<compile_context>
chip_gen: v5e
topology: v5e:2x2
jax: 0.10.0
libtpu: 0.0.40
codegen_flags: <defaults>
</compile_context>

<pallas_src>
import jax
import jax.numpy as jnp
from jax import lax
from jax.experimental import pallas as pl
from jax.experimental.pallas import tpu as pltpu


# ---------------------------------------------------------------------------
# Static geometry (the module hardcodes 28x28 single-channel input)
# ---------------------------------------------------------------------------
def _geom(hin, win):
    ho, wo = (hin - 1) // 2, (win - 1) // 2        # pooled output size (floor)
    rows = (2 * ho - 1) * win + 2 * wo             # conv-output rows the pool reads
    return ho, wo, rows


_HO1, _WO1, _R1 = _geom(28, 28)    # 13, 13, 726
_HO2, _WO2, _R2 = _geom(13, 13)    # 6,  6,  155
_HO3, _WO3, _R3 = _geom(6, 6)      # 2,  2,  22

_PARAM_ORDER = ("w1", "b1", "w2", "b2", "w3", "b3",
                "fc1_w", "fc1_b", "fc2_w", "fc2_b")


# ---------------------------------------------------------------------------
# Fused kernel: per-image conv1/2/3 + pools, batched fc1 -> relu -> fc2
# ---------------------------------------------------------------------------
def _net_kernel(x_ref, w1, b1, w2, b2, w3, b3, fc1w, fc1b, fc2w, fc2b,
                out_ref, ys1, a2, ys2, a3, ys3, feat):
    bb = out_ref.shape[0]                          # images per grid step

    def pooled_block(ys_ref, win, wo, bias, i):
        """Pooled row i of a 2x2/s2 max-pool over conv-output rows, + bias/ReLU.

        Conv-output row r corresponds to spatial (h, w) = (r // win, r % win);
        the strided reads only ever touch valid (h <= hin-2, w <= win-2) rows.
        Bias + ReLU commute with the max, so they are applied once per pooled
        block instead of on the full conv output.
        """
        base = 2 * i * win
        m = ys_ref[pl.ds(base, wo, stride=2), :]
        for off in (1, win, win + 1):
            m = jnp.maximum(m, ys_ref[pl.ds(base + off, wo, stride=2), :])
        return jnp.maximum(m + bias, 0.0)

    def tap_slab(src_ref, win, rows):
        """im2col for a 2x2 valid conv: lane-concat of the 4 tap-shifted row
        windows -> (rows, 4*Cin); the conv becomes ONE K=4*Cin MXU matmul.
        Each unaligned sublane shift happens exactly once per stage."""
        return jnp.concatenate(
            [src_ref[pl.ds(off, rows), :] for off in (0, 1, win, win + 1)],
            axis=1)

    @pl.loop(0, bb)
    def _per_image(b):
        # ---- stage 1: 28x28x1 -> 13x13x32 (taps pre-packed on lanes) -------
        ys1[...] = jnp.dot(x_ref[b], w1[...], preferred_element_type=jnp.float32)
        bias1 = b1[...]
        for i in range(_HO1):
            a2[pl.ds(i * _WO1, _WO1), :] = pooled_block(ys1, 28, _WO1, bias1, i)

        # ---- stage 2: 13x13x32 -> 6x6x64 (single K=128 matmul) -------------
        ys2[...] = jnp.dot(tap_slab(a2, 13, _R2), w2[...],
                           preferred_element_type=jnp.float32)
        bias2 = b2[...]
        for i in range(_HO2):
            a3[pl.ds(i * _WO2, _WO2), :] = pooled_block(ys2, 13, _WO2, bias2, i)

        # ---- stage 3: 6x6x64 -> 2x2x128 (single K=256 matmul) --------------
        ys3[...] = jnp.dot(tap_slab(a3, 6, _R3), w3[...],
                           preferred_element_type=jnp.float32)
        bias3 = b3[...]
        rows = []
        for i in range(_HO3):
            p = pooled_block(ys3, 6, _WO3, bias3, i)       # (2, 128)
            for j in range(_WO3):
                rows.append(p[j:j + 1, :])
        # flatten to (1,512) with feature index (h*2+w)*128 + c; the PyTorch
        # (c,h,w) flatten order is folded into the prepared fc1 weights.
        feat[pl.ds(b, 1), :] = jnp.concatenate(rows, axis=1)

    # ---- batched fully-connected head ---------------------------------------
    h = jnp.maximum(
        jnp.dot(feat[...], fc1w[...], preferred_element_type=jnp.float32)
        + fc1b[...], 0.0)
    out_ref[...] = (jnp.dot(h, fc2w[...], preferred_element_type=jnp.float32)
                    + fc2b[...])


# ---------------------------------------------------------------------------
# Parameters: raw PyTorch-layout params + one-time preparation for the kernel
# ---------------------------------------------------------------------------
def init_params(key):
    ks = jax.random.split(key, 10)
    s = 0.05
    return {
        "conv1_w": jax.random.normal(ks[0], (32, 1, 2, 2), jnp.float32) * s,
        "conv1_b": jax.random.normal(ks[1], (32,), jnp.float32) * s,
        "conv2_w": jax.random.normal(ks[2], (64, 32, 2, 2), jnp.float32) * s,
        "conv2_b": jax.random.normal(ks[3], (64,), jnp.float32) * s,
        "conv3_w": jax.random.normal(ks[4], (128, 64, 2, 2), jnp.float32) * s,
        "conv3_b": jax.random.normal(ks[5], (128,), jnp.float32) * s,
        # PyTorch Linear stores (out, in); forward is x @ W.T + b
        "fc1_w": jax.random.normal(ks[6], (512, 512), jnp.float32) * s,
        "fc1_b": jax.random.normal(ks[7], (512,), jnp.float32) * s,
        "fc2_w": jax.random.normal(ks[8], (10, 512), jnp.float32) * s,
        "fc2_b": jax.random.normal(ks[9], (10,), jnp.float32) * s,
    }


def prepare_params(raw):
    """Fold all layout transposes / flatten order / padding into the weights."""
    prep = {}
    # conv weights: OIHW -> (4*Cin, Cout) with row = (kh*2+kw)*Cin + cin
    for idx, name in enumerate(("conv1", "conv2", "conv3"), start=1):
        w = raw[f"{name}_w"]                                  # (Cout, Cin, 2, 2)
        cout, cin = w.shape[0], w.shape[1]
        prep[f"w{idx}"] = jnp.transpose(w, (2, 3, 1, 0)).reshape(4 * cin, cout)
        prep[f"b{idx}"] = raw[f"{name}_b"].reshape(1, cout)

    # fc1: PyTorch flatten is (c, h, w); kernel feature index is (h*2+w)*128 + c
    fc1 = raw["fc1_w"].reshape(512, 128, 2, 2)                # (o, c, h, w)
    prep["fc1_w"] = jnp.transpose(fc1, (2, 3, 1, 0)).reshape(512, 512)
    prep["fc1_b"] = raw["fc1_b"].reshape(1, 512)

    # fc2: (10,512) -> (512,128) zero-padded so the output store is lane-dense
    prep["fc2_w"] = jnp.zeros((512, 128), jnp.float32).at[:, :10].set(raw["fc2_w"].T)
    prep["fc2_b"] = jnp.zeros((1, 128), jnp.float32).at[:, :10].set(raw["fc2_b"])
    return prep


# ---------------------------------------------------------------------------
# Forward pass: one fused pallas_call, grid over batch blocks of `block_b`
# ---------------------------------------------------------------------------
def net_forward(prep, x_nchw, *, block_b=8):
    n = x_nchw.shape[0]
    bb = max(8, -(-block_b // 8) * 8)              # keep the out block 8-aligned
    n_pad = -(-n // bb) * bb

    xf = x_nchw.reshape(n, 28 * 28).astype(jnp.float32)
    if n_pad != n:
        xf = jnp.pad(xf, ((0, n_pad - n), (0, 0)))

    # Pre-pack the 4 conv1 tap windows on the lane axis (layout plumbing only):
    # tap t at (kh,kw) reads flat pixel (h*28+w) + kh*28 + kw.
    x_taps = jnp.stack([xf[:, o:o + _R1] for o in (0, 1, 28, 29)], axis=-1)

    rep2d = lambda a: pl.BlockSpec(a.shape, lambda i: (0, 0))

    out = pl.pallas_call(
        _net_kernel,
        out_shape=jax.ShapeDtypeStruct((n_pad, 128), jnp.float32),
        grid=(n_pad // bb,),
        in_specs=[pl.BlockSpec((bb, _R1, 4), lambda i: (i, 0, 0))]
        + [rep2d(prep[k]) for k in _PARAM_ORDER],
        out_specs=pl.BlockSpec((bb, 128), lambda i: (i, 0)),
        scratch_shapes=[
            pltpu.VMEM((_R1, 32), jnp.float32),           # conv1 output rows
            pltpu.VMEM((_HO1 * _WO1, 32), jnp.float32),   # stage-2 input (169,32)
            pltpu.VMEM((_R2, 64), jnp.float32),           # conv2 output rows
            pltpu.VMEM((_HO2 * _WO2, 64), jnp.float32),   # stage-3 input (36,64)
            pltpu.VMEM((_R3, 128), jnp.float32),          # conv3 output rows
            pltpu.VMEM((bb, 512), jnp.float32),           # per-block fc features
        ],
        compiler_params=pltpu.CompilerParams(
            dimension_semantics=("parallel",),
            vmem_limit_bytes=32 * 1024 * 1024),
    )(x_taps, *[prep[k] for k in _PARAM_ORDER])

    return out[:n, :10]


# ---------------------------------------------------------------------------
# Pure-JAX reference (correctness sanity check)
# ---------------------------------------------------------------------------
def net_forward_ref(params, x_nchw):
    dn = ("NHWC", "HWIO", "NHWC")

    def conv_relu(x, w_oihw, b):
        w = jnp.transpose(w_oihw, (2, 3, 1, 0))  # OIHW -> HWIO
        y = lax.conv_general_dilated(x, w, (1, 1), "VALID", dimension_numbers=dn)
        return jnp.maximum(y + b, 0.0)

    def pool(x):
        return lax.reduce_window(
            x, -jnp.inf, lax.max, (1, 2, 2, 1), (1, 2, 2, 1), "VALID")

    n = x_nchw.shape[0]
    x = jnp.transpose(x_nchw, (0, 2, 3, 1))
    x = pool(conv_relu(x, params["conv1_w"], params["conv1_b"]))
    x = pool(conv_relu(x, params["conv2_w"], params["conv2_b"]))
    x = pool(conv_relu(x, params["conv3_w"], params["conv3_b"]))
    x = jnp.transpose(x, (0, 3, 1, 2)).reshape(n, 512)
    x = jnp.maximum(x @ params["fc1_w"].T + params["fc1_b"], 0.0)
    return x @ params["fc2_w"].T + params["fc2_b"]


if __name__ == "__main__":
    key = jax.random.PRNGKey(0)
    k_param, k_x = jax.random.split(key)
    raw_params = init_params(k_param)
    prep_params = prepare_params(raw_params)

    # 16 single-channel 28x28 images -> block_b=8 -> grid of 2 (feeds both
    # v7x TensorCores; single-TC v5e/v6e just iterate).
    x = jax.random.normal(k_x, (16, 1, 28, 28), jnp.float32)

    out = jax.block_until_ready(jax.jit(net_forward)(prep_params, x))
    assert out.shape == (16, 10), out.shape

    ref = jax.block_until_ready(net_forward_ref(raw_params, x))
    err = float(jnp.max(jnp.abs(out - ref)))
    assert jnp.allclose(out, ref, atol=1e-3, rtol=1e-3), err

    print("KERNEL_OK")
</pallas_src>

<mosaic_0001>
module attributes {stable_mosaic.version = 11 : i64} {
  func.func @_net_kernel(%arg0: i32, %arg1: memref<8x726x4xf32, #tpu.memory_space<vmem>>, %arg2: memref<4x32xf32, #tpu.memory_space<vmem>>, %arg3: memref<1x32xf32, #tpu.memory_space<vmem>>, %arg4: memref<128x64xf32, #tpu.memory_space<vmem>>, %arg5: memref<1x64xf32, #tpu.memory_space<vmem>>, %arg6: memref<256x128xf32, #tpu.memory_space<vmem>>, %arg7: memref<1x128xf32, #tpu.memory_space<vmem>>, %arg8: memref<512x512xf32, #tpu.memory_space<vmem>>, %arg9: memref<1x512xf32, #tpu.memory_space<vmem>>, %arg10: memref<512x128xf32, #tpu.memory_space<vmem>>, %arg11: memref<1x128xf32, #tpu.memory_space<vmem>>, %arg12: memref<8x128xf32, #tpu.memory_space<vmem>>, %arg13: memref<726x32xf32, #tpu.memory_space<vmem>>, %arg14: memref<169x32xf32, #tpu.memory_space<vmem>>, %arg15: memref<155x64xf32, #tpu.memory_space<vmem>>, %arg16: memref<36x64xf32, #tpu.memory_space<vmem>>, %arg17: memref<22x128xf32, #tpu.memory_space<vmem>>, %arg18: memref<8x512xf32, #tpu.memory_space<vmem>>) attributes {dimension_semantics = [#tpu.dimension_semantics<parallel>], iteration_bounds = array<i64: 2>, scalar_prefetch = 0 : i64, scratch_operands = 6 : i64, tpu.core_type = #tpu.core_type<tc>, window_params = [{transform_indices = @transform_0, window_bounds = array<i64: 8, 726, 4>}, {pipeline_mode = #tpu.pipeline_mode<synchronous>, transform_indices = @transform_1, window_bounds = array<i64: 4, 32>}, {pipeline_mode = #tpu.pipeline_mode<synchronous>, transform_indices = @transform_2, window_bounds = array<i64: 1, 32>}, {pipeline_mode = #tpu.pipeline_mode<synchronous>, transform_indices = @transform_3, window_bounds = array<i64: 128, 64>}, {pipeline_mode = #tpu.pipeline_mode<synchronous>, transform_indices = @transform_4, window_bounds = array<i64: 1, 64>}, {pipeline_mode = #tpu.pipeline_mode<synchronous>, transform_indices = @transform_5, window_bounds = array<i64: 256, 128>}, {pipeline_mode = #tpu.pipeline_mode<synchronous>, transform_indices = @transform_6, window_bounds = array<i64: 1, 128>}, {pipeline_mode = #tpu.pipeline_mode<synchronous>, transform_indices = @transform_7, window_bounds = array<i64: 512, 512>}, {pipeline_mode = #tpu.pipeline_mode<synchronous>, transform_indices = @transform_8, window_bounds = array<i64: 1, 512>}, {pipeline_mode = #tpu.pipeline_mode<synchronous>, transform_indices = @transform_9, window_bounds = array<i64: 512, 128>}, {pipeline_mode = #tpu.pipeline_mode<synchronous>, transform_indices = @transform_10, window_bounds = array<i64: 1, 128>}, {transform_indices = @transform_11, window_bounds = array<i64: 8, 128>}]} {
    %c0_i32 = arith.constant 0 : i32
    %c8_i32 = arith.constant 8 : i32
    %0 = arith.addi %c0_i32, %c8_i32 : i32
    %c1_i32 = arith.constant 1 : i32
    scf.for %arg19 = %c0_i32 to %0 step %c1_i32  : i32 {
      %c1_i32_14 = arith.constant 1 : i32
      %15 = arith.muli %arg19, %c1_i32_14 : i32
      %c0_i32_15 = arith.constant 0 : i32
      %16 = arith.addi %c0_i32_15, %15 : i32
      %17 = arith.index_cast %16 : i32 to index
      %c0_16 = arith.constant 0 : index
      %c0_17 = arith.constant 0 : index
      %18 = vector.load %arg1[%17, %c0_16, %c0_17] : memref<8x726x4xf32, #tpu.memory_space<vmem>>, vector<1x726x4xf32>
      %19 = vector.shape_cast %18 : vector<1x726x4xf32> to vector<726x4xf32>
      %c0_18 = arith.constant 0 : index
      %c0_19 = arith.constant 0 : index
      %20 = vector.load %arg2[%c0_18, %c0_19] : memref<4x32xf32, #tpu.memory_space<vmem>>, vector<4x32xf32>
      %cst_20 = arith.constant dense<0.000000e+00> : vector<726x32xf32>
      %21 = tpu.matmul %19, %20, %cst_20 {dimension_numbers = #tpu.dot_dimension_numbers<[1], [0], [0], [1], [0, 0, 1, 1], [], []>} : vector<726x4xf32>, vector<4x32xf32>, vector<726x32xf32> -> vector<726x32xf32>
      %c0_21 = arith.constant 0 : index
      %c0_22 = arith.constant 0 : index
      %22 = vector.load %arg13[%c0_21, %c0_22] : memref<726x32xf32, #tpu.memory_space<vmem>>, vector<726x32xf32>
      tpu.vector_store %arg13[%c0_21, %c0_22], %21 {strides = array<i32>} : memref<726x32xf32, #tpu.memory_space<vmem>>, vector<726x32xf32>,
      %c0_23 = arith.constant 0 : index
      %c0_24 = arith.constant 0 : index
      %23 = vector.load %arg3[%c0_23, %c0_24] : memref<1x32xf32, #tpu.memory_space<vmem>>, vector<1x32xf32>
      %c0_25 = arith.constant 0 : index
      %c0_26 = arith.constant 0 : index
      %24 = tpu.strided_load %arg13[%c0_25, %c0_26] {strides = array<i32: 2, 1>} : memref<726x32xf32, #tpu.memory_space<vmem>>, vector<13x32xf32>
      %c1 = arith.constant 1 : index
      %c0_27 = arith.constant 0 : index
      %25 = tpu.strided_load %arg13[%c1, %c0_27] {strides = array<i32: 2, 1>} : memref<726x32xf32, #tpu.memory_space<vmem>>, vector<13x32xf32>
      %26 = arith.maximumf %24, %25 : vector<13x32xf32>
      %c28 = arith.constant 28 : index
      %c0_28 = arith.constant 0 : index
      %27 = tpu.strided_load %arg13[%c28, %c0_28] {strides = array<i32: 2, 1>} : memref<726x32xf32, #tpu.memory_space<vmem>>, vector<13x32xf32>
      %28 = arith.maximumf %26, %27 : vector<13x32xf32>
      %c29 = arith.constant 29 : index
      %c0_29 = arith.constant 0 : index
      %29 = tpu.strided_load %arg13[%c29, %c0_29] {strides = array<i32: 2, 1>} : memref<726x32xf32, #tpu.memory_space<vmem>>, vector<13x32xf32>
      %30 = arith.maximumf %28, %29 : vector<13x32xf32>
      %31 = vector.broadcast %23 : vector<1x32xf32> to vector<13x32xf32>
      %32 = arith.addf %30, %31 : vector<13x32xf32>
      %cst_30 = arith.constant 0.000000e+00 : f32
      %33 = vector.broadcast %cst_30 : f32 to vector<13x32xf32>
      %34 = arith.maximumf %32, %33 : vector<13x32xf32>
      %c0_31 = arith.constant 0 : index
      %c0_32 = arith.constant 0 : index
      %35 = vector.load %arg14[%c0_31, %c0_32] : memref<169x32xf32, #tpu.memory_space<vmem>>, vector<13x32xf32>
      tpu.vector_store %arg14[%c0_31, %c0_32], %34 {strides = array<i32>} : memref<169x32xf32, #tpu.memory_space<vmem>>, vector<13x32xf32>,
      %c56 = arith.constant 56 : index
      %c0_33 = arith.constant 0 : index
      %36 = tpu.strided_load %arg13[%c56, %c0_33] {strides = array<i32: 2, 1>} : memref<726x32xf32, #tpu.memory_space<vmem>>, vector<13x32xf32>
      %c57 = arith.constant 57 : index
      %c0_34 = arith.constant 0 : index
      %37 = tpu.strided_load %arg13[%c57, %c0_34] {strides = array<i32: 2, 1>} : memref<726x32xf32, #tpu.memory_space<vmem>>, vector<13x32xf32>
      %38 = arith.maximumf %36, %37 : vector<13x32xf32>
      %c84 = arith.constant 84 : index
      %c0_35 = arith.constant 0 : index
      %39 = tpu.strided_load %arg13[%c84, %c0_35] {strides = array<i32: 2, 1>} : memref<726x32xf32, #tpu.memory_space<vmem>>, vector<13x32xf32>
      %40 = arith.maximumf %38, %39 : vector<13x32xf32>
      %c85 = arith.constant 85 : index
      %c0_36 = arith.constant 0 : index
      %41 = tpu.strided_load %arg13[%c85, %c0_36] {strides = array<i32: 2, 1>} : memref<726x32xf32, #tpu.memory_space<vmem>>, vector<13x32xf32>
      %42 = arith.maximumf %40, %41 : vector<13x32xf32>
      %43 = vector.broadcast %23 : vector<1x32xf32> to vector<13x32xf32>
      %44 = arith.addf %42, %43 : vector<13x32xf32>
      %cst_37 = arith.constant 0.000000e+00 : f32
      %45 = vector.broadcast %cst_37 : f32 to vector<13x32xf32>
      %46 = arith.maximumf %44, %45 : vector<13x32xf32>
      %c13 = arith.constant 13 : index
      %c0_38 = arith.constant 0 : index
      %47 = vector.load %arg14[%c13, %c0_38] : memref<169x32xf32, #tpu.memory_space<vmem>>, vector<13x32xf32>
      tpu.vector_store %arg14[%c13, %c0_38], %46 {strides = array<i32>} : memref<169x32xf32, #tpu.memory_space<vmem>>, vector<13x32xf32>,
      %c112 = arith.constant 112 : index
      %c0_39 = arith.constant 0 : index
      %48 = tpu.strided_load %arg13[%c112, %c0_39] {strides = array<i32: 2, 1>} : memref<726x32xf32, #tpu.memory_space<vmem>>, vector<13x32xf32>
      %c113 = arith.constant 113 : index
      %c0_40 = arith.constant 0 : index
      %49 = tpu.strided_load %arg13[%c113, %c0_40] {strides = array<i32: 2, 1>} : memref<726x32xf32, #tpu.memory_space<vmem>>, vector<13x32xf32>
      %50 = arith.maximumf %48, %49 : vector<13x32xf32>
      %c140 = arith.constant 140 : index
      %c0_41 = arith.constant 0 : index
      %51 = tpu.strided_load %arg13[%c140, %c0_41] {strides = array<i32: 2, 1>} : memref<726x32xf32, #tpu.memory_space<vmem>>, vector<13x32xf32>
      %52 = arith.maximumf %50, %51 : vector<13x32xf32>
      %c141 = arith.constant 141 : index
      %c0_42 = arith.constant 0 : index
      %53 = tpu.strided_load %arg13[%c141, %c0_42] {strides = array<i32: 2, 1>} : memref<726x32xf32, #tpu.memory_space<vmem>>, vector<13x32xf32>
      %54 = arith.maximumf %52, %53 : vector<13x32xf32>
      %55 = vector.broadcast %23 : vector<1x32xf32> to vector<13x32xf32>
      %56 = arith.addf %54, %55 : vector<13x32xf32>
      %cst_43 = arith.constant 0.000000e+00 : f32
      %57 = vector.broadcast %cst_43 : f32 to vector<13x32xf32>
      %58 = arith.maximumf %56, %57 : vector<13x32xf32>
      %c26 = arith.constant 26 : index
      %c0_44 = arith.constant 0 : index
      %59 = vector.load %arg14[%c26, %c0_44] : memref<169x32xf32, #tpu.memory_space<vmem>>, vector<13x32xf32>
      tpu.vector_store %arg14[%c26, %c0_44], %58 {strides = array<i32>} : memref<169x32xf32, #tpu.memory_space<vmem>>, vector<13x32xf32>,
      %c168 = arith.constant 168 : index
      %c0_45 = arith.constant 0 : index
      %60 = tpu.strided_load %arg13[%c168, %c0_45] {strides = array<i32: 2, 1>} : memref<726x32xf32, #tpu.memory_space<vmem>>, vector<13x32xf32>
      %c169 = arith.constant 169 : index
      %c0_46 = arith.constant 0 : index
      %61 = tpu.strided_load %arg13[%c169, %c0_46] {strides = array<i32: 2, 1>} : memref<726x32xf32, #tpu.memory_space<vmem>>, vector<13x32xf32>
      %62 = arith.maximumf %60, %61 : vector<13x32xf32>
      %c196 = arith.constant 196 : index
      %c0_47 = arith.constant 0 : index
      %63 = tpu.strided_load %arg13[%c196, %c0_47] {strides = array<i32: 2, 1>} : memref<726x32xf32, #tpu.memory_space<vmem>>, vector<13x32xf32>
      %64 = arith.maximumf %62, %63 : vector<13x32xf32>
      %c197 = arith.constant 197 : index
      %c0_48 = arith.constant 0 : index
      %65 = tpu.strided_load %arg13[%c197, %c0_48] {strides = array<i32: 2, 1>} : memref<726x32xf32, #tpu.memory_space<vmem>>, vector<13x32xf32>
      %66 = arith.maximumf %64, %65 : vector<13x32xf32>
      %67 = vector.broadcast %23 : vector<1x32xf32> to vector<13x32xf32>
      %68 = arith.addf %66, %67 : vector<13x32xf32>
      %cst_49 = arith.constant 0.000000e+00 : f32
      %69 = vector.broadcast %cst_49 : f32 to vector<13x32xf32>
      %70 = arith.maximumf %68, %69 : vector<13x32xf32>
      %c39 = arith.constant 39 : index
      %c0_50 = arith.constant 0 : index
      %71 = vector.load %arg14[%c39, %c0_50] : memref<169x32xf32, #tpu.memory_space<vmem>>, vector<13x32xf32>
      tpu.vector_store %arg14[%c39, %c0_50], %70 {strides = array<i32>} : memref<169x32xf32, #tpu.memory_space<vmem>>, vector<13x32xf32>,
      %c224 = arith.constant 224 : index
      %c0_51 = arith.constant 0 : index
      %72 = tpu.strided_load %arg13[%c224, %c0_51] {strides = array<i32: 2, 1>} : memref<726x32xf32, #tpu.memory_space<vmem>>, vector<13x32xf32>
      %c225 = arith.constant 225 : index
      %c0_52 = arith.constant 0 : index
      %73 = tpu.strided_load %arg13[%c225, %c0_52] {strides = array<i32: 2, 1>} : memref<726x32xf32, #tpu.memory_space<vmem>>, vector<13x32xf32>
      %74 = arith.maximumf %72, %73 : vector<13x32xf32>
      %c252 = arith.constant 252 : index
      %c0_53 = arith.constant 0 : index
      %75 = tpu.strided_load %arg13[%c252, %c0_53] {strides = array<i32: 2, 1>} : memref<726x32xf32, #tpu.memory_space<vmem>>, vector<13x32xf32>
      %76 = arith.maximumf %74, %75 : vector<13x32xf32>
      %c253 = arith.constant 253 : index
      %c0_54 = arith.constant 0 : index
      %77 = tpu.strided_load %arg13[%c253, %c0_54] {strides = array<i32: 2, 1>} : memref<726x32xf32, #tpu.memory_space<vmem>>, vector<13x32xf32>
      %78 = arith.maximumf %76, %77 : vector<13x32xf32>
      %79 = vector.broadcast %23 : vector<1x32xf32> to vector<13x32xf32>
      %80 = arith.addf %78, %79 : vector<13x32xf32>
      %cst_55 = arith.constant 0.000000e+00 : f32
      %81 = vector.broadcast %cst_55 : f32 to vector<13x32xf32>
      %82 = arith.maximumf %80, %81 : vector<13x32xf32>
      %c52 = arith.constant 52 : index
      %c0_56 = arith.constant 0 : index
      %83 = vector.load %arg14[%c52, %c0_56] : memref<169x32xf32, #tpu.memory_space<vmem>>, vector<13x32xf32>
      tpu.vector_store %arg14[%c52, %c0_56], %82 {strides = array<i32>} : memref<169x32xf32, #tpu.memory_space<vmem>>, vector<13x32xf32>,
      %c280 = arith.constant 280 : index
      %c0_57 = arith.constant 0 : index
      %84 = tpu.strided_load %arg13[%c280, %c0_57] {strides = array<i32: 2, 1>} : memref<726x32xf32, #tpu.memory_space<vmem>>, vector<13x32xf32>
      %c281 = arith.constant 281 : index
      %c0_58 = arith.constant 0 : index
      %85 = tpu.strided_load %arg13[%c281, %c0_58] {strides = array<i32: 2, 1>} : memref<726x32xf32, #tpu.memory_space<vmem>>, vector<13x32xf32>
      %86 = arith.maximumf %84, %85 : vector<13x32xf32>
      %c308 = arith.constant 308 : index
      %c0_59 = arith.constant 0 : index
      %87 = tpu.strided_load %arg13[%c308, %c0_59] {strides = array<i32: 2, 1>} : memref<726x32xf32, #tpu.memory_space<vmem>>, vector<13x32xf32>
      %88 = arith.maximumf %86, %87 : vector<13x32xf32>
      %c309 = arith.constant 309 : index
      %c0_60 = arith.constant 0 : index
      %89 = tpu.strided_load %arg13[%c309, %c0_60] {strides = array<i32: 2, 1>} : memref<726x32xf32, #tpu.memory_space<vmem>>, vector<13x32xf32>
      %90 = arith.maximumf %88, %89 : vector<13x32xf32>
      %91 = vector.broadcast %23 : vector<1x32xf32> to vector<13x32xf32>
      %92 = arith.addf %90, %91 : vector<13x32xf32>
      %cst_61 = arith.constant 0.000000e+00 : f32
      %93 = vector.broadcast %cst_61 : f32 to vector<13x32xf32>
      %94 = arith.maximumf %92, %93 : vector<13x32xf32>
      %c65 = arith.constant 65 : index
      %c0_62 = arith.constant 0 : index
      %95 = vector.load %arg14[%c65, %c0_62] : memref<169x32xf32, #tpu.memory_space<vmem>>, vector<13x32xf32>
      tpu.vector_store %arg14[%c65, %c0_62], %94 {strides = array<i32>} : memref<169x32xf32, #tpu.memory_space<vmem>>, vector<13x32xf32>,
      %c336 = arith.constant 336 : index
      %c0_63 = arith.constant 0 : index
      %96 = tpu.strided_load %arg13[%c336, %c0_63] {strides = array<i32: 2, 1>} : memref<726x32xf32, #tpu.memory_space<vmem>>, vector<13x32xf32>
      %c337 = arith.constant 337 : index
      %c0_64 = arith.constant 0 : index
      %97 = tpu.strided_load %arg13[%c337, %c0_64] {strides = array<i32: 2, 1>} : memref<726x32xf32, #tpu.memory_space<vmem>>, vector<13x32xf32>
      %98 = arith.maximumf %96, %97 : vector<13x32xf32>
      %c364 = arith.constant 364 : index
      %c0_65 = arith.constant 0 : index
      %99 = tpu.strided_load %arg13[%c364, %c0_65] {strides = array<i32: 2, 1>} : memref<726x32xf32, #tpu.memory_space<vmem>>, vector<13x32xf32>
      %100 = arith.maximumf %98, %99 : vector<13x32xf32>
      %c365 = arith.constant 365 : index
      %c0_66 = arith.constant 0 : index
      %101 = tpu.strided_load %arg13[%c365, %c0_66] {strides = array<i32: 2, 1>} : memref<726x32xf32, #tpu.memory_space<vmem>>, vector<13x32xf32>
      %102 = arith.maximumf %100, %101 : vector<13x32xf32>
      %103 = vector.broadcast %23 : vector<1x32xf32> to vector<13x32xf32>
      %104 = arith.addf %102, %103 : vector<13x32xf32>
      %cst_67 = arith.constant 0.000000e+00 : f32
      %105 = vector.broadcast %cst_67 : f32 to vector<13x32xf32>
      %106 = arith.maximumf %104, %105 : vector<13x32xf32>
      %c78 = arith.constant 78 : index
      %c0_68 = arith.constant 0 : index
      %107 = vector.load %arg14[%c78, %c0_68] : memref<169x32xf32, #tpu.memory_space<vmem>>, vector<13x32xf32>
      tpu.vector_store %arg14[%c78, %c0_68], %106 {strides = array<i32>} : memref<169x32xf32, #tpu.memory_space<vmem>>, vector<13x32xf32>,
      %c392 = arith.constant 392 : index
      %c0_69 = arith.constant 0 : index
      %108 = tpu.strided_load %arg13[%c392, %c0_69] {strides = array<i32: 2, 1>} : memref<726x32xf32, #tpu.memory_space<vmem>>, vector<13x32xf32>
      %c393 = arith.constant 393 : index
      %c0_70 = arith.constant 0 : index
      %109 = tpu.strided_load %arg13[%c393, %c0_70] {strides = array<i32: 2, 1>} : memref<726x32xf32, #tpu.memory_space<vmem>>, vector<13x32xf32>
      %110 = arith.maximumf %108, %109 : vector<13x32xf32>
      %c420 = arith.constant 420 : index
      %c0_71 = arith.constant 0 : index
      %111 = tpu.strided_load %arg13[%c420, %c0_71] {strides = array<i32: 2, 1>} : memref<726x32xf32, #tpu.memory_space<vmem>>, vector<13x32xf32>
      %112 = arith.maximumf %110, %111 : vector<13x32xf32>
      %c421 = arith.constant 421 : index
      %c0_72 = arith.constant 0 : index
      %113 = tpu.strided_load %arg13[%c421, %c0_72] {strides = array<i32: 2, 1>} : memref<726x32xf32, #tpu.memory_space<vmem>>, vector<13x32xf32>
      %114 = arith.maximumf %112, %113 : vector<13x32xf32>
      %115 = vector.broadcast %23 : vector<1x32xf32> to vector<13x32xf32>
      %116 = arith.addf %114, %115 : vector<13x32xf32>
      %cst_73 = arith.constant 0.000000e+00 : f32
      %117 = vector.broadcast %cst_73 : f32 to vector<13x32xf32>
      %118 = arith.maximumf %116, %117 : vector<13x32xf32>
      %c91 = arith.constant 91 : index
      %c0_74 = arith.constant 0 : index
      %119 = vector.load %arg14[%c91, %c0_74] : memref<169x32xf32, #tpu.memory_space<vmem>>, vector<13x32xf32>
      tpu.vector_store %arg14[%c91, %c0_74], %118 {strides = array<i32>} : memref<169x32xf32, #tpu.memory_space<vmem>>, vector<13x32xf32>,
      %c448 = arith.constant 448 : index
      %c0_75 = arith.constant 0 : index
      %120 = tpu.strided_load %arg13[%c448, %c0_75] {strides = array<i32: 2, 1>} : memref<726x32xf32, #tpu.memory_space<vmem>>, vector<13x32xf32>
      %c449 = arith.constant 449 : index
      %c0_76 = arith.constant 0 : index
      %121 = tpu.strided_load %arg13[%c449, %c0_76] {strides = array<i32: 2, 1>} : memref<726x32xf32, #tpu.memory_space<vmem>>, vector<13x32xf32>
      %122 = arith.maximumf %120, %121 : vector<13x32xf32>
      %c476 = arith.constant 476 : index
      %c0_77 = arith.constant 0 : index
      %123 = tpu.strided_load %arg13[%c476, %c0_77] {strides = array<i32: 2, 1>} : memref<726x32xf32, #tpu.memory_space<vmem>>, vector<13x32xf32>
      %124 = arith.maximumf %122, %123 : vector<13x32xf32>
      %c477 = arith.constant 477 : index
      %c0_78 = arith.constant 0 : index
      %125 = tpu.strided_load %arg13[%c477, %c0_78] {strides = array<i32: 2, 1>} : memref<726x32xf32, #tpu.memory_space<vmem>>, vector<13x32xf32>
      %126 = arith.maximumf %124, %125 : vector<13x32xf32>
      %127 = vector.broadcast %23 : vector<1x32xf32> to vector<13x32xf32>
      %128 = arith.addf %126, %127 : vector<13x32xf32>
      %cst_79 = arith.constant 0.000000e+00 : f32
      %129 = vector.broadcast %cst_79 : f32 to vector<13x32xf32>
      %130 = arith.maximumf %128, %129 : vector<13x32xf32>
      %c104 = arith.constant 104 : index
      %c0_80 = arith.constant 0 : index
      %131 = vector.load %arg14[%c104, %c0_80] : memref<169x32xf32, #tpu.memory_space<vmem>>, vector<13x32xf32>
      tpu.vector_store %arg14[%c104, %c0_80], %130 {strides = array<i32>} : memref<169x32xf32, #tpu.memory_space<vmem>>, vector<13x32xf32>,
      %c504 = arith.constant 504 : index
      %c0_81 = arith.constant 0 : index
      %132 = tpu.strided_load %arg13[%c504, %c0_81] {strides = array<i32: 2, 1>} : memref<726x32xf32, #tpu.memory_space<vmem>>, vector<13x32xf32>
      %c505 = arith.constant 505 : index
      %c0_82 = arith.constant 0 : index
      %133 = tpu.strided_load %arg13[%c505, %c0_82] {strides = array<i32: 2, 1>} : memref<726x32xf32, #tpu.memory_space<vmem>>, vector<13x32xf32>
      %134 = arith.maximumf %132, %133 : vector<13x32xf32>
      %c532 = arith.constant 532 : index
      %c0_83 = arith.constant 0 : index
      %135 = tpu.strided_load %arg13[%c532, %c0_83] {strides = array<i32: 2, 1>} : memref<726x32xf32, #tpu.memory_space<vmem>>, vector<13x32xf32>
      %136 = arith.maximumf %134, %135 : vector<13x32xf32>
      %c533 = arith.constant 533 : index
      %c0_84 = arith.constant 0 : index
      %137 = tpu.strided_load %arg13[%c533, %c0_84] {strides = array<i32: 2, 1>} : memref<726x32xf32, #tpu.memory_space<vmem>>, vector<13x32xf32>
      %138 = arith.maximumf %136, %137 : vector<13x32xf32>
      %139 = vector.broadcast %23 : vector<1x32xf32> to vector<13x32xf32>
      %140 = arith.addf %138, %139 : vector<13x32xf32>
      %cst_85 = arith.constant 0.000000e+00 : f32
      %141 = vector.broadcast %cst_85 : f32 to vector<13x32xf32>
      %142 = arith.maximumf %140, %141 : vector<13x32xf32>
      %c117 = arith.constant 117 : index
      %c0_86 = arith.constant 0 : index
      %143 = vector.load %arg14[%c117, %c0_86] : memref<169x32xf32, #tpu.memory_space<vmem>>, vector<13x32xf32>
      tpu.vector_store %arg14[%c117, %c0_86], %142 {strides = array<i32>} : memref<169x32xf32, #tpu.memory_space<vmem>>, vector<13x32xf32>,
      %c560 = arith.constant 560 : index
      %c0_87 = arith.constant 0 : index
      %144 = tpu.strided_load %arg13[%c560, %c0_87] {strides = array<i32: 2, 1>} : memref<726x32xf32, #tpu.memory_space<vmem>>, vector<13x32xf32>
      %c561 = arith.constant 561 : index
      %c0_88 = arith.constant 0 : index
      %145 = tpu.strided_load %arg13[%c561, %c0_88] {strides = array<i32: 2, 1>} : memref<726x32xf32, #tpu.memory_space<vmem>>, vector<13x32xf32>
      %146 = arith.maximumf %144, %145 : vector<13x32xf32>
      %c588 = arith.constant 588 : index
      %c0_89 = arith.constant 0 : index
      %147 = tpu.strided_load %arg13[%c588, %c0_89] {strides = array<i32: 2, 1>} : memref<726x32xf32, #tpu.memory_space<vmem>>, vector<13x32xf32>
      %148 = arith.maximumf %146, %147 : vector<13x32xf32>
      %c589 = arith.constant 589 : index
      %c0_90 = arith.constant 0 : index
      %149 = tpu.strided_load %arg13[%c589, %c0_90] {strides = array<i32: 2, 1>} : memref<726x32xf32, #tpu.memory_space<vmem>>, vector<13x32xf32>
      %150 = arith.maximumf %148, %149 : vector<13x32xf32>
      %151 = vector.broadcast %23 : vector<1x32xf32> to vector<13x32xf32>
      %152 = arith.addf %150, %151 : vector<13x32xf32>
      %cst_91 = arith.constant 0.000000e+00 : f32
      %153 = vector.broadcast %cst_91 : f32 to vector<13x32xf32>
      %154 = arith.maximumf %152, %153 : vector<13x32xf32>
      %c130 = arith.constant 130 : index
      %c0_92 = arith.constant 0 : index
      %155 = vector.load %arg14[%c130, %c0_92] : memref<169x32xf32, #tpu.memory_space<vmem>>, vector<13x32xf32>
      tpu.vector_store %arg14[%c130, %c0_92], %154 {strides = array<i32>} : memref<169x32xf32, #tpu.memory_space<vmem>>, vector<13x32xf32>,
      %c616 = arith.constant 616 : index
      %c0_93 = arith.constant 0 : index
      %156 = tpu.strided_load %arg13[%c616, %c0_93] {strides = array<i32: 2, 1>} : memref<726x32xf32, #tpu.memory_space<vmem>>, vector<13x32xf32>
      %c617 = arith.constant 617 : index
      %c0_94 = arith.constant 0 : index
      %157 = tpu.strided_load %arg13[%c617, %c0_94] {strides = array<i32: 2, 1>} : memref<726x32xf32, #tpu.memory_space<vmem>>, vector<13x32xf32>
      %158 = arith.maximumf %156, %157 : vector<13x32xf32>
      %c644 = arith.constant 644 : index
      %c0_95 = arith.constant 0 : index
      %159 = tpu.strided_load %arg13[%c644, %c0_95] {strides = array<i32: 2, 1>} : memref<726x32xf32, #tpu.memory_space<vmem>>, vector<13x32xf32>
      %160 = arith.maximumf %158, %159 : vector<13x32xf32>
      %c645 = arith.constant 645 : index
      %c0_96 = arith.constant 0 : index
      %161 = tpu.strided_load %arg13[%c645, %c0_96] {strides = array<i32: 2, 1>} : memref<726x32xf32, #tpu.memory_space<vmem>>, vector<13x32xf32>
      %162 = arith.maximumf %160, %161 : vector<13x32xf32>
      %163 = vector.broadcast %23 : vector<1x32xf32> to vector<13x32xf32>
      %164 = arith.addf %162, %163 : vector<13x32xf32>
      %cst_97 = arith.constant 0.000000e+00 : f32
      %165 = vector.broadcast %cst_97 : f32 to vector<13x32xf32>
      %166 = arith.maximumf %164, %165 : vector<13x32xf32>
      %c143 = arith.constant 143 : index
      %c0_98 = arith.constant 0 : index
      %167 = vector.load %arg14[%c143, %c0_98] : memref<169x32xf32, #tpu.memory_space<vmem>>, vector<13x32xf32>
      tpu.vector_store %arg14[%c143, %c0_98], %166 {strides = array<i32>} : memref<169x32xf32, #tpu.memory_space<vmem>>, vector<13x32xf32>,
      %c672 = arith.constant 672 : index
      %c0_99 = arith.constant 0 : index
      %168 = tpu.strided_load %arg13[%c672, %c0_99] {strides = array<i32: 2, 1>} : memref<726x32xf32, #tpu.memory_space<vmem>>, vector<13x32xf32>
      %c673 = arith.constant 673 : index
      %c0_100 = arith.constant 0 : index
      %169 = tpu.strided_load %arg13[%c673, %c0_100] {strides = array<i32: 2, 1>} : memref<726x32xf32, #tpu.memory_space<vmem>>, vector<13x32xf32>
      %170 = arith.maximumf %168, %169 : vector<13x32xf32>
      %c700 = arith.constant 700 : index
      %c0_101 = arith.constant 0 : index
      %171 = tpu.strided_load %arg13[%c700, %c0_101] {strides = array<i32: 2, 1>} : memref<726x32xf32, #tpu.memory_space<vmem>>, vector<13x32xf32>
      %172 = arith.maximumf %170, %171 : vector<13x32xf32>
      %c701 = arith.constant 701 : index
      %c0_102 = arith.constant 0 : index
      %173 = tpu.strided_load %arg13[%c701, %c0_102] {strides = array<i32: 2, 1>} : memref<726x32xf32, #tpu.memory_space<vmem>>, vector<13x32xf32>
      %174 = arith.maximumf %172, %173 : vector<13x32xf32>
      %175 = vector.broadcast %23 : vector<1x32xf32> to vector<13x32xf32>
      %176 = arith.addf %174, %175 : vector<13x32xf32>
      %cst_103 = arith.constant 0.000000e+00 : f32
      %177 = vector.broadcast %cst_103 : f32 to vector<13x32xf32>
      %178 = arith.maximumf %176, %177 : vector<13x32xf32>
      %c156 = arith.constant 156 : index
      %c0_104 = arith.constant 0 : index
      %179 = vector.load %arg14[%c156, %c0_104] : memref<169x32xf32, #tpu.memory_space<vmem>>, vector<13x32xf32>
      tpu.vector_store %arg14[%c156, %c0_104], %178 {strides = array<i32>} : memref<169x32xf32, #tpu.memory_space<vmem>>, vector<13x32xf32>,
      %c0_105 = arith.constant 0 : index
      %c0_106 = arith.constant 0 : index
      %180 = vector.load %arg14[%c0_105, %c0_106] : memref<169x32xf32, #tpu.memory_space<vmem>>, vector<155x32xf32>
      %c1_107 = arith.constant 1 : index
      %c0_108 = arith.constant 0 : index
      %181 = vector.load %arg14[%c1_107, %c0_108] : memref<169x32xf32, #tpu.memory_space<vmem>>, vector<155x32xf32>
      %c13_109 = arith.constant 13 : index
      %c0_110 = arith.constant 0 : index
      %182 = vector.load %arg14[%c13_109, %c0_110] : memref<169x32xf32, #tpu.memory_space<vmem>>, vector<155x32xf32>
      %c14 = arith.constant 14 : index
      %c0_111 = arith.constant 0 : index
      %183 = vector.load %arg14[%c14, %c0_111] : memref<169x32xf32, #tpu.memory_space<vmem>>, vector<155x32xf32>
      %184 = tpu.concatenate %180, %181, %182, %183 in 1 : vector<155x32xf32>, vector<155x32xf32>, vector<155x32xf32>, vector<155x32xf32> -> vector<155x128xf32>
      %c0_112 = arith.constant 0 : index
      %c0_113 = arith.constant 0 : index
      %185 = vector.load %arg4[%c0_112, %c0_113] : memref<128x64xf32, #tpu.memory_space<vmem>>, vector<128x64xf32>
      %cst_114 = arith.constant dense<0.000000e+00> : vector<155x64xf32>
      %186 = tpu.matmul %184, %185, %cst_114 {dimension_numbers = #tpu.dot_dimension_numbers<[1], [0], [0], [1], [0, 0, 1, 1], [], []>} : vector<155x128xf32>, vector<128x64xf32>, vector<155x64xf32> -> vector<155x64xf32>
      %c0_115 = arith.constant 0 : index
      %c0_116 = arith.constant 0 : index
      %187 = vector.load %arg15[%c0_115, %c0_116] : memref<155x64xf32, #tpu.memory_space<vmem>>, vector<155x64xf32>
      tpu.vector_store %arg15[%c0_115, %c0_116], %186 {strides = array<i32>} : memref<155x64xf32, #tpu.memory_space<vmem>>, vector<155x64xf32>,
      %c0_117 = arith.constant 0 : index
      %c0_118 = arith.constant 0 : index
      %188 = vector.load %arg5[%c0_117, %c0_118] : memref<1x64xf32, #tpu.memory_space<vmem>>, vector<1x64xf32>
      %c0_119 = arith.constant 0 : index
      %c0_120 = arith.constant 0 : index
      %189 = tpu.strided_load %arg15[%c0_119, %c0_120] {strides = array<i32: 2, 1>} : memref<155x64xf32, #tpu.memory_space<vmem>>, vector<6x64xf32>
      %c1_121 = arith.constant 1 : index
      %c0_122 = arith.constant 0 : index
      %190 = tpu.strided_load %arg15[%c1_121, %c0_122] {strides = array<i32: 2, 1>} : memref<155x64xf32, #tpu.memory_space<vmem>>, vector<6x64xf32>
      %191 = arith.maximumf %189, %190 : vector<6x64xf32>
      %c13_123 = arith.constant 13 : index
      %c0_124 = arith.constant 0 : index
      %192 = tpu.strided_load %arg15[%c13_123, %c0_124] {strides = array<i32: 2, 1>} : memref<155x64xf32, #tpu.memory_space<vmem>>, vector<6x64xf32>
      %193 = arith.maximumf %191, %192 : vector<6x64xf32>
      %c14_125 = arith.constant 14 : index
      %c0_126 = arith.constant 0 : index
      %194 = tpu.strided_load %arg15[%c14_125, %c0_126] {strides = array<i32: 2, 1>} : memref<155x64xf32, #tpu.memory_space<vmem>>, vector<6x64xf32>
      %195 = arith.maximumf %193, %194 : vector<6x64xf32>
      %196 = vector.broadcast %188 : vector<1x64xf32> to vector<6x64xf32>
      %197 = arith.addf %195, %196 : vector<6x64xf32>
      %cst_127 = arith.constant 0.000000e+00 : f32
      %198 = vector.broadcast %cst_127 : f32 to vector<6x64xf32>
      %199 = arith.maximumf %197, %198 : vector<6x64xf32>
      %c0_128 = arith.constant 0 : index
      %c0_129 = arith.constant 0 : index
      %200 = vector.load %arg16[%c0_128, %c0_129] : memref<36x64xf32, #tpu.memory_space<vmem>>, vector<6x64xf32>
      tpu.vector_store %arg16[%c0_128, %c0_129], %199 {strides = array<i32>} : memref<36x64xf32, #tpu.memory_space<vmem>>, vector<6x64xf32>,
      %c26_130 = arith.constant 26 : index
      %c0_131 = arith.constant 0 : index
      %201 = tpu.strided_load %arg15[%c26_130, %c0_131] {strides = array<i32: 2, 1>} : memref<155x64xf32, #tpu.memory_space<vmem>>, vector<6x64xf32>
      %c27 = arith.constant 27 : index
      %c0_132 = arith.constant 0 : index
      %202 = tpu.strided_load %arg15[%c27, %c0_132] {strides = array<i32: 2, 1>} : memref<155x64xf32, #tpu.memory_space<vmem>>, vector<6x64xf32>
      %203 = arith.maximumf %201, %202 : vector<6x64xf32>
      %c39_133 = arith.constant 39 : index
      %c0_134 = arith.constant 0 : index
      %204 = tpu.strided_load %arg15[%c39_133, %c0_134] {strides = array<i32: 2, 1>} : memref<155x64xf32, #tpu.memory_space<vmem>>, vector<6x64xf32>
      %205 = arith.maximumf %203, %204 : vector<6x64xf32>
      %c40 = arith.constant 40 : index
      %c0_135 = arith.constant 0 : index
      %206 = tpu.strided_load %arg15[%c40, %c0_135] {strides = array<i32: 2, 1>} : memref<155x64xf32, #tpu.memory_space<vmem>>, vector<6x64xf32>
      %207 = arith.maximumf %205, %206 : vector<6x64xf32>
      %208 = vector.broadcast %188 : vector<1x64xf32> to vector<6x64xf32>
      %209 = arith.addf %207, %208 : vector<6x64xf32>
      %cst_136 = arith.constant 0.000000e+00 : f32
      %210 = vector.broadcast %cst_136 : f32 to vector<6x64xf32>
      %211 = arith.maximumf %209, %210 : vector<6x64xf32>
      %c6 = arith.constant 6 : index
      %c0_137 = arith.constant 0 : index
      %212 = vector.load %arg16[%c6, %c0_137] : memref<36x64xf32, #tpu.memory_space<vmem>>, vector<6x64xf32>
      tpu.vector_store %arg16[%c6, %c0_137], %211 {strides = array<i32>} : memref<36x64xf32, #tpu.memory_space<vmem>>, vector<6x64xf32>,
      %c52_138 = arith.constant 52 : index
      %c0_139 = arith.constant 0 : index
      %213 = tpu.strided_load %arg15[%c52_138, %c0_139] {strides = array<i32: 2, 1>} : memref<155x64xf32, #tpu.memory_space<vmem>>, vector<6x64xf32>
      %c53 = arith.constant 53 : index
      %c0_140 = arith.constant 0 : index
      %214 = tpu.strided_load %arg15[%c53, %c0_140] {strides = array<i32: 2, 1>} : memref<155x64xf32, #tpu.memory_space<vmem>>, vector<6x64xf32>
      %215 = arith.maximumf %213, %214 : vector<6x64xf32>
      %c65_141 = arith.constant 65 : index
      %c0_142 = arith.constant 0 : index
      %216 = tpu.strided_load %arg15[%c65_141, %c0_142] {strides = array<i32: 2, 1>} : memref<155x64xf32, #tpu.memory_space<vmem>>, vector<6x64xf32>
      %217 = arith.maximumf %215, %216 : vector<6x64xf32>
      %c66 = arith.constant 66 : index
      %c0_143 = arith.constant 0 : index
      %218 = tpu.strided_load %arg15[%c66, %c0_143] {strides = array<i32: 2, 1>} : memref<155x64xf32, #tpu.memory_space<vmem>>, vector<6x64xf32>
      %219 = arith.maximumf %217, %218 : vector<6x64xf32>
      %220 = vector.broadcast %188 : vector<1x64xf32> to vector<6x64xf32>
      %221 = arith.addf %219, %220 : vector<6x64xf32>
      %cst_144 = arith.constant 0.000000e+00 : f32
      %222 = vector.broadcast %cst_144 : f32 to vector<6x64xf32>
      %223 = arith.maximumf %221, %222 : vector<6x64xf32>
      %c12 = arith.constant 12 : index
      %c0_145 = arith.constant 0 : index
      %224 = vector.load %arg16[%c12, %c0_145] : memref<36x64xf32, #tpu.memory_space<vmem>>, vector<6x64xf32>
      tpu.vector_store %arg16[%c12, %c0_145], %223 {strides = array<i32>} : memref<36x64xf32, #tpu.memory_space<vmem>>, vector<6x64xf32>,
      %c78_146 = arith.constant 78 : index
      %c0_147 = arith.constant 0 : index
      %225 = tpu.strided_load %arg15[%c78_146, %c0_147] {strides = array<i32: 2, 1>} : memref<155x64xf32, #tpu.memory_space<vmem>>, vector<6x64xf32>
      %c79 = arith.constant 79 : index
      %c0_148 = arith.constant 0 : index
      %226 = tpu.strided_load %arg15[%c79, %c0_148] {strides = array<i32: 2, 1>} : memref<155x64xf32, #tpu.memory_space<vmem>>, vector<6x64xf32>
      %227 = arith.maximumf %225, %226 : vector<6x64xf32>
      %c91_149 = arith.constant 91 : index
      %c0_150 = arith.constant 0 : index
      %228 = tpu.strided_load %arg15[%c91_149, %c0_150] {strides = array<i32: 2, 1>} : memref<155x64xf32, #tpu.memory_space<vmem>>, vector<6x64xf32>
      %229 = arith.maximumf %227, %228 : vector<6x64xf32>
      %c92 = arith.constant 92 : index
      %c0_151 = arith.constant 0 : index
      %230 = tpu.strided_load %arg15[%c92, %c0_151] {strides = array<i32: 2, 1>} : memref<155x64xf32, #tpu.memory_space<vmem>>, vector<6x64xf32>
      %231 = arith.maximumf %229, %230 : vector<6x64xf32>
      %232 = vector.broadcast %188 : vector<1x64xf32> to vector<6x64xf32>
      %233 = arith.addf %231, %232 : vector<6x64xf32>
      %cst_152 = arith.constant 0.000000e+00 : f32
      %234 = vector.broadcast %cst_152 : f32 to vector<6x64xf32>
      %235 = arith.maximumf %233, %234 : vector<6x64xf32>
      %c18 = arith.constant 18 : index
      %c0_153 = arith.constant 0 : index
      %236 = vector.load %arg16[%c18, %c0_153] : memref<36x64xf32, #tpu.memory_space<vmem>>, vector<6x64xf32>
      tpu.vector_store %arg16[%c18, %c0_153], %235 {strides = array<i32>} : memref<36x64xf32, #tpu.memory_space<vmem>>, vector<6x64xf32>,
      %c104_154 = arith.constant 104 : index
      %c0_155 = arith.constant 0 : index
      %237 = tpu.strided_load %arg15[%c104_154, %c0_155] {strides = array<i32: 2, 1>} : memref<155x64xf32, #tpu.memory_space<vmem>>, vector<6x64xf32>
      %c105 = arith.constant 105 : index
      %c0_156 = arith.constant 0 : index
      %238 = tpu.strided_load %arg15[%c105, %c0_156] {strides = array<i32: 2, 1>} : memref<155x64xf32, #tpu.memory_space<vmem>>, vector<6x64xf32>
      %239 = arith.maximumf %237, %238 : vector<6x64xf32>
      %c117_157 = arith.constant 117 : index
      %c0_158 = arith.constant 0 : index
      %240 = tpu.strided_load %arg15[%c117_157, %c0_158] {strides = array<i32: 2, 1>} : memref<155x64xf32, #tpu.memory_space<vmem>>, vector<6x64xf32>
      %241 = arith.maximumf %239, %240 : vector<6x64xf32>
      %c118 = arith.constant 118 : index
      %c0_159 = arith.constant 0 : index
      %242 = tpu.strided_load %arg15[%c118, %c0_159] {strides = array<i32: 2, 1>} : memref<155x64xf32, #tpu.memory_space<vmem>>, vector<6x64xf32>
      %243 = arith.maximumf %241, %242 : vector<6x64xf32>
      %244 = vector.broadcast %188 : vector<1x64xf32> to vector<6x64xf32>
      %245 = arith.addf %243, %244 : vector<6x64xf32>
      %cst_160 = arith.constant 0.000000e+00 : f32
      %246 = vector.broadcast %cst_160 : f32 to vector<6x64xf32>
      %247 = arith.maximumf %245, %246 : vector<6x64xf32>
      %c24 = arith.constant 24 : index
      %c0_161 = arith.constant 0 : index
      %248 = vector.load %arg16[%c24, %c0_161] : memref<36x64xf32, #tpu.memory_space<vmem>>, vector<6x64xf32>
      tpu.vector_store %arg16[%c24, %c0_161], %247 {strides = array<i32>} : memref<36x64xf32, #tpu.memory_space<vmem>>, vector<6x64xf32>,
      %c130_162 = arith.constant 130 : index
      %c0_163 = arith.constant 0 : index
      %249 = tpu.strided_load %arg15[%c130_162, %c0_163] {strides = array<i32: 2, 1>} : memref<155x64xf32, #tpu.memory_space<vmem>>, vector<6x64xf32>
      %c131 = arith.constant 131 : index
      %c0_164 = arith.constant 0 : index
      %250 = tpu.strided_load %arg15[%c131, %c0_164] {strides = array<i32: 2, 1>} : memref<155x64xf32, #tpu.memory_space<vmem>>, vector<6x64xf32>
      %251 = arith.maximumf %249, %250 : vector<6x64xf32>
      %c143_165 = arith.constant 143 : index
      %c0_166 = arith.constant 0 : index
      %252 = tpu.strided_load %arg15[%c143_165, %c0_166] {strides = array<i32: 2, 1>} : memref<155x64xf32, #tpu.memory_space<vmem>>, vector<6x64xf32>
      %253 = arith.maximumf %251, %252 : vector<6x64xf32>
      %c144 = arith.constant 144 : index
      %c0_167 = arith.constant 0 : index
      %254 = tpu.strided_load %arg15[%c144, %c0_167] {strides = array<i32: 2, 1>} : memref<155x64xf32, #tpu.memory_space<vmem>>, vector<6x64xf32>
      %255 = arith.maximumf %253, %254 : vector<6x64xf32>
      %256 = vector.broadcast %188 : vector<1x64xf32> to vector<6x64xf32>
      %257 = arith.addf %255, %256 : vector<6x64xf32>
      %cst_168 = arith.constant 0.000000e+00 : f32
      %258 = vector.broadcast %cst_168 : f32 to vector<6x64xf32>
      %259 = arith.maximumf %257, %258 : vector<6x64xf32>
      %c30 = arith.constant 30 : index
      %c0_169 = arith.constant 0 : index
      %260 = vector.load %arg16[%c30, %c0_169] : memref<36x64xf32, #tpu.memory_space<vmem>>, vector<6x64xf32>
      tpu.vector_store %arg16[%c30, %c0_169], %259 {strides = array<i32>} : memref<36x64xf32, #tpu.memory_space<vmem>>, vector<6x64xf32>,
      %c0_170 = arith.constant 0 : index
      %c0_171 = arith.constant 0 : index
      %261 = vector.load %arg16[%c0_170, %c0_171] : memref<36x64xf32, #tpu.memory_space<vmem>>, vector<22x64xf32>
      %c1_172 = arith.constant 1 : index
      %c0_173 = arith.constant 0 : index
      %262 = vector.load %arg16[%c1_172, %c0_173] : memref<36x64xf32, #tpu.memory_space<vmem>>, vector<22x64xf32>
      %c6_174 = arith.constant 6 : index
      %c0_175 = arith.constant 0 : index
      %263 = vector.load %arg16[%c6_174, %c0_175] : memref<36x64xf32, #tpu.memory_space<vmem>>, vector<22x64xf32>
      %c7 = arith.constant 7 : index
      %c0_176 = arith.constant 0 : index
      %264 = vector.load %arg16[%c7, %c0_176] : memref<36x64xf32, #tpu.memory_space<vmem>>, vector<22x64xf32>
      %265 = tpu.concatenate %261, %262, %263, %264 in 1 : vector<22x64xf32>, vector<22x64xf32>, vector<22x64xf32>, vector<22x64xf32> -> vector<22x256xf32>
      %c0_177 = arith.constant 0 : index
      %c0_178 = arith.constant 0 : index
      %266 = vector.load %arg6[%c0_177, %c0_178] : memref<256x128xf32, #tpu.memory_space<vmem>>, vector<256x128xf32>
      %cst_179 = arith.constant dense<0.000000e+00> : vector<22x128xf32>
      %267 = tpu.matmul %265, %266, %cst_179 {dimension_numbers = #tpu.dot_dimension_numbers<[1], [0], [0], [1], [0, 0, 1, 1], [], []>} : vector<22x256xf32>, vector<256x128xf32>, vector<22x128xf32> -> vector<22x128xf32>
      %c0_180 = arith.constant 0 : index
      %c0_181 = arith.constant 0 : index
      %268 = vector.load %arg17[%c0_180, %c0_181] : memref<22x128xf32, #tpu.memory_space<vmem>>, vector<22x128xf32>
      tpu.vector_store %arg17[%c0_180, %c0_181], %267 {strides = array<i32>} : memref<22x128xf32, #tpu.memory_space<vmem>>, vector<22x128xf32>,
      %c0_182 = arith.constant 0 : index
      %c0_183 = arith.constant 0 : index
      %269 = vector.load %arg7[%c0_182, %c0_183] : memref<1x128xf32, #tpu.memory_space<vmem>>, vector<1x128xf32>
      %c0_184 = arith.constant 0 : index
      %c0_185 = arith.constant 0 : index
      %270 = tpu.strided_load %arg17[%c0_184, %c0_185] {strides = array<i32: 2, 1>} : memref<22x128xf32, #tpu.memory_space<vmem>>, vector<2x128xf32>
      %c1_186 = arith.constant 1 : index
      %c0_187 = arith.constant 0 : index
      %271 = tpu.strided_load %arg17[%c1_186, %c0_187] {strides = array<i32: 2, 1>} : memref<22x128xf32, #tpu.memory_space<vmem>>, vector<2x128xf32>
      %272 = arith.maximumf %270, %271 : vector<2x128xf32>
      %c6_188 = arith.constant 6 : index
      %c0_189 = arith.constant 0 : index
      %273 = tpu.strided_load %arg17[%c6_188, %c0_189] {strides = array<i32: 2, 1>} : memref<22x128xf32, #tpu.memory_space<vmem>>, vector<2x128xf32>
      %274 = arith.maximumf %272, %273 : vector<2x128xf32>
      %c7_190 = arith.constant 7 : index
      %c0_191 = arith.constant 0 : index
      %275 = tpu.strided_load %arg17[%c7_190, %c0_191] {strides = array<i32: 2, 1>} : memref<22x128xf32, #tpu.memory_space<vmem>>, vector<2x128xf32>
      %276 = arith.maximumf %274, %275 : vector<2x128xf32>
      %277 = vector.broadcast %269 : vector<1x128xf32> to vector<2x128xf32>
      %278 = arith.addf %276, %277 : vector<2x128xf32>
      %cst_192 = arith.constant 0.000000e+00 : f32
      %279 = vector.broadcast %cst_192 : f32 to vector<2x128xf32>
      %280 = arith.maximumf %278, %279 : vector<2x128xf32>
      %281 = vector.extract_strided_slice %280 {offsets = [0, 0], sizes = [1, 128], strides = [1, 1]} : vector<2x128xf32> to vector<1x128xf32>
      %282 = vector.extract_strided_slice %280 {offsets = [1, 0], sizes = [1, 128], strides = [1, 1]} : vector<2x128xf32> to vector<1x128xf32>
      %c12_193 = arith.constant 12 : index
      %c0_194 = arith.constant 0 : index
      %283 = tpu.strided_load %arg17[%c12_193, %c0_194] {strides = array<i32: 2, 1>} : memref<22x128xf32, #tpu.memory_space<vmem>>, vector<2x128xf32>
      %c13_195 = arith.constant 13 : index
      %c0_196 = arith.constant 0 : index
      %284 = tpu.strided_load %arg17[%c13_195, %c0_196] {strides = array<i32: 2, 1>} : memref<22x128xf32, #tpu.memory_space<vmem>>, vector<2x128xf32>
      %285 = arith.maximumf %283, %284 : vector<2x128xf32>
      %c18_197 = arith.constant 18 : index
      %c0_198 = arith.constant 0 : index
      %286 = tpu.strided_load %arg17[%c18_197, %c0_198] {strides = array<i32: 2, 1>} : memref<22x128xf32, #tpu.memory_space<vmem>>, vector<2x128xf32>
      %287 = arith.maximumf %285, %286 : vector<2x128xf32>
      %c19 = arith.constant 19 : index
      %c0_199 = arith.constant 0 : index
      %288 = tpu.strided_load %arg17[%c19, %c0_199] {strides = array<i32: 2, 1>} : memref<22x128xf32, #tpu.memory_space<vmem>>, vector<2x128xf32>
      %289 = arith.maximumf %287, %288 : vector<2x128xf32>
      %290 = vector.broadcast %269 : vector<1x128xf32> to vector<2x128xf32>
      %291 = arith.addf %289, %290 : vector<2x128xf32>
      %cst_200 = arith.constant 0.000000e+00 : f32
      %292 = vector.broadcast %cst_200 : f32 to vector<2x128xf32>
      %293 = arith.maximumf %291, %292 : vector<2x128xf32>
      %294 = vector.extract_strided_slice %293 {offsets = [0, 0], sizes = [1, 128], strides = [1, 1]} : vector<2x128xf32> to vector<1x128xf32>
      %295 = vector.extract_strided_slice %293 {offsets = [1, 0], sizes = [1, 128], strides = [1, 1]} : vector<2x128xf32> to vector<1x128xf32>
      %296 = tpu.concatenate %281, %282, %294, %295 in 1 : vector<1x128xf32>, vector<1x128xf32>, vector<1x128xf32>, vector<1x128xf32> -> vector<1x512xf32>
      %297 = arith.index_cast %16 : i32 to index
      %c0_201 = arith.constant 0 : index
      %298 = vector.load %arg18[%297, %c0_201] : memref<8x512xf32, #tpu.memory_space<vmem>>, vector<1x512xf32>
      tpu.vector_store %arg18[%297, %c0_201], %296 {strides = array<i32>} : memref<8x512xf32, #tpu.memory_space<vmem>>, vector<1x512xf32>,
    }
    %c8_i32_0 = arith.constant 8 : i32
    %c0 = arith.constant 0 : index
    %c0_1 = arith.constant 0 : index
    %1 = vector.load %arg18[%c0, %c0_1] : memref<8x512xf32, #tpu.memory_space<vmem>>, vector<8x512xf32>
    %c0_2 = arith.constant 0 : index
    %c0_3 = arith.constant 0 : index
    %2 = vector.load %arg8[%c0_2, %c0_3] : memref<512x512xf32, #tpu.memory_space<vmem>>, vector<512x512xf32>
    %cst = arith.constant dense<0.000000e+00> : vector<8x512xf32>
    %3 = tpu.matmul %1, %2, %cst {dimension_numbers = #tpu.dot_dimension_numbers<[1], [0], [0], [1], [0, 0, 1, 1], [], []>} : vector<8x512xf32>, vector<512x512xf32>, vector<8x512xf32> -> vector<8x512xf32>
    %c0_4 = arith.constant 0 : index
    %c0_5 = arith.constant 0 : index
    %4 = vector.load %arg9[%c0_4, %c0_5] : memref<1x512xf32, #tpu.memory_space<vmem>>, vector<1x512xf32>
    %5 = vector.broadcast %4 : vector<1x512xf32> to vector<8x512xf32>
    %6 = arith.addf %3, %5 : vector<8x512xf32>
    %cst_6 = arith.constant 0.000000e+00 : f32
    %7 = vector.broadcast %cst_6 : f32 to vector<8x512xf32>
    %8 = arith.maximumf %6, %7 : vector<8x512xf32>
    %c0_7 = arith.constant 0 : index
    %c0_8 = arith.constant 0 : index
    %9 = vector.load %arg10[%c0_7, %c0_8] : memref<512x128xf32, #tpu.memory_space<vmem>>, vector<512x128xf32>
    %cst_9 = arith.constant dense<0.000000e+00> : vector<8x128xf32>
    %10 = tpu.matmul %8, %9, %cst_9 {dimension_numbers = #tpu.dot_dimension_numbers<[1], [0], [0], [1], [0, 0, 1, 1], [], []>} : vector<8x512xf32>, vector<512x128xf32>, vector<8x128xf32> -> vector<8x128xf32>
    %c0_10 = arith.constant 0 : index
    %c0_11 = arith.constant 0 : index
    %11 = vector.load %arg11[%c0_10, %c0_11] : memref<1x128xf32, #tpu.memory_space<vmem>>, vector<1x128xf32>
    %12 = vector.broadcast %11 : vector<1x128xf32> to vector<8x128xf32>
    %13 = arith.addf %10, %12 : vector<8x128xf32>
    %c0_12 = arith.constant 0 : index
    %c0_13 = arith.constant 0 : index
    %14 = vector.load %arg12[%c0_12, %c0_13] : memref<8x128xf32, #tpu.memory_space<vmem>>, vector<8x128xf32>
    tpu.vector_store %arg12[%c0_12, %c0_13], %13 {strides = array<i32>} : memref<8x128xf32, #tpu.memory_space<vmem>>, vector<8x128xf32>,
    return
  }
  func.func @transform_0(%arg0: i32) -> (i32, i32, i32) {
    %c0_i32 = arith.constant 0 : i32
    %c0_i32_0 = arith.constant 0 : i32
    %c0_i32_1 = arith.constant 0 : i32
    return %arg0, %c0_i32, %c0_i32_0 : i32, i32, i32
  }
  func.func @transform_1(%arg0: i32) -> (i32, i32) {
    %c0_i32 = arith.constant 0 : i32
    %c0_i32_0 = arith.constant 0 : i32
    %c0_i32_1 = arith.constant 0 : i32
    return %c0_i32, %c0_i32_0 : i32, i32
  }
  func.func @transform_2(%arg0: i32) -> (i32, i32) {
    %c0_i32 = arith.constant 0 : i32
    %c0_i32_0 = arith.constant 0 : i32
    %c0_i32_1 = arith.constant 0 : i32
    return %c0_i32, %c0_i32_0 : i32, i32
  }
  func.func @transform_3(%arg0: i32) -> (i32, i32) {
    %c0_i32 = arith.constant 0 : i32
    %c0_i32_0 = arith.constant 0 : i32
    %c0_i32_1 = arith.constant 0 : i32
    return %c0_i32, %c0_i32_0 : i32, i32
  }
  func.func @transform_4(%arg0: i32) -> (i32, i32) {
    %c0_i32 = arith.constant 0 : i32
    %c0_i32_0 = arith.constant 0 : i32
    %c0_i32_1 = arith.constant 0 : i32
    return %c0_i32, %c0_i32_0 : i32, i32
  }
  func.func @transform_5(%arg0: i32) -> (i32, i32) {
    %c0_i32 = arith.constant 0 : i32
    %c0_i32_0 = arith.constant 0 : i32
    %c0_i32_1 = arith.constant 0 : i32
    return %c0_i32, %c0_i32_0 : i32, i32
  }
  func.func @transform_6(%arg0: i32) -> (i32, i32) {
    %c0_i32 = arith.constant 0 : i32
    %c0_i32_0 = arith.constant 0 : i32
    %c0_i32_1 = arith.constant 0 : i32
    return %c0_i32, %c0_i32_0 : i32, i32
  }
  func.func @transform_7(%arg0: i32) -> (i32, i32) {
    %c0_i32 = arith.constant 0 : i32
    %c0_i32_0 = arith.constant 0 : i32
    %c0_i32_1 = arith.constant 0 : i32
    return %c0_i32, %c0_i32_0 : i32, i32
  }
  func.func @transform_8(%arg0: i32) -> (i32, i32) {
    %c0_i32 = arith.constant 0 : i32
    %c0_i32_0 = arith.constant 0 : i32
    %c0_i32_1 = arith.constant 0 : i32
    return %c0_i32, %c0_i32_0 : i32, i32
  }
  func.func @transform_9(%arg0: i32) -> (i32, i32) {
    %c0_i32 = arith.constant 0 : i32
    %c0_i32_0 = arith.constant 0 : i32
    %c0_i32_1 = arith.constant 0 : i32
    return %c0_i32, %c0_i32_0 : i32, i32
  }
  func.func @transform_10(%arg0: i32) -> (i32, i32) {
    %c0_i32 = arith.constant 0 : i32
    %c0_i32_0 = arith.constant 0 : i32
    %c0_i32_1 = arith.constant 0 : i32
    return %c0_i32, %c0_i32_0 : i32, i32
  }
  func.func @transform_11(%arg0: i32) -> (i32, i32) {
    %c0_i32 = arith.constant 0 : i32
    %c0_i32_0 = arith.constant 0 : i32
    return %arg0, %c0_i32 : i32, i32
  }
}

</mosaic_0001>

<bundles_post_ra>
// kernel: net_forward.1
= control target key start
LH: loop header
LB: loop body
LE: loop exit
PB: predicated region body
PF: predicated region fallthrough
CT: control target
= control target key end

     0   :  { %s5264_s0 = inlined_call_operand.vmem [shape: f32[16,726,4], index: 0, kind: input, shape index: {}]   ;;  %s5265_s1 = inlined_call_operand.vmem [shape: f32[4,32], index: 1, kind: input, shape index: {}]   ;;  %s5266_s2 = inlined_call_operand.vmem [shape: f32[1,32], index: 2, kind: input, shape index: {}]   ;;  %s5267_s3 = inlined_call_operand.vmem [shape: f32[128,64], index: 3, kind: input, shape index: {}]   ;;  %s5268_s4 = inlined_call_operand.vmem [shape: f32[1,64], index: 4, kind: input, shape index: {}]   ;;  %s5269_s5 = inlined_call_operand.vmem [shape: f32[256,128], index: 5, kind: input, shape index: {}]   ;;  %s5270_s6 = inlined_call_operand.vmem [shape: f32[1,128], index: 6, kind: input, shape index: {}]   ;;  %s5271_s7 = inlined_call_operand.vmem [shape: f32[512,512], index: 7, kind: input, shape index: {}]   ;;  %s5272_s8 = inlined_call_operand.vmem [shape: f32[1,512], index: 8, kind: input, shape index: {}]   ;;  %s5273_s9 = inlined_call_operand.vmem [shape: f32[512,128], index: 9, kind: input, shape index: {}]   ;;  %s5274_s10 = inlined_call_operand.vmem [shape: f32[1,128], index: 10, kind: input, shape index: {}]   ;;  %s5275_s11 = inlined_call_operand.hbm [shape: f32[16,128], index: 11, kind: output, shape index: {}]  }
   0x1   :  { %5283 = sst [smem:[#allocation11_spill]] %s5264_s0 }
   0x2   :  { %5284 = sst [smem:[#allocation12_spill]] %s5265_s1 }
   0x3   :  { %5285 = sst [smem:[#allocation13_spill]] %s5266_s2 }
   0x4   :  { %5286 = sst [smem:[#allocation14_spill]] %s5267_s3 }
   0x5   :  { %16 = vsyncpa [#allocation9], 0 }
   0x6   :  { %18 = vsyncpa [#allocation9 + $0x1], 0  ;;  %s3529_s17 = smov 0   ;;  %s3531_s18 = smov 0  }
   0x7   :  { %s3533_s19 = smov 0   ;;  %s3535_s20 = smov 0  }
   0x8 LB: > { %s3116_s21 = sadd.s32 4294967295, %s3460_s20   ;;  %s3117_s22 = sadd.s32 4294967294, %s3460_s20   ;;  %s3460_s20 = sphi %s3535_s20, %s5302_s20   ;;  %s3456_s19 = sphi %s3533_s19, %s5301_s19   ;;  %s3452_s18 = sphi %s3531_s18, %s5300_s18   ;;  %s3448_s17 = sphi %s3529_s17, %s5299_s17  }
   0x9   : > { %s3552_s23 = sadd.s32 1, %s3460_s20   ;;  %s267_s24 = sadd.s32 1, %s3456_s19 }
   0xa   : > { %s264_s25 = ssub.s32 %s3460_s20, %s3552_s23  ;;  %p277_p0 = scmp.ne.s32.totalorder %s3456_s19, %s3452_s18 }
   0xb   : > { %p265_p1 = scmp.eq.s32.totalorder %s264_s25, 0  ;;  %p278_p2 = scmp.eq.s32.totalorder %s3116_s21, 1 }
   0xc   : > { %p283_p3 = scmp.ne.s32.totalorder %s3452_s18, %s3448_s17  ;;  %p284_p4 = scmp.eq.s32.totalorder %s3117_s22, 1 }
   0xd   : > { %s3562_s26 = scalar_select %p265_p1, %s3456_s19, %s267_s24  }
   0xe   : > { %p3564_p5 = por %p278_p2, %p277_p0  ;;  %p3568_p6 = por %p284_p4, %p283_p3 }
   0xf   : > { %p3120_p7 = scmp.ge.s32.totalorder %s3460_s20, 1  ;;  %p342_p8 = scmp.lt.s32.totalorder %s3460_s20, 3 }
  0x11   : > { %p343_p9 = pnand %p3120_p7, %p342_p8 }
  0x12   : > { %s5276_s29 = sand.u32 (!%p343_p9), 1, %s3452_s18   ;;  %s3575_s30 = sshll.u32 (!%p343_p9), %s3116_s21, 3 }
  0x13   : > { %346 = sbr.rel (%p343_p9) target bundleno = 1436 (0x59c), region = 64  ;;  %s3579_s12 = sshll.u32 (!%p343_p9), %s5276_s29, 3 }
  0x14   : > { %p384_p10 = scmp.lt.s32.totalorder (!%p343_p9), %s3575_s30, 15  ;;  %s5289_s0 = sld [smem:[#allocation11_spill]] (!%p343_p9) }
  0x15   : > { %s3589_s25 = smov (!%p343_p9), 0  }
  0x18   : > { %s385_s13 = scalar_select %p384_p10, %s3575_s30, 15 }
  0x1a   : > { %s3228_s14 = smul.u32 728, %s385_s13 }
  0x1c   : > { %s3586_s22 = scalar_lea.vmem %s5289_s0, %s3228_s14 }
  0x1d LB: >> { %s5290_s1 = sld [smem:[#allocation12_spill]]  ;;  %vm764_vm0 = vcmask 1043456   ;;  %s396_s13 = smul.u32 728, %s3464_s25  ;;  %vm490_vm1 = vcmask 31744   ;;  %vm1058_vm2 = vcmask 261120   ;;  %vm1181_vm3 = vcmask 258048   ;;  %s3464_s25 = sphi %s3589_s25, %s395_s25  }
  0x1e   : >> { %s5291_s2 = sld [smem:[#allocation13_spill]]  ;;  %s5277_s16 = smov 32   ;;  %vm1859_vm4 = vcmask 523264   ;;  %vm1880_vm5 = vcmask 785408   ;;  %vm2031_vm6 = vcmask 521216   ;;  %vm1149_vm7 = vcmask 259072  }
  0x1f   : >> { %s3599_s14 = scalar_lea.vmem %s3586_s22, %s396_s13  ;;  %s5279_s21 = smov 96   ;;  %vm2013_vm8 = vcmask 518144   ;;  %vm2272_vm9 = vcmask 1041408  }
  0x20   : >> { %v398_v1 = vld [vmem:[%s3599_s14] sm:$0xff]  ;;  %v399_v3 = vld [vmem:[%s3599_s14 + $0x8] sm:$0xff]  ;;  %v400_v5 = vld [vmem:[%s3599_s14 + $0x10] sm:$0xff]  ;;  %s5281_s13 = smov 64   ;;  %s5292_s3 = sld [smem:[#allocation14_spill]] }
  0x21   : >> { %v434_v2 = vld [vmem:[%s3599_s14 + $0x120] sm:$0xff]  ;;  %v435_v4 = vld [vmem:[%s3599_s14 + $0x128] sm:$0xff]  ;;  %v436_v6 = vld [vmem:[%s3599_s14 + $0x130] sm:$0xff]  ;;  %s5293_s29 = smov 96   ;;  %s5294_s15 = smov 32  }
  0x22   : >> { %v401_v7 = vld [vmem:[%s3599_s14 + $0x18] sm:$0xff]  ;;  %v402_v9 = vld [vmem:[%s3599_s14 + $0x20] sm:$0xff]  ;;  %v403_v11 = vld [vmem:[%s3599_s14 + $0x28] sm:$0xff] }
  0x23   : >> { %v489_v0 = vld [vmem:[%s5290_s1] sm:$0xf]  ;;  %v437_v8 = vld [vmem:[%s3599_s14 + $0x138] sm:$0xff]  ;;  %v439_v12 = vld [vmem:[%s3599_s14 + $0x148] sm:$0xff] }
  0x24   : >> { %3124 = vmatpush.msk.msra.mxu0 %vm764_vm0, %v489_v0  ;;  %3226 = vmatpush.msk.msra.mxu2 %vm764_vm0, %v489_v0  ;;  %v438_v10 = vld [vmem:[%s3599_s14 + $0x140] sm:$0xff]  ;;  %v404_v14 = vld [vmem:[%s3599_s14 + $0x30] sm:$0xff]  ;;  %v431_v16 = vld [vmem:[%s3599_s14 + $0x108] sm:$0xff] }
  0x25   : >> { %3225 = vmatpush.msk.msra.mxu1 %vm764_vm0, %v489_v0  ;;  %3227 = vmatpush.msk.msra.mxu3 %vm764_vm0, %v489_v0  ;;  %v430_v13 = vld [vmem:[%s3599_s14 + $0x100] sm:$0xff]  ;;  %v440_v15 = vld [vmem:[%s3599_s14 + $0x150] sm:$0xff]  ;;  %v405_v17 = vld [vmem:[%s3599_s14 + $0x38] sm:$0xff] }
  0x26   : >> { %3125 = vmatmul.msk.f32.vlgmr.msra.gmra.mxu0 %vm490_vm1, %v398_v1  ;;  %3161 = vmatmul.msk.f32.vlgmr.msra.gmra.mxu2 %vm490_vm1, %v434_v2  ;;  %v441_v18 = vld [vmem:[%s3599_s14 + $0x158] sm:$0xff]  ;;  %v432_v19 = vld [vmem:[%s3599_s14 + $0x110] sm:$0xff]  ;;  %v406_v20 = vld [vmem:[%s3599_s14 + $0x40] sm:$0xff] }
  0x27   : >> { %3157 = vmatmul.msk.f32.vlgmr.msra.gmra.mxu1 %vm490_vm1, %v430_v13  ;;  %v442_v21 = vld [vmem:[%s3599_s14 + $0x160] sm:$0xff]  ;;  %v433_v22 = vld [vmem:[%s3599_s14 + $0x118] sm:$0xff]  ;;  %v407_v23 = vld [vmem:[%s3599_s14 + $0x48] sm:$0xff] }
  0x28   : >> { %v443_v24 = vld [vmem:[%s3599_s14 + $0x168] sm:$0xff]  ;;  %v462_v25 = vld [vmem:[%s3599_s14 + $0x200] sm:$0xff]  ;;  %v408_v26 = vld [vmem:[%s3599_s14 + $0x50] sm:$0xff] }
  0x29   : >> { %3189 = vmatmul.msk.f32.vlgmr.msra.gmra.mxu3 %vm490_vm1, %v462_v25  ;;  %v444_v27 = vld [vmem:[%s3599_s14 + $0x170] sm:$0xff]  ;;  %v463_v28 = vld [vmem:[%s3599_s14 + $0x208] sm:$0xff]  ;;  %v409_v29 = vld [vmem:[%s3599_s14 + $0x58] sm:$0xff] }
  0x2a   : >> { %v445_v30 = vld [vmem:[%s3599_s14 + $0x178] sm:$0xff]  ;;  %v410_v31 = vld [vmem:[%s3599_s14 + $0x60] sm:$0xff]  ;;  %v464_v33 = vld [vmem:[%s3599_s14 + $0x210] sm:$0xff] }
  0x2b   : >> { %v446_v32 = vld [vmem:[%s3599_s14 + $0x180] sm:$0xff]  ;;  %v411_v34 = vld [vmem:[%s3599_s14 + $0x68] sm:$0xff]  ;;  %v465_v36 = vld [vmem:[%s3599_s14 + $0x218] sm:$0xff] }
  0x2c   : >> { %v447_v35 = vld [vmem:[%s3599_s14 + $0x188] sm:$0xff]  ;;  %v412_v37 = vld [vmem:[%s3599_s14 + $0x70] sm:$0xff]  ;;  %v466_v39 = vld [vmem:[%s3599_s14 + $0x220] sm:$0xff] }
  0x2d   : >> { %v448_v38 = vld [vmem:[%s3599_s14 + $0x190] sm:$0xff]  ;;  %v413_v40 = vld [vmem:[%s3599_s14 + $0x78] sm:$0xff]  ;;  %v467_v42 = vld [vmem:[%s3599_s14 + $0x228] sm:$0xff] }
  0x2e   : >> { %3126 = vmatmul.msk.f32.gmra.mxu0 %vm490_vm1, %v399_v3  ;;  %3162 = vmatmul.msk.f32.gmra.mxu2 %vm490_vm1, %v435_v4  ;;  %v449_v41 = vld [vmem:[%s3599_s14 + $0x198] sm:$0xff]  ;;  %v414_v44 = vld [vmem:[%s3599_s14 + $0x80] sm:$0xff]  ;;  %v468_v46 = vld [vmem:[%s3599_s14 + $0x230] sm:$0xff] }
  0x2f   : >> { %3158 = vmatmul.msk.f32.gmra.mxu1 %vm490_vm1, %v431_v16  ;;  %v450_v45 = vld [vmem:[%s3599_s14 + $0x1a0] sm:$0xff]  ;;  %v415_v49 = vld [vmem:[%s3599_s14 + $0x88] sm:$0xff]  ;;  %v469_v51 = vld [vmem:[%s3599_s14 + $0x238] sm:$0xff] }
  0x30   : >> { %v451_v50 = vld [vmem:[%s3599_s14 + $0x1a8] sm:$0xff]  ;;  %v416_v54 = vld [vmem:[%s3599_s14 + $0x90] sm:$0xff]  ;;  %v470_v56 = vld [vmem:[%s3599_s14 + $0x240] sm:$0xff] }
  0x31   : >> { %3190 = vmatmul.msk.f32.gmra.mxu3 %vm490_vm1, %v463_v28  ;;  %v452_v55 = vld [vmem:[%s3599_s14 + $0x1b0] sm:$0xff]  ;;  %v417_v59 = vld [vmem:[%s3599_s14 + $0x98] sm:$0xff]  ;;  %v471_v61 = vld [vmem:[%s3599_s14 + $0x248] sm:$0xff] }
  0x32   : >> { %v453_v60 = vld [vmem:[%s3599_s14 + $0x1b8] sm:$0xff]  ;;  %v418_v0 = vld [vmem:[%s3599_s14 + $0xa0] sm:$0xff]  ;;  %v472_v2 = vld [vmem:[%s3599_s14 + $0x250] sm:$0xff] }
  0x33   : >> { %v454_v1 = vld [vmem:[%s3599_s14 + $0x1c0] sm:$0xff] }
  0x36   : >> { %3127 = vmatmul.msk.f32.gmra.mxu0 %vm490_vm1, %v400_v5  ;;  %3163 = vmatmul.msk.f32.gmra.mxu2 %vm490_vm1, %v436_v6  ;;  %v419_v5 = vld [vmem:[%s3599_s14 + $0xa8] sm:$0xff] }
  0x37   : >> { %3159 = vmatmul.msk.f32.gmra.mxu1 %vm490_vm1, %v432_v19  ;;  %v455_v6 = vld [vmem:[%s3599_s14 + $0x1c8] sm:$0xff] }
  0x39   : >> { %3191 = vmatmul.msk.f32.gmra.mxu3 %vm490_vm1, %v464_v33 }
  0x3e   : >> { %3128 = vmatmul.msk.f32.gmra.mxu0 %vm490_vm1, %v401_v7  ;;  %3164 = vmatmul.msk.f32.gmra.mxu2 %vm490_vm1, %v437_v8  ;;  %v473_v8 = vld [vmem:[%s3599_s14 + $0x258] sm:$0xff] }
  0x3f   : >> { %3160 = vmatmul.msk.f32.gmra.mxu1 %vm490_vm1, %v433_v22 }
  0x41   : >> { %3192 = vmatmul.msk.f32.gmra.mxu3 %vm490_vm1, %v465_v36 }
  0x46   : >> { %3129 = vmatmul.msk.f32.gmra.mxu0 %vm490_vm1, %v402_v9  ;;  %3165 = vmatmul.msk.f32.gmra.mxu2 %vm490_vm1, %v438_v10 }
  0x49   : >> { %3193 = vmatmul.msk.f32.gmra.mxu3 %vm490_vm1, %v466_v39 }
  0x4e   : >> { %3130 = vmatmul.msk.f32.gmra.mxu0 %vm490_vm1, %v403_v11  ;;  %3166 = vmatmul.msk.f32.gmra.mxu2 %vm490_vm1, %v439_v12 }
  0x51   : >> { %3194 = vmatmul.msk.f32.gmra.mxu3 %vm490_vm1, %v467_v42 }
  0x56   : >> { %3131 = vmatmul.msk.f32.gmra.mxu0 %vm490_vm1, %v404_v14  ;;  %3167 = vmatmul.msk.f32.gmra.mxu2 %vm490_vm1, %v440_v15  ;;  %v420_v14 = vld [vmem:[%s3599_s14 + $0xb0] sm:$0xff] }
  0x59   : >> { %3195 = vmatmul.msk.f32.gmra.mxu3 %vm490_vm1, %v468_v46 }
  0x5e   : >> { %3132 = vmatmul.msk.f32.gmra.mxu0 %vm490_vm1, %v405_v17  ;;  %3168 = vmatmul.msk.f32.gmra.mxu2 %vm490_vm1, %v441_v18  ;;  %v456_v18 = vld [vmem:[%s3599_s14 + $0x1d0] sm:$0xff] }
  0x61   : >> { %3196 = vmatmul.msk.f32.gmra.mxu3 %vm490_vm1, %v469_v51  ;;  %v458_v51 = vld [vmem:[%s3599_s14 + $0x1e0] sm:$0xff] }
  0x66   : >> { %3133 = vmatmul.msk.f32.gmra.mxu0 %vm490_vm1, %v406_v20  ;;  %3169 = vmatmul.msk.f32.gmra.mxu2 %vm490_vm1, %v442_v21  ;;  %v3739_v20 = vld [vmem:[%s5291_s2] ss:$0 sm:$0xff] }
  0x67   : >> { %v474_v21 = vld [vmem:[%s3599_s14 + $0x260] sm:$0xff] }
  0x69   : >> { %3197 = vmatmul.msk.f32.gmra.mxu3 %vm490_vm1, %v470_v56 }
  0x6e   : >> { %3134 = vmatmul.msk.f32.gmra.mxu0 %vm490_vm1, %v407_v23  ;;  %3170 = vmatmul.msk.f32.gmra.mxu2 %vm490_vm1, %v443_v24 }
  0x71   : >> { %3198 = vmatmul.msk.f32.gmra.mxu3 %vm490_vm1, %v471_v61 }
  0x76   : >> { %3135 = vmatmul.msk.f32.gmra.mxu0 %vm490_vm1, %v408_v26  ;;  %3171 = vmatmul.msk.f32.gmra.mxu2 %vm490_vm1, %v444_v27 }
  0x79   : >> { %3199 = vmatmul.msk.f32.gmra.mxu3 %vm490_vm1, %v472_v2 }
  0x7e   : >> { %3136 = vmatmul.msk.f32.gmra.mxu0 %vm490_vm1, %v409_v29  ;;  %3172 = vmatmul.msk.f32.gmra.mxu2 %vm490_vm1, %v445_v30 }
  0x81   : >> { %3200 = vmatmul.msk.f32.gmra.mxu3 %vm490_vm1, %v473_v8 }
  0x86   : >> { %3137 = vmatmul.msk.f32.gmra.mxu0 %vm490_vm1, %v410_v31  ;;  %3173 = vmatmul.msk.f32.gmra.mxu2 %vm490_vm1, %v446_v32 }
  0x89   : >> { %3201 = vmatmul.msk.f32.gmra.mxu3 %vm490_vm1, %v474_v21  ;;  %v426_v21 = vld [vmem:[%s3599_s14 + $0xe0] sm:$0xff] }
  0x8e   : >> { %3138 = vmatmul.msk.f32.gmra.mxu0 %vm490_vm1, %v411_v34  ;;  %3174 = vmatmul.msk.f32.gmra.mxu2 %vm490_vm1, %v447_v35 }
  0x96   : >> { %3139 = vmatmul.msk.f32.gmra.mxu0 %vm490_vm1, %v412_v37  ;;  %3175 = vmatmul.msk.f32.gmra.mxu2 %vm490_vm1, %v448_v38  ;;  %v421_v37 = vld [vmem:[%s3599_s14 + $0xb8] sm:$0xff] }
  0x97   : >> { %v457_v38 = vld [vmem:[%s3599_s14 + $0x1d8] sm:$0xff] }
  0x9e   : >> { %3140 = vmatmul.msk.f32.gmra.mxu0 %vm490_vm1, %v413_v40  ;;  %3176 = vmatmul.msk.f32.gmra.mxu2 %vm490_vm1, %v449_v41  ;;  %v475_v41 = vld [vmem:[%s3599_s14 + $0x268] sm:$0xff] }
  0x9f   : >> { %3202 = vmatmul.msk.f32.gmra.mxu3 %vm490_vm1, %v475_v41 }
  0xa3   : >> { %v785_v43 = vpop.f32.mrf.mxu0 }
  0xa4   : >> { %1059 = vst.msk [vmem:[#allocation2] sm:$0xff] %vm1058_vm2, %v785_v43  ;;  %v881_v7 = vpop.f32.mrf.mxu1 }
  0xa5   : >> { %1091 = vst.msk [vmem:[#allocation2 + $0x100] sm:$0xff] %vm1058_vm2, %v881_v7  ;;  %v478_v7 = vld [vmem:[%s3599_s14 + $0x280] sm:$0xff] }
  0xa6   : >> { %3141 = vmatmul.msk.f32.gmra.mxu0 %vm490_vm1, %v414_v44  ;;  %3177 = vmatmul.msk.f32.gmra.mxu2 %vm490_vm1, %v450_v45 }
  0xa9   : >> { %v893_v47 = vpop.f32.mrf.mxu2 }
  0xaa   : >> { %1095 = vst.msk [vmem:[#allocation2 + $0x120] sm:$0xff] %vm1058_vm2, %v893_v47 }
  0xab   : >> { %v788_v48 = vpop.f32.mrf.mxu0 }
  0xac   : >> { %1060 = vst.msk [vmem:[#allocation2 + $0x8] sm:$0xff] %vm1058_vm2, %v788_v48  ;;  %v884_v23 = vpop.f32.mrf.mxu1 }
  0xad   : >> { %1092 = vst.msk [vmem:[#allocation2 + $0x108] sm:$0xff] %vm1058_vm2, %v884_v23  ;;  %v480_v23 = vld [vmem:[%s3599_s14 + $0x290] sm:$0xff] }
  0xae   : >> { %3142 = vmatmul.msk.f32.gmra.mxu0 %vm490_vm1, %v415_v49  ;;  %3178 = vmatmul.msk.f32.gmra.mxu2 %vm490_vm1, %v451_v50  ;;  %v422_v50 = vld [vmem:[%s3599_s14 + $0xc0] sm:$0xff] }
  0xb1   : >> { %v896_v52 = vpop.f32.mrf.mxu2 }
  0xb2   : >> { %1096 = vst.msk [vmem:[#allocation2 + $0x128] sm:$0xff] %vm1058_vm2, %v896_v52 }
  0xb3   : >> { %v791_v53 = vpop.f32.mrf.mxu0  ;;  %v1152_v9 = vld [vmem:[#allocation2] ss:$2 sm:$0xff]  ;;  %v1156_v10 = vld [vmem:[#allocation2 + $0x1] ss:$2 sm:$0xff] }
  0xb4   : >> { %1061 = vst.msk [vmem:[#allocation2 + $0x10] sm:$0xff] %vm1058_vm2, %v791_v53  ;;  %v1159_v12 = vmax.f32 %v1152_v9, %v1156_v10  ;;  %v887_v43 = vpop.f32.mrf.mxu1  ;;  %v476_v53 = vld [vmem:[%s3599_s14 + $0x270] sm:$0xff]  ;;  %v977_v10 = vpop.f32.mrf.mxu3 }
  0xb5   : >> { %1093 = vst.msk [vmem:[#allocation2 + $0x110] sm:$0xff] %vm1058_vm2, %v887_v43  ;;  %3203 = vmatmul.msk.f32.gmra.mxu3 %vm490_vm1, %v476_v53 }
  0xb6   : >> { %3143 = vmatmul.msk.f32.gmra.mxu0 %vm490_vm1, %v416_v54  ;;  %3179 = vmatmul.msk.f32.gmra.mxu2 %vm490_vm1, %v452_v55  ;;  %1123 = vst.msk [vmem:[#allocation2 + $0x200] sm:$0xff] %vm1058_vm2, %v977_v10 }
  0xb9   : >> { %v899_v57 = vpop.f32.mrf.mxu2 }
  0xba   : >> { %1097 = vst.msk [vmem:[#allocation2 + $0x130] sm:$0xff] %vm1058_vm2, %v899_v57  ;;  %v423_v57 = vld [vmem:[%s3599_s14 + $0xc8] sm:$0xff] }
  0xbb   : >> { %v794_v58 = vpop.f32.mrf.mxu0 }
  0xbc   : >> { %1062 = vst.msk [vmem:[#allocation2 + $0x18] sm:$0xff] %vm1058_vm2, %v794_v58  ;;  %v890_v54 = vpop.f32.mrf.mxu1  ;;  %v459_v58 = vld [vmem:[%s3599_s14 + $0x1e8] sm:$0xff] }
  0xbd   : >> { %1094 = vst.msk [vmem:[#allocation2 + $0x118] sm:$0xff] %vm1058_vm2, %v890_v54 }
  0xbe   : >> { %3144 = vmatmul.msk.f32.gmra.mxu0 %vm490_vm1, %v417_v59  ;;  %3180 = vmatmul.msk.f32.gmra.mxu2 %vm490_vm1, %v453_v60  ;;  %v477_v59 = vld [vmem:[%s3599_s14 + $0x278] sm:$0xff] }
  0xbf   : >> { %3204 = vmatmul.msk.f32.gmra.mxu3 %vm490_vm1, %v477_v59 }
  0xc1   : >> { %v902_v62 = vpop.f32.mrf.mxu2  ;;  %v1298_v13 = vld [vmem:[#allocation2 + $0x128] ss:$2 sm:$0x1f]  ;;  %v1302_v15 = vld [vmem:[#allocation2 + $0x129] ss:$2 sm:$0x1f] }
  0xc2   : >> { %1098 = vst.msk [vmem:[#allocation2 + $0x138] sm:$0xff] %vm1058_vm2, %v902_v62  ;;  %v1304_v24 = vmax.f32 %v1298_v13, %v1302_v15  ;;  %v425_v13 = vld [vmem:[%s3599_s14 + $0xd8] sm:$0xff]  ;;  %v479_v15 = vld [vmem:[%s3599_s14 + $0x288] sm:$0xff] }
  0xc3   : >> { %v797_v63 = vpop.f32.mrf.mxu0  ;;  %v1154_v26 = vld [vmem:[#allocation2 + $0x10] ss:$2 sm:$0x1f]  ;;  %v1158_v27 = vld [vmem:[#allocation2 + $0x11] ss:$2 sm:$0x1f] }
  0xc4   : >> { %1063 = vst.msk [vmem:[#allocation2 + $0x20] sm:$0xff] %vm1058_vm2, %v797_v63  ;;  %v1160_v32 = vmax.f32 %v1154_v26, %v1158_v27  ;;  %v1296_v61 = vld [vmem:[#allocation2 + $0x118] ss:$2 sm:$0xff]  ;;  %v1300_v62 = vld [vmem:[#allocation2 + $0x119] ss:$2 sm:$0xff] }
  0xc5   : >> { %v1303_v63 = vmax.f32 %v1296_v61, %v1300_v62  ;;  %v482_v62 = vld [vmem:[%s3599_s14 + $0x2a0] sm:$0xff] }
  0xc6   : >> { %3145 = vmatmul.msk.f32.gmra.mxu0 %vm490_vm1, %v418_v0  ;;  %3181 = vmatmul.msk.f32.gmra.mxu2 %vm490_vm1, %v454_v1 }
  0xc7   : >> { %3205 = vmatmul.msk.f32.gmra.mxu3 %vm490_vm1, %v478_v7 }
  0xc9   : >> { %v905_v3 = vpop.f32.mrf.mxu2 }
  0xca   : >> { %1099 = vst.msk [vmem:[#allocation2 + $0x140] sm:$0xff] %vm1058_vm2, %v905_v3 }
  0xcb   : >> { %v800_v4 = vpop.f32.mrf.mxu0 }
  0xcc   : >> { %1064 = vst.msk [vmem:[#allocation2 + $0x28] sm:$0xff] %vm1058_vm2, %v800_v4  ;;  %v424_v4 = vld [vmem:[%s3599_s14 + $0xd0] sm:$0xff] }
  0xce   : >> { %3146 = vmatmul.msk.f32.gmra.mxu0 %vm490_vm1, %v419_v5  ;;  %3182 = vmatmul.msk.f32.gmra.mxu2 %vm490_vm1, %v455_v6  ;;  %v460_v5 = vld [vmem:[%s3599_s14 + $0x1f0] sm:$0xff] }
  0xcf   : >> { %3206 = vmatmul.msk.f32.gmra.mxu3 %vm490_vm1, %v479_v15  ;;  %v484_v15 = vld [vmem:[%s3599_s14 + $0x2b0] sm:$0xff] }
  0xd1   : >> { %v908_v11 = vpop.f32.mrf.mxu2  ;;  %v1306_v60 = vld [vmem:[#allocation2 + $0x134] ss:$2 sm:$0xff]  ;;  %v1312_v0 = vld [vmem:[#allocation2 + $0x135] ss:$2 sm:$0xff] }
  0xd2   : >> { %1100 = vst.msk [vmem:[#allocation2 + $0x148] sm:$0xff] %vm1058_vm2, %v908_v11  ;;  %v1309_v1 = vmax.f32 %v1303_v63, %v1306_v60 }
  0xd3   : >> { %v1162_v16 = vld [vmem:[#allocation2 + $0x1c] ss:$2 sm:$0xff]  ;;  %v803_v17 = vpop.f32.mrf.mxu0  ;;  %v1168_v22 = vld [vmem:[#allocation2 + $0x1d] ss:$2 sm:$0xff] }
  0xd4   : >> { %v1165_v19 = vmax.f32 %v1159_v12, %v1162_v16  ;;  %1065 = vst.msk [vmem:[#allocation2 + $0x30] sm:$0xff] %vm1058_vm2, %v803_v17  ;;  %v1315_v6 = vmax.f32 %v1309_v1, %v1312_v0 }
  0xd6   : >> { %v1171_v25 = vmax.f32 %v1165_v19, %v1168_v22  ;;  %3147 = vmatmul.msk.f32.gmra.mxu0 %vm490_vm1, %v420_v14  ;;  %3183 = vmatmul.msk.f32.gmra.mxu2 %vm490_vm1, %v456_v18  ;;  %v1317_v8 = vadd.f32 %v3739_v20, %v1315_v6  ;;  %v461_v14 = vld [vmem:[%s3599_s14 + $0x1f8] sm:$0xff]  ;;  %v980_v22 = vpop.f32.mrf.mxu3 }
  0xd7   : >> { %1124 = vst.msk [vmem:[#allocation2 + $0x208] sm:$0xff] %vm1058_vm2, %v980_v22  ;;  %3207 = vmatmul.msk.f32.gmra.mxu3 %vm490_vm1, %v480_v23  ;;  %v429_v6 = vld [vmem:[%s3599_s14 + $0xf8] sm:$0xff] }
  0xd8   : >> { %v1176_v28 = vadd.f32 %v3739_v20, %v1171_v25  ;;  %v1319_v11 = vmax.f32 %v1317_v8, 0.0 }
  0xd9   : >> { %v1308_v29 = vld [vmem:[#allocation2 + $0x144] ss:$2 sm:$0x1f]  ;;  %v1314_v30 = vld [vmem:[#allocation2 + $0x145] ss:$2 sm:$0x1f]  ;;  %v911_v31 = vpop.f32.mrf.mxu2 }
  0xda   : >> { %v1310_v33 = vmax.f32 %v1304_v24, %v1308_v29  ;;  %1101 = vst.msk [vmem:[#allocation2 + $0x150] sm:$0xff] %vm1058_vm2, %v911_v31  ;;  %v1178_v34 = vmax.f32 %v1176_v28, 0.0 }
  0xdb   : >> { %v1164_v35 = vld [vmem:[#allocation2 + $0x2c] ss:$2 sm:$0x1f]  ;;  %v806_v36 = vpop.f32.mrf.mxu0  ;;  %v1170_v42 = vld [vmem:[#allocation2 + $0x2d] ss:$2 sm:$0x1f] }
  0xdc   : >> { %v1316_v39 = vmax.f32 %v1310_v33, %v1314_v30  ;;  %v1166_v40 = vmax.f32 %v1160_v32, %v1164_v35  ;;  %1066 = vst.msk [vmem:[#allocation2 + $0x38] sm:$0xff] %vm1058_vm2, %v806_v36  ;;  %v427_v36 = vld [vmem:[%s3599_s14 + $0xe8] sm:$0xff] }
  0xdd   : >> { %1180 = vst.msk [vmem:[#allocation3] sm:$0xff] %vm1058_vm2, %v1178_v34 }
  0xde   : >> { %v1318_v44 = vadd.f32 %v3739_v20, %v1316_v39  ;;  %v1172_v45 = vmax.f32 %v1166_v40, %v1170_v42  ;;  %3148 = vmatmul.msk.f32.gmra.mxu0 %vm490_vm1, %v421_v37  ;;  %3184 = vmatmul.msk.f32.gmra.mxu2 %vm490_vm1, %v457_v38  ;;  %1321 = vst.msk [vmem:[#allocation3 + $0x41] sm:$0xff] %vm1058_vm2, %v1319_v11  ;;  %v983_v37 = vpop.f32.mrf.mxu3  ;;  %v483_v11 = vld [vmem:[%s3599_s14 + $0x2a8] sm:$0xff] }
  0xdf   : >> { %1125 = vst.msk [vmem:[#allocation2 + $0x210] sm:$0xff] %vm1058_vm2, %v983_v37 }
  0xe0   : >> { %v1320_v46 = vmax.f32 %v1318_v44, 0.0  ;;  %v1177_v47 = vadd.f32 %v3739_v20, %v1172_v45 }
  0xe1   : >> { %v914_v48 = vpop.f32.mrf.mxu2 }
  0xe2   : >> { %1102 = vst.msk [vmem:[#allocation2 + $0x158] sm:$0xff] %vm1058_vm2, %v914_v48  ;;  %v1179_v52 = vmax.f32 %v1177_v47, 0.0 }
  0xe3   : >> { %v809_v49 = vpop.f32.mrf.mxu0  ;;  %1322 = vst.msk [vmem:[#allocation3 + $0x49] sm:$0x1f] %vm1181_vm3, %v1320_v46  ;;  %v481_v46 = vld [vmem:[%s3599_s14 + $0x298] sm:$0xff] }
  0xe4   : >> { %1067 = vst.msk [vmem:[#allocation2 + $0x40] sm:$0xff] %vm1058_vm2, %v809_v49  ;;  %3208 = vmatmul.msk.f32.gmra.mxu3 %vm490_vm1, %v481_v46 }
  0xe5   : >> { %1182 = vst.msk [vmem:[#allocation3 + $0x8] sm:$0x1f] %vm1181_vm3, %v1179_v52 }
  0xe6   : >> { %3149 = vmatmul.msk.f32.gmra.mxu0 %vm490_vm1, %v422_v50  ;;  %3185 = vmatmul.msk.f32.gmra.mxu2 %vm490_vm1, %v458_v51 }
  0xe9   : >> { %v917_v55 = vpop.f32.mrf.mxu2  ;;  %v1324_v17 = vld [vmem:[#allocation2 + $0x150] ss:$2 sm:$0xff]  ;;  %v1328_v18 = vld [vmem:[#allocation2 + $0x151] ss:$2 sm:$0xff] }
  0xea   : >> { %1103 = vst.msk [vmem:[#allocation2 + $0x160] sm:$0xff] %vm1058_vm2, %v917_v55  ;;  %v1331_v24 = vmax.f32 %v1324_v17, %v1328_v18 }
  0xeb   : >> { %v812_v56 = vpop.f32.mrf.mxu0  ;;  %v1184_v25 = vld [vmem:[#allocation2 + $0x38] ss:$2 sm:$0xff]  ;;  %v1188_v26 = vld [vmem:[#allocation2 + $0x39] ss:$2 sm:$0xff] }
  0xec   : >> { %1068 = vst.msk [vmem:[#allocation2 + $0x48] sm:$0xff] %vm1058_vm2, %v812_v56  ;;  %v1191_v30 = vmax.f32 %v1184_v25, %v1188_v26  ;;  %3209 = vmatmul.msk.f32.gmra.mxu3 %vm490_vm1, %v482_v62  ;;  %v1539_v7 = vld [vmem:[#allocation3 + $0x1] sm:$0xff] }
  0xee   : >> { %3150 = vmatmul.msk.f32.gmra.mxu0 %vm490_vm1, %v423_v57  ;;  %3186 = vmatmul.msk.f32.gmra.mxu2 %vm490_vm1, %v459_v58  ;;  %v428_v57 = vld [vmem:[%s3599_s14 + $0xf0] sm:$0xff]  ;;  %v986_v58 = vpop.f32.mrf.mxu3 }
  0xef   : >> { %1126 = vst.msk [vmem:[#allocation2 + $0x218] sm:$0xff] %vm1058_vm2, %v986_v58 }
  0xf1   : >> { %v920_v2 = vpop.f32.mrf.mxu2 }
  0xf2   : >> { %1104 = vst.msk [vmem:[#allocation2 + $0x168] sm:$0xff] %vm1058_vm2, %v920_v2 }
  0xf3   : >> { %v815_v3 = vpop.f32.mrf.mxu0 }
  0xf4   : >> { %1069 = vst.msk [vmem:[#allocation2 + $0x50] sm:$0xff] %vm1058_vm2, %v815_v3  ;;  %3210 = vmatmul.msk.f32.gmra.mxu3 %vm490_vm1, %v483_v11 }
  0xf6   : >> { %3151 = vmatmul.msk.f32.gmra.mxu0 %vm490_vm1, %v424_v4  ;;  %3187 = vmatmul.msk.f32.gmra.mxu2 %vm490_vm1, %v460_v5 }
  0xf9   : >> { %v923_v9 = vpop.f32.mrf.mxu2  ;;  %v1326_v31 = vld [vmem:[#allocation2 + $0x160] ss:$2 sm:$0x1f]  ;;  %v1330_v33 = vld [vmem:[#allocation2 + $0x161] ss:$2 sm:$0x1f] }
  0xfa   : >> { %1105 = vst.msk [vmem:[#allocation2 + $0x170] sm:$0xff] %vm1058_vm2, %v923_v9  ;;  %v1332_v41 = vmax.f32 %v1326_v31, %v1330_v33  ;;  %v989_v9 = vpop.f32.mrf.mxu3 }
  0xfb   : >> { %v818_v12 = vpop.f32.mrf.mxu0  ;;  %v1186_v42 = vld [vmem:[#allocation2 + $0x48] ss:$2 sm:$0x1f]  ;;  %v1190_v45 = vld [vmem:[#allocation2 + $0x49] ss:$2 sm:$0x1f] }
  0xfc   : >> { %1070 = vst.msk [vmem:[#allocation2 + $0x58] sm:$0xff] %vm1058_vm2, %v818_v12  ;;  %v1192_v52 = vmax.f32 %v1186_v42, %v1190_v45  ;;  %3211 = vmatmul.msk.f32.gmra.mxu3 %vm490_vm1, %v484_v15 }
  0xfd   : >> { %1127 = vst.msk [vmem:[#allocation2 + $0x220] sm:$0xff] %vm1058_vm2, %v989_v9 }
  0xfe   : >> { %3152 = vmatmul.msk.f32.gmra.mxu0 %vm490_vm1, %v425_v13  ;;  %3188 = vmatmul.msk.f32.gmra.mxu2 %vm490_vm1, %v461_v14 }
 0x101   : >> { %v926_v16 = vpop.f32.mrf.mxu2 }
 0x102   : >> { %1106 = vst.msk [vmem:[#allocation2 + $0x178] sm:$0xff] %vm1058_vm2, %v926_v16  ;;  %v992_v14 = vpop.f32.mrf.mxu3 }
 0x103   : >> { %v821_v19 = vpop.f32.mrf.mxu0  ;;  %1128 = vst.msk [vmem:[#allocation2 + $0x228] sm:$0xff] %vm1058_vm2, %v992_v14 }
 0x104   : >> { %1071 = vst.msk [vmem:[#allocation2 + $0x60] sm:$0xff] %vm1058_vm2, %v821_v19  ;;  %v485_v19 = vld [vmem:[%s3599_s14 + $0x2b8] sm:$0xff] }
 0x105   : >> { %3212 = vmatmul.msk.f32.gmra.mxu3 %vm490_vm1, %v485_v19 }
 0x106   : >> { %3153 = vmatmul.msk.f32.gmra.mxu0 %vm490_vm1, %v426_v21 }
 0x109   : >> { %v1334_v27 = vld [vmem:[#allocation2 + $0x16c] ss:$2 sm:$0xff]  ;;  %v1340_v28 = vld [vmem:[#allocation2 + $0x16d] ss:$2 sm:$0xff]  ;;  %v929_v29 = vpop.f32.mrf.mxu2 }
 0x10a   : >> { %v1337_v32 = vmax.f32 %v1331_v24, %v1334_v27  ;;  %1107 = vst.msk [vmem:[#allocation2 + $0x180] sm:$0xff] %vm1058_vm2, %v929_v29  ;;  %v995_v18 = vpop.f32.mrf.mxu3  ;;  %v486_v24 = vld [vmem:[%s3599_s14 + $0x2c0] sm:$0xff] }
 0x10b   : >> { %v1194_v34 = vld [vmem:[#allocation2 + $0x54] ss:$2 sm:$0xff]  ;;  %v824_v35 = vpop.f32.mrf.mxu0  ;;  %v1200_v40 = vld [vmem:[#allocation2 + $0x55] ss:$2 sm:$0xff]  ;;  %1129 = vst.msk [vmem:[#allocation2 + $0x230] sm:$0xff] %vm1058_vm2, %v995_v18 }
 0x10c   : >> { %v1343_v38 = vmax.f32 %v1337_v32, %v1340_v28  ;;  %v1197_v39 = vmax.f32 %v1191_v30, %v1194_v34  ;;  %1072 = vst.msk [vmem:[#allocation2 + $0x68] sm:$0xff] %vm1058_vm2, %v824_v35  ;;  %v487_v30 = vld [vmem:[%s3599_s14 + $0x2c8] sm:$0xff] }
 0x10d   : >> { %3213 = vmatmul.msk.f32.gmra.mxu3 %vm490_vm1, %v486_v24 }
 0x10e   : >> { %v1345_v43 = vadd.f32 %v3739_v20, %v1343_v38  ;;  %v1203_v44 = vmax.f32 %v1197_v39, %v1200_v40  ;;  %3154 = vmatmul.msk.f32.gmra.mxu0 %vm490_vm1, %v427_v36 }
 0x110   : >> { %v1347_v47 = vmax.f32 %v1345_v43, 0.0  ;;  %v1205_v48 = vadd.f32 %v3739_v20, %v1203_v44 }
 0x111   : >> { %v1336_v49 = vld [vmem:[#allocation2 + $0x17c] ss:$2 sm:$0x1f]  ;;  %v1342_v50 = vld [vmem:[#allocation2 + $0x17d] ss:$2 sm:$0x1f]  ;;  %v932_v51 = vpop.f32.mrf.mxu2 }
 0x112   : >> { %1349 = vst.msk [vmem:[#allocation3 + $0x4e] sm:$0xff] %vm1058_vm2, %v1347_v47  ;;  %v1207_v53 = vmax.f32 %v1205_v48, 0.0  ;;  %v1338_v54 = vmax.f32 %v1332_v41, %v1336_v49  ;;  %v998_v23 = vpop.f32.mrf.mxu3 }
 0x113   : >> { %v1196_v55 = vld [vmem:[#allocation2 + $0x64] ss:$2 sm:$0x1f]  ;;  %v827_v56 = vpop.f32.mrf.mxu0  ;;  %v1202_v61 = vld [vmem:[#allocation2 + $0x65] ss:$2 sm:$0x1f] }
 0x114   : >> { %1209 = vst.msk [vmem:[#allocation3 + $0xd] sm:$0xff] %vm1058_vm2, %v1207_v53  ;;  %v1344_v59 = vmax.f32 %v1338_v54, %v1342_v50  ;;  %v1198_v60 = vmax.f32 %v1192_v52, %v1196_v55 }
 0x115   : >> { %1108 = vst.msk [vmem:[#allocation2 + $0x188] sm:$0xff] %vm1058_vm2, %v932_v51  ;;  %3214 = vmatmul.msk.f32.gmra.mxu3 %vm490_vm1, %v487_v30 }
 0x116   : >> { %v1346_v63 = vadd.f32 %v3739_v20, %v1344_v59  ;;  %v1204_v0 = vmax.f32 %v1198_v60, %v1202_v61  ;;  %1073 = vst.msk [vmem:[#allocation2 + $0x70] sm:$0xff] %vm1058_vm2, %v827_v56  ;;  %3155 = vmatmul.msk.f32.gmra.mxu0 %vm490_vm1, %v428_v57 }
 0x117   : >> { %1130 = vst.msk [vmem:[#allocation2 + $0x238] sm:$0xff] %vm1058_vm2, %v998_v23 }
 0x118   : >> { %v1348_v1 = vmax.f32 %v1346_v63, 0.0  ;;  %v1206_v2 = vadd.f32 %v3739_v20, %v1204_v0 }
 0x119   : >> { %v935_v3 = vpop.f32.mrf.mxu2 }
 0x11a   : >> { %v1208_v4 = vmax.f32 %v1206_v2, 0.0  ;;  %1109 = vst.msk [vmem:[#allocation2 + $0x190] sm:$0xff] %vm1058_vm2, %v935_v3  ;;  %v1001_v29 = vpop.f32.mrf.mxu3 }
 0x11b   : >> { %v830_v5 = vpop.f32.mrf.mxu0  ;;  %v1540_v8 = vld [vmem:[#allocation3 + $0x9] sm:$0xff]  ;;  %1350 = vst.msk [vmem:[#allocation3 + $0x56] sm:$0x1f] %vm1181_vm3, %v1348_v1 }
 0x11c   : >> { %1074 = vst.msk [vmem:[#allocation2 + $0x78] sm:$0xff] %vm1058_vm2, %v830_v5  ;;  %v3279_v10 = vpack.i.bf16 %v1540_v8, %v1539_v7  ;;  %v1559_v3 = vld [vmem:[#allocation3 + $0xd] sm:$0xff] }
 0x11d   : >> { %1210 = vst.msk [vmem:[#allocation3 + $0x15] sm:$0x1f] %vm1181_vm3, %v1208_v4 }
 0x11e   : >> { %3156 = vmatmul.msk.f32.gmra.mxu0 %vm490_vm1, %v429_v6  ;;  %3280 = vrot.lane.b32.xlu0 %v3279_v10, %s5277_s16  ;;  %1131 = vst.msk [vmem:[#allocation2 + $0x240] sm:$0xff] %vm1058_vm2, %v1001_v29  ;;  %v1436_v23 = vld [vmem:[#allocation2 + $0x230] ss:$2 sm:$0xff]  ;;  %v1440_v24 = vld [vmem:[#allocation2 + $0x231] ss:$2 sm:$0xff] }
 0x121   : >> { %v938_v12 = vpop.f32.mrf.mxu2  ;;  %v1352_v26 = vld [vmem:[#allocation2 + $0x188] ss:$2 sm:$0xff]  ;;  %v1356_v27 = vld [vmem:[#allocation2 + $0x189] ss:$2 sm:$0xff] }
 0x122   : >> { %1110 = vst.msk [vmem:[#allocation2 + $0x198] sm:$0xff] %vm1058_vm2, %v938_v12  ;;  %v1359_v31 = vmax.f32 %v1352_v26, %v1356_v27  ;;  %v1004_v41 = vpop.f32.mrf.mxu3 }
 0x123   : >> { %v833_v13 = vpop.f32.mrf.mxu0  ;;  %v1212_v32 = vld [vmem:[#allocation2 + $0x70] ss:$2 sm:$0xff]  ;;  %v1216_v33 = vld [vmem:[#allocation2 + $0x71] ss:$2 sm:$0xff]  ;;  %1132 = vst.msk [vmem:[#allocation2 + $0x248] sm:$0xff] %vm1058_vm2, %v1004_v41 }
 0x124   : >> { %1075 = vst.msk [vmem:[#allocation2 + $0x80] sm:$0xff] %vm1058_vm2, %v833_v13  ;;  %v1219_v37 = vmax.f32 %v1212_v32, %v1216_v33  ;;  %v1579_v5 = vld [vmem:[#allocation3 + $0xe] sm:$0xff] }
 0x125   : >> { %v1420_v33 = vld [vmem:[#allocation2 + $0x224] ss:$2 sm:$0x1f] }
 0x129   : >> { %v941_v16 = vpop.f32.mrf.mxu2 }
 0x12a   : >> { %1111 = vst.msk [vmem:[#allocation2 + $0x1a0] sm:$0xff] %vm1058_vm2, %v941_v16  ;;  %v1007_v56 = vpop.f32.mrf.mxu3 }
 0x12b   : >> { %v836_v17 = vpop.f32.mrf.mxu0  ;;  %1133 = vst.msk [vmem:[#allocation2 + $0x250] sm:$0xff] %vm1058_vm2, %v1007_v56 }
 0x12c   : >> { %1076 = vst.msk [vmem:[#allocation2 + $0x88] sm:$0xff] %vm1058_vm2, %v836_v17  ;;  %v1541_v17 = vld [vmem:[#allocation3 + $0x11] sm:$0xff] }
 0x131   : >> { %v944_v21 = vpop.f32.mrf.mxu2  ;;  %v1354_v57 = vld [vmem:[#allocation2 + $0x198] ss:$2 sm:$0x1f]  ;;  %v1358_v60 = vld [vmem:[#allocation2 + $0x199] ss:$2 sm:$0x1f] }
 0x132   : >> { %1112 = vst.msk [vmem:[#allocation2 + $0x1a8] sm:$0xff] %vm1058_vm2, %v944_v21  ;;  %v1360_v63 = vmax.f32 %v1354_v57, %v1358_v60  ;;  %v1010_v8 = vpop.f32.mrf.mxu3 }
 0x133   : >> { %v839_v22 = vpop.f32.mrf.mxu0  ;;  %v1214_v47 = vld [vmem:[#allocation2 + $0x80] ss:$2 sm:$0x1f]  ;;  %v1218_v48 = vld [vmem:[#allocation2 + $0x81] ss:$2 sm:$0x1f] }
 0x134   : >> { %1077 = vst.msk [vmem:[#allocation2 + $0x90] sm:$0xff] %vm1058_vm2, %v839_v22  ;;  %v1220_v52 = vmax.f32 %v1214_v47, %v1218_v48  ;;  %v1410_v22 = vld [vmem:[#allocation2 + $0x208] ss:$2 sm:$0x1f] }
 0x135   : >> { %1134 = vst.msk [vmem:[#allocation2 + $0x258] sm:$0xff] %vm1058_vm2, %v1010_v8 }
 0x139   : >> { %v947_v25 = vpop.f32.mrf.mxu2 }
 0x13a   : >> { %1113 = vst.msk [vmem:[#allocation2 + $0x1b0] sm:$0xff] %vm1058_vm2, %v947_v25  ;;  %v1013_v18 = vpop.f32.mrf.mxu3  ;;  %v1414_v25 = vld [vmem:[#allocation2 + $0x209] ss:$2 sm:$0x1f] }
 0x13b   : >> { %v842_v28 = vpop.f32.mrf.mxu0  ;;  %1135 = vst.msk [vmem:[#allocation2 + $0x260] sm:$0xff] %vm1058_vm2, %v1013_v18 }
 0x13c   : >> { %1078 = vst.msk [vmem:[#allocation2 + $0x98] sm:$0xff] %vm1058_vm2, %v842_v28  ;;  %v1443_v28 = vmax.f32 %v1436_v23, %v1440_v24  ;;  %v1446_v32 = vld [vmem:[#allocation2 + $0x24c] ss:$2 sm:$0xff] }
 0x141   : >> { %v1362_v34 = vld [vmem:[#allocation2 + $0x1a4] ss:$2 sm:$0xff]  ;;  %v1368_v35 = vld [vmem:[#allocation2 + $0x1a5] ss:$2 sm:$0xff]  ;;  %v950_v36 = vpop.f32.mrf.mxu2 }
 0x142   : >> { %v1365_v38 = vmax.f32 %v1359_v31, %v1362_v34  ;;  %1114 = vst.msk [vmem:[#allocation2 + $0x1b8] sm:$0xff] %vm1058_vm2, %v950_v36  ;;  %v1016_v30 = vpop.f32.mrf.mxu3  ;;  %v1416_v31 = vmax.f32 %v1410_v22, %v1414_v25  ;;  %v1449_v34 = vmax.f32 %v1443_v28, %v1446_v32  ;;  %v1452_v36 = vld [vmem:[#allocation2 + $0x24d] ss:$2 sm:$0xff] }
 0x143   : >> { %v1222_v39 = vld [vmem:[#allocation2 + $0x8c] ss:$2 sm:$0xff]  ;;  %v845_v40 = vpop.f32.mrf.mxu0  ;;  %v1228_v44 = vld [vmem:[#allocation2 + $0x8d] ss:$2 sm:$0xff]  ;;  %1136 = vst.msk [vmem:[#allocation2 + $0x268] sm:$0xff] %vm1058_vm2, %v1016_v30 }
 0x144   : >> { %v1371_v42 = vmax.f32 %v1365_v38, %v1368_v35  ;;  %v1225_v43 = vmax.f32 %v1219_v37, %v1222_v39  ;;  %1079 = vst.msk [vmem:[#allocation2 + $0xa0] sm:$0xff] %vm1058_vm2, %v845_v40  ;;  %v1422_v35 = vmax.f32 %v1416_v31, %v1420_v33  ;;  %v1426_v37 = vld [vmem:[#allocation2 + $0x225] ss:$2 sm:$0x1f]  ;;  %v1455_v40 = vmax.f32 %v1449_v34, %v1452_v36  ;;  %v1418_v30 = vld [vmem:[#allocation2 + $0x214] ss:$2 sm:$0xff] }
 0x145   : >> { %v1448_v33 = vld [vmem:[#allocation2 + $0x25c] ss:$2 sm:$0x1f] }
 0x146   : >> { %v1373_v45 = vadd.f32 %v3739_v20, %v1371_v42  ;;  %v1231_v46 = vmax.f32 %v1225_v43, %v1228_v44  ;;  %v1428_v42 = vmax.f32 %v1422_v35, %v1426_v37  ;;  %v1457_v43 = vadd.f32 %v3739_v20, %v1455_v40 }
 0x148   : >> { %v1375_v49 = vmax.f32 %v1373_v45, 0.0  ;;  %v1233_v50 = vadd.f32 %v3739_v20, %v1231_v46  ;;  %v1430_v44 = vadd.f32 %v3739_v20, %v1428_v42  ;;  %v1916_v42 = vld [vmem:[%s5292_s3 + $0x78] sm:$0xff] }
 0x149   : >> { %v953_v51 = vpop.f32.mrf.mxu2  ;;  %v1364_v1 = vld [vmem:[#allocation2 + $0x1b4] ss:$2 sm:$0x1f]  ;;  %v1370_v12 = vld [vmem:[#allocation2 + $0x1b5] ss:$2 sm:$0x1f]  ;;  %1917 = vmatpush.msrb.mxu1 %v1916_v42 }
 0x14a   : >> { %1377 = vst.msk [vmem:[#allocation3 + $0x5b] sm:$0xff] %vm1058_vm2, %v1375_v49  ;;  %v1235_v53 = vmax.f32 %v1233_v50, 0.0  ;;  %v1366_v11 = vmax.f32 %v1360_v63, %v1364_v1  ;;  %v1019_v41 = vpop.f32.mrf.mxu3  ;;  %v1432_v46 = vmax.f32 %v1430_v44, 0.0  ;;  %v1424_v44 = vld [vmem:[#allocation2 + $0x215] ss:$2 sm:$0xff] }
 0x14b   : >> { %v1224_v54 = vld [vmem:[#allocation2 + $0x9c] ss:$2 sm:$0x1f]  ;;  %v848_v55 = vpop.f32.mrf.mxu0  ;;  %v1230_v59 = vld [vmem:[#allocation2 + $0x9d] ss:$2 sm:$0x1f] }
 0x14c   : >> { %1237 = vst.msk [vmem:[#allocation3 + $0x1a] sm:$0xff] %vm1058_vm2, %v1235_v53  ;;  %v1226_v58 = vmax.f32 %v1220_v52, %v1224_v54  ;;  %v1372_v13 = vmax.f32 %v1366_v11, %v1370_v12  ;;  %v1903_v42 = vld [vmem:[%s5292_s3 + $0x10] sm:$0xff] }
 0x14d   : >> { %1115 = vst.msk [vmem:[#allocation2 + $0x1c0] sm:$0xff] %vm1058_vm2, %v953_v51  ;;  %v1459_v51 = vmax.f32 %v1457_v43, 0.0  ;;  %v1915_v43 = vld [vmem:[%s5292_s3 + $0x70] sm:$0xff] }
 0x14e   : >> { %v1232_v61 = vmax.f32 %v1226_v58, %v1230_v59  ;;  %1080 = vst.msk [vmem:[#allocation2 + $0xa8] sm:$0xff] %vm1058_vm2, %v848_v55  ;;  %v1374_v21 = vadd.f32 %v3739_v20, %v1372_v13  ;;  %1918 = vmatpush.msrb.mxu1 %v1915_v43  ;;  %v1286_v43 = vld [vmem:[#allocation2 + $0x10d] ss:$2 sm:$0x1f] }
 0x14f   : >> { %1137 = vst.msk [vmem:[#allocation2 + $0x270] sm:$0xff] %vm1058_vm2, %v1019_v41 }
 0x150   : >> { %v1234_v62 = vadd.f32 %v3739_v20, %v1232_v61  ;;  %v1376_v27 = vmax.f32 %v1374_v21, 0.0  ;;  %1434 = vst.msk [vmem:[#allocation3 + $0x7d] sm:$0x1f] %vm1181_vm3, %v1432_v46 }
 0x151   : >> { %v956_v0 = vpop.f32.mrf.mxu2  ;;  %1461 = vst.msk [vmem:[#allocation3 + $0x82] sm:$0xff] %vm1058_vm2, %v1459_v51 }
 0x152   : >> { %v1236_v2 = vmax.f32 %v1234_v62, 0.0  ;;  %1116 = vst.msk [vmem:[#allocation2 + $0x1c8] sm:$0xff] %vm1058_vm2, %v956_v0  ;;  %v1022_v50 = vpop.f32.mrf.mxu3 }
 0x153   : >> { %v851_v4 = vpop.f32.mrf.mxu0  ;;  %v1580_v6 = vld [vmem:[#allocation3 + $0x16] sm:$0xff]  ;;  %1378 = vst.msk [vmem:[#allocation3 + $0x63] sm:$0x1f] %vm1181_vm3, %v1376_v27  ;;  %v1442_v27 = vld [vmem:[#allocation2 + $0x241] ss:$2 sm:$0x1f] }
 0x154   : >> { %v1560_v7 = vld [vmem:[#allocation3 + $0x15] sm:$0xff]  ;;  %1238 = vst.msk [vmem:[#allocation3 + $0x22] sm:$0x1f] %vm1181_vm3, %v1236_v2  ;;  %v3289_v9 = vpack.i.bf16 %v1580_v6, %v1579_v5 }
 0x155   : >> { %v3284_v10 = vpack.i.bf16 %v1560_v7, %v1559_v3  ;;  %1081 = vst.msk [vmem:[#allocation2 + $0xb0] sm:$0xff] %vm1058_vm2, %v851_v4  ;;  %v1542_v15 = vld [vmem:[#allocation3 + $0x19] sm:$0xff] }
 0x156   : >> { %3290 = vrot.lane.b32.xlu1 %v3289_v9, %s5279_s21  ;;  %v3294_v19 = vpack.i.bf16 %v1542_v15, %v1541_v17  ;;  %1138 = vst.msk [vmem:[#allocation2 + $0x278] sm:$0xff] %vm1058_vm2, %v1022_v50  ;;  %v1454_v50 = vld [vmem:[#allocation2 + $0x25d] ss:$2 sm:$0x1f]  ;;  %s2282_s21 = sand.u32 7, %s3464_s25 }
 0x157   : >> { %3285 = vrot.lane.b32.xlu0 %v3284_v10, %s5281_s13 }
 0x159   : >> { %v959_v14 = vpop.f32.mrf.mxu2  ;;  %v1380_v47 = vld [vmem:[#allocation2 + $0x1c0] ss:$2 sm:$0xff]  ;;  %v1384_v48 = vld [vmem:[#allocation2 + $0x1c1] ss:$2 sm:$0xff] }
 0x15a   : >> { %1117 = vst.msk [vmem:[#allocation2 + $0x1d0] sm:$0xff] %vm1058_vm2, %v959_v14  ;;  %v1387_v52 = vmax.f32 %v1380_v47, %v1384_v48  ;;  %v1025_v0 = vpop.f32.mrf.mxu3  ;;  %v1464_v47 = vld [vmem:[#allocation2 + $0x268] ss:$2 sm:$0xff]  ;;  %v1468_v48 = vld [vmem:[#allocation2 + $0x269] ss:$2 sm:$0xff] }
 0x15b   : >> { %v854_v16 = vpop.f32.mrf.mxu0  ;;  %1139 = vst.msk [vmem:[#allocation2 + $0x280] sm:$0xff] %vm1058_vm2, %v1025_v0  ;;  %v1561_v35 = vld [vmem:[#allocation3 + $0x1d] sm:$0xff] }
 0x15c   : >> { %1082 = vst.msk [vmem:[#allocation2 + $0xb8] sm:$0xff] %vm1058_vm2, %v854_v16  ;;  %v1240_v53 = vld [vmem:[#allocation2 + $0xa8] ss:$2 sm:$0xff]  ;;  %v1244_v54 = vld [vmem:[#allocation2 + $0xa9] ss:$2 sm:$0xff] }
 0x15d   : >> { %v1247_v58 = vmax.f32 %v1240_v53, %v1244_v54  ;;  %v1913_v53 = vld [vmem:[%s5292_s3 + $0x60] sm:$0xff]  ;;  %v1471_v54 = vmax.f32 %v1464_v47, %v1468_v48  ;;  %v1902_v47 = vld [vmem:[%s5292_s3 + $0x8] sm:$0xff] }
 0x15e   : >> { %3295 = vrot.lane.b32.xlu1 %v3294_v19, %s5277_s16 }
 0x161   : >> { %v962_v26 = vpop.f32.mrf.mxu2 }
 0x162   : >> { %1118 = vst.msk [vmem:[#allocation2 + $0x1d8] sm:$0xff] %vm1058_vm2, %v962_v26  ;;  %v1028_v19 = vpop.f32.mrf.mxu3  ;;  %v1438_v26 = vld [vmem:[#allocation2 + $0x240] ss:$2 sm:$0x1f] }
 0x163   : >> { %v857_v29 = vpop.f32.mrf.mxu0  ;;  %1140 = vst.msk [vmem:[#allocation2 + $0x288] sm:$0xff] %vm1058_vm2, %v1028_v19  ;;  %v1444_v32 = vmax.f32 %v1438_v26, %v1442_v27  ;;  %v1466_v0 = vld [vmem:[#allocation2 + $0x278] ss:$2 sm:$0x1f] }
 0x164   : >> { %1083 = vst.msk [vmem:[#allocation2 + $0xc0] sm:$0xff] %vm1058_vm2, %v857_v29 }
 0x169   : >> { %v965_v38 = vpop.f32.mrf.mxu2  ;;  %v1382_v59 = vld [vmem:[#allocation2 + $0x1d0] ss:$2 sm:$0x1f]  ;;  %v1386_v61 = vld [vmem:[#allocation2 + $0x1d1] ss:$2 sm:$0x1f] }
 0x16a   : >> { %1119 = vst.msk [vmem:[#allocation2 + $0x1e0] sm:$0xff] %vm1058_vm2, %v965_v38  ;;  %v1388_v4 = vmax.f32 %v1382_v59, %v1386_v61  ;;  %v1031_v37 = vpop.f32.mrf.mxu3 }
 0x16b   : >> { %v860_v39 = vpop.f32.mrf.mxu0  ;;  %v1242_v7 = vld [vmem:[#allocation2 + $0xb8] ss:$2 sm:$0x1f]  ;;  %v1246_v8 = vld [vmem:[#allocation2 + $0xb9] ss:$2 sm:$0x1f] }
 0x16c   : >> { %1084 = vst.msk [vmem:[#allocation2 + $0xc8] sm:$0xff] %vm1058_vm2, %v860_v39  ;;  %v1248_v13 = vmax.f32 %v1242_v7, %v1246_v8  ;;  %v1911_v7 = vld [vmem:[%s5292_s3 + $0x50] sm:$0xff] }
 0x16d   : >> { %1141 = vst.msk [vmem:[#allocation2 + $0x290] sm:$0xff] %vm1058_vm2, %v1031_v37  ;;  %v1904_v37 = vld [vmem:[%s5292_s3 + $0x18] sm:$0xff] }
 0x171   : >> { %v968_v45 = vpop.f32.mrf.mxu2 }
 0x172   : >> { %1120 = vst.msk [vmem:[#allocation2 + $0x1e8] sm:$0xff] %vm1058_vm2, %v968_v45  ;;  %v1450_v45 = vmax.f32 %v1444_v32, %v1448_v33 }
 0x173   : >> { %v863_v49 = vpop.f32.mrf.mxu0 }
 0x174   : >> { %1085 = vst.msk [vmem:[#allocation2 + $0xd0] sm:$0xff] %vm1058_vm2, %v863_v49  ;;  %v1914_v49 = vld [vmem:[%s5292_s3 + $0x68] sm:$0xff] }
 0x175   : >> { %1919 = vmatpush.msrb.mxu1 %v1914_v49  ;;  %v1901_v49 = vld [vmem:[%s5292_s3] sm:$0xff] }
 0x177   : >> { %1920 = vmatpush.msrb.mxu1 %v1913_v53 }
 0x179   : >> { %v1390_v55 = vld [vmem:[#allocation2 + $0x1dc] ss:$2 sm:$0xff]  ;;  %v1396_v56 = vld [vmem:[#allocation2 + $0x1dd] ss:$2 sm:$0xff]  ;;  %v971_v57 = vpop.f32.mrf.mxu2 }
 0x17a   : >> { %v1393_v60 = vmax.f32 %v1387_v52, %v1390_v55  ;;  %1121 = vst.msk [vmem:[#allocation2 + $0x1f0] sm:$0xff] %vm1058_vm2, %v971_v57  ;;  %v1456_v55 = vmax.f32 %v1450_v45, %v1454_v50  ;;  %v1581_v57 = vld [vmem:[#allocation3 + $0x1e] sm:$0xff] }
 0x17b   : >> { %v1250_v62 = vld [vmem:[#allocation2 + $0xc4] ss:$2 sm:$0xff]  ;;  %v866_v63 = vpop.f32.mrf.mxu0  ;;  %v1256_v3 = vld [vmem:[#allocation2 + $0xc5] ss:$2 sm:$0xff] }
 0x17c   : >> { %v1399_v1 = vmax.f32 %v1393_v60, %v1396_v56  ;;  %v1253_v2 = vmax.f32 %v1247_v58, %v1250_v62  ;;  %1086 = vst.msk [vmem:[#allocation2 + $0xd8] sm:$0xff] %vm1058_vm2, %v866_v63  ;;  %v1034_v60 = vpop.f32.mrf.mxu3  ;;  %v1458_v8 = vadd.f32 %v3739_v20, %v1456_v55 }
 0x17d   : >> { %1142 = vst.msk [vmem:[#allocation2 + $0x298] sm:$0xff] %vm1058_vm2, %v1034_v60 }
 0x17e   : >> { %v1401_v5 = vadd.f32 %v3739_v20, %v1399_v1  ;;  %v1259_v6 = vmax.f32 %v1253_v2, %v1256_v3  ;;  %v1912_v1 = vld [vmem:[%s5292_s3 + $0x58] sm:$0xff]  ;;  %v1474_v2 = vld [vmem:[#allocation2 + $0x284] ss:$2 sm:$0xff]  ;;  %v1480_v3 = vld [vmem:[#allocation2 + $0x285] ss:$2 sm:$0xff] }
 0x17f   : >> { %1921 = vmatpush.msrb.mxu1 %v1912_v1  ;;  %v1547_v1 = vld [vmem:[#allocation3 + $0x41] sm:$0xff] }
 0x180   : >> { %v1403_v9 = vmax.f32 %v1401_v5, 0.0  ;;  %v1261_v10 = vadd.f32 %v3739_v20, %v1259_v6  ;;  %v1470_v5 = vld [vmem:[#allocation2 + $0x279] ss:$2 sm:$0x1f]  ;;  %v1477_v6 = vmax.f32 %v1471_v54, %v1474_v2 }
 0x181   : >> { %v1392_v11 = vld [vmem:[#allocation2 + $0x1ec] ss:$2 sm:$0x1f]  ;;  %v1398_v12 = vld [vmem:[#allocation2 + $0x1ed] ss:$2 sm:$0x1f]  ;;  %v974_v16 = vpop.f32.mrf.mxu2  ;;  %1922 = vmatpush.msrb.mxu1 %v1911_v7 }
 0x182   : >> { %1405 = vst.msk [vmem:[#allocation3 + $0x68] sm:$0xff] %vm1058_vm2, %v1403_v9  ;;  %v1263_v14 = vmax.f32 %v1261_v10, 0.0  ;;  %v1394_v15 = vmax.f32 %v1388_v4, %v1392_v11  ;;  %v1483_v9 = vmax.f32 %v1477_v6, %v1480_v3  ;;  %v1472_v10 = vmax.f32 %v1466_v0, %v1470_v5  ;;  %v1910_v11 = vld [vmem:[%s5292_s3 + $0x48] sm:$0xff]  ;;  %v1586_v3 = vld [vmem:[#allocation3 + $0x46] sm:$0xff] }
 0x183   : >> { %v1252_v17 = vld [vmem:[#allocation2 + $0xd4] ss:$2 sm:$0x1f]  ;;  %v869_v18 = vpop.f32.mrf.mxu0  ;;  %v1258_v23 = vld [vmem:[#allocation2 + $0xd5] ss:$2 sm:$0x1f]  ;;  %1923 = vmatpush.msrb.mxu1 %v1910_v11 }
 0x184   : >> { %1265 = vst.msk [vmem:[#allocation3 + $0x27] sm:$0xff] %vm1058_vm2, %v1263_v14  ;;  %v1400_v21 = vmax.f32 %v1394_v15, %v1398_v12  ;;  %v1254_v22 = vmax.f32 %v1248_v13, %v1252_v17  ;;  %v1485_v12 = vadd.f32 %v3739_v20, %v1483_v9  ;;  %v1909_v13 = vld [vmem:[%s5292_s3 + $0x40] sm:$0xff]  ;;  %v1037_v15 = vpop.f32.mrf.mxu3  ;;  %v1476_v17 = vld [vmem:[#allocation2 + $0x294] ss:$2 sm:$0x1f] }
 0x185   : >> { %1122 = vst.msk [vmem:[#allocation2 + $0x1f8] sm:$0xff] %vm1058_vm2, %v974_v16  ;;  %v1460_v16 = vmax.f32 %v1458_v8, 0.0  ;;  %1924 = vmatpush.msrb.mxu1 %v1909_v13  ;;  %v1548_v2 = vld [vmem:[#allocation3 + $0x49] sm:$0xff]  ;;  %v1588_v9 = vld [vmem:[#allocation3 + $0x56] sm:$0xff] }
 0x186   : >> { %v1402_v24 = vadd.f32 %v3739_v20, %v1400_v21  ;;  %v1260_v25 = vmax.f32 %v1254_v22, %v1258_v23  ;;  %1087 = vst.msk [vmem:[#allocation2 + $0xe0] sm:$0xff] %vm1058_vm2, %v869_v18  ;;  %v1908_v18 = vld [vmem:[%s5292_s3 + $0x38] sm:$0xff]  ;;  %v1487_v19 = vmax.f32 %v1485_v12, 0.0  ;;  %v1478_v21 = vmax.f32 %v1472_v10, %v1476_v17  ;;  %v1907_v23 = vld [vmem:[%s5292_s3 + $0x30] sm:$0xff]  ;;  %v1567_v12 = vld [vmem:[#allocation3 + $0x4d] sm:$0xff] }
 0x187   : >> { %v1482_v22 = vld [vmem:[#allocation2 + $0x295] ss:$2 sm:$0x1f]  ;;  %1143 = vst.msk [vmem:[#allocation2 + $0x2a0] sm:$0xff] %vm1058_vm2, %v1037_v15  ;;  %1925 = vmatpush.msrb.mxu1 %v1908_v18  ;;  %v3339_v7 = vpack.i.bf16 %v1548_v2, %v1547_v1  ;;  %v1568_v10 = vld [vmem:[#allocation3 + $0x55] sm:$0xff] }
 0x188   : >> { %v1262_v28 = vadd.f32 %v3739_v20, %v1260_v25  ;;  %v1404_v29 = vmax.f32 %v1402_v24, 0.0  ;;  %1462 = vst.msk [vmem:[#allocation3 + $0x8a] sm:$0x1f] %vm1181_vm3, %v1460_v16  ;;  %v1484_v24 = vmax.f32 %v1478_v21, %v1482_v22  ;;  %v1550_v13 = vld [vmem:[#allocation3 + $0x59] sm:$0xff]  ;;  %v1587_v16 = vld [vmem:[#allocation3 + $0x4e] sm:$0xff] }
 0x189   : >> { %1489 = vst.msk [vmem:[#allocation3 + $0x8f] sm:$0xff] %vm1058_vm2, %v1487_v19  ;;  %1926 = vmatpush.msrb.mxu1 %v1907_v23  ;;  %v3349_v18 = vpack.i.bf16 %v1588_v9, %v1587_v16  ;;  %v3344_v19 = vpack.i.bf16 %v1568_v10, %v1567_v12  ;;  %v1549_v21 = vld [vmem:[#allocation3 + $0x51] sm:$0xff] }
 0x18a   : >> { %v1264_v31 = vmax.f32 %v1262_v28, 0.0  ;;  %1406 = vst.msk [vmem:[#allocation3 + $0x70] sm:$0x1f] %vm1181_vm3, %v1404_v29  ;;  %v1486_v27 = vadd.f32 %v3739_v20, %v1484_v24  ;;  %v1906_v28 = vld [vmem:[%s5292_s3 + $0x28] sm:$0xff]  ;;  %v1905_v29 = vld [vmem:[%s5292_s3 + $0x20] sm:$0xff]  ;;  %v3354_v22 = vpack.i.bf16 %v1550_v13, %v1549_v21 }
 0x18b   : >> { %v872_v34 = vpop.f32.mrf.mxu0  ;;  %v1562_v36 = vld [vmem:[#allocation3 + $0x25] sm:$0xff]  ;;  %1927 = vmatpush.msrb.mxu1 %v1906_v28 }
 0x18c   : >> { %1266 = vst.msk [vmem:[#allocation3 + $0x2f] sm:$0x1f] %vm1181_vm3, %v1264_v31  ;;  %v1408_v38 = vld [vmem:[#allocation2 + $0x1f8] ss:$2 sm:$0xff]  ;;  %v1412_v39 = vld [vmem:[#allocation2 + $0x1f9] ss:$2 sm:$0xff]  ;;  %v3299_v40 = vpack.i.bf16 %v1562_v36, %v1561_v35  ;;  %v1040_v33 = vpop.f32.mrf.mxu3 }
 0x18d   : >> { %v1415_v41 = vmax.f32 %v1408_v38, %v1412_v39  ;;  %1088 = vst.msk [vmem:[#allocation2 + $0xe8] sm:$0xff] %vm1058_vm2, %v872_v34  ;;  %v1582_v52 = vld [vmem:[#allocation3 + $0x26] sm:$0xff]  ;;  %v1488_v36 = vmax.f32 %v1486_v27, 0.0  ;;  %v1280_v38 = vld [vmem:[#allocation2 + $0x10c] ss:$2 sm:$0x1f]  ;;  %1928 = vmatpush.msrb.mxu1 %v1905_v29 }
 0x18e   : >> { %3300 = vrot.lane.b32.xlu2 %v3299_v40, %s5281_s13  ;;  %v1543_v58 = vld [vmem:[#allocation3 + $0x21] sm:$0xff]  ;;  %v3304_v62 = vpack.i.bf16 %v1582_v52, %v1581_v57  ;;  %1144 = vst.msk [vmem:[#allocation2 + $0x2a8] sm:$0xff] %vm1058_vm2, %v1040_v33  ;;  %s5295_s13 = smov 64  }
 0x18f   : >> { %v1421_v46 = vmax.f32 %v1415_v41, %v1418_v30  ;;  %1490 = vst.msk [vmem:[#allocation3 + $0x97] sm:$0x1f] %vm1181_vm3, %v1488_v36  ;;  %1929 = vmatpush.msrb.mxu1 %v1904_v37  ;;  %v1519_v28 = vld [vmem:[#allocation3] sm:$0xff] }
 0x190   : >> { %v3281_v8 = vpop.permute.xlu0 %3280  ;;  %v1594_v1 = vld [vmem:[#allocation3 + $0x86] sm:$0xff]  ;;  %v1595_v13 = vld [vmem:[#allocation3 + $0x8e] sm:$0xff] }
 0x191   : >> { %v1427_v51 = vmax.f32 %v1421_v46, %v1424_v44  ;;  %1930 = vmatpush.msrb.mxu1 %v1903_v42  ;;  %v3282_v17 = vunpack.i.l.bf16 %v3281_v8  ;;  %v1520_v42 = vld [vmem:[#allocation3 + $0x8] sm:$0xff] }
 0x192   : >> { %v1574_v2 = vld [vmem:[#allocation3 + $0x85] sm:$0xff] }
 0x193   : >> { %v875_v56 = vpop.f32.mrf.mxu0  ;;  %v1544_v59 = vld [vmem:[#allocation3 + $0x29] sm:$0xff]  ;;  %v1429_v61 = vadd.f32 %v3739_v20, %v1427_v51  ;;  %1931 = vmatpush.msrb.mxu1 %v1902_v47  ;;  %v1839_v29 = vsel %vm1058_vm2, %v1519_v28, %v3282_v17 }
 0x194   : >> { %1089 = vst.msk [vmem:[#allocation2 + $0xf0] sm:$0xff] %vm1058_vm2, %v875_v56  ;;  %v3309_v63 = vpack.i.bf16 %v1544_v59, %v1543_v58  ;;  %v1268_v25 = vld [vmem:[#allocation2 + $0xe0] ss:$2 sm:$0xff]  ;;  %v1272_v26 = vld [vmem:[#allocation2 + $0xe1] ss:$2 sm:$0xff]  ;;  %v1043_v51 = vpop.f32.mrf.mxu3 }
 0x195   : >> { %v1431_v4 = vmax.f32 %v1429_v61, 0.0  ;;  %v1275_v30 = vmax.f32 %v1268_v25, %v1272_v26  ;;  %1145 = vst.msk [vmem:[#allocation2 + $0x2b0] sm:$0xff] %vm1058_vm2, %v1043_v51  ;;  %1932 = vmatpush.msrb.mxu1 %v1901_v49  ;;  %v1496_v15 = vld [vmem:[#allocation2 + $0x2a1] ss:$2 sm:$0xff] }
 0x196   : >> { %3305 = vrot.lane.b32.xlu2 %v3304_v62, %s5293_s29  ;;  %3310 = vrot.lane.b32.xlu0 %v3309_v63, %s5294_s15 }
 0x197   : >> { %1433 = vst.msk [vmem:[#allocation3 + $0x75] sm:$0xff] %vm1058_vm2, %v1431_v4  ;;  %v1566_v4 = vld [vmem:[#allocation3 + $0x45] sm:$0xff] }
 0x19b   : >> { %v878_v14 = vpop.f32.mrf.mxu0 }
 0x19c   : >> { %1090 = vst.msk [vmem:[#allocation2 + $0xf8] sm:$0xff] %vm1058_vm2, %v878_v14  ;;  %v1046_v53 = vpop.f32.mrf.mxu3  ;;  %v1492_v14 = vld [vmem:[#allocation2 + $0x2a0] ss:$2 sm:$0xff] }
 0x19d   : >> { %1146 = vst.msk [vmem:[#allocation2 + $0x2b8] sm:$0xff] %vm1058_vm2, %v1046_v53  ;;  %v1499_v23 = vmax.f32 %v1492_v14, %v1496_v15  ;;  %v1575_v14 = vld [vmem:[#allocation3 + $0x8d] sm:$0xff]  ;;  %v1522_v15 = vld [vmem:[#allocation3 + $0x18] sm:$0xff] }
 0x1a3   : >> { %v1270_v31 = vld [vmem:[#allocation2 + $0xf0] ss:$2 sm:$0x1f]  ;;  %v1274_v32 = vld [vmem:[#allocation2 + $0xf1] ss:$2 sm:$0x1f] }
 0x1a4   : >> { %v1276_v34 = vmax.f32 %v1270_v31, %v1274_v32  ;;  %v1278_v35 = vld [vmem:[#allocation2 + $0xfc] ss:$2 sm:$0xff]  ;;  %v1284_v41 = vld [vmem:[#allocation2 + $0xfd] ss:$2 sm:$0xff]  ;;  %v1049_v0 = vpop.f32.mrf.mxu3 }
 0x1a5   : >> { %v1281_v39 = vmax.f32 %v1275_v30, %v1278_v35  ;;  %1147 = vst.msk [vmem:[#allocation2 + $0x2c0] sm:$0xff] %vm1058_vm2, %v1049_v0  ;;  %v1570_v31 = vld [vmem:[#allocation3 + $0x65] sm:$0xff] }
 0x1a6   : >> { %v1282_v40 = vmax.f32 %v1276_v34, %v1280_v38  ;;  %v3283_v34 = vunpack.i.h.bf16 %v3281_v8  ;;  %v1569_v38 = vld [vmem:[#allocation3 + $0x5d] sm:$0xff] }
 0x1a7   : >> { %v1287_v44 = vmax.f32 %v1281_v39, %v1284_v41  ;;  %v3359_v39 = vpack.i.bf16 %v1570_v31, %v1569_v38  ;;  %v1589_v41 = vld [vmem:[#allocation3 + $0x5e] sm:$0xff] }
 0x1a8   : >> { %v1288_v45 = vmax.f32 %v1282_v40, %v1286_v43 }
 0x1a9   : >> { %v1289_v46 = vadd.f32 %v3739_v20, %v1287_v44  ;;  %v1590_v44 = vld [vmem:[#allocation3 + $0x66] sm:$0xff] }
 0x1aa   : >> { %v1290_v48 = vadd.f32 %v3739_v20, %v1288_v45  ;;  %v1840_v45 = vsel %vm1058_vm2, %v1520_v42, %v3283_v34  ;;  %v1524_v34 = vld [vmem:[#allocation3 + $0x28] sm:$0xff] }
 0x1ab   : >> { %v1291_v50 = vmax.f32 %v1289_v46, 0.0  ;;  %v3997_v46 = vld [vmem:[%s5291_s2] ss:$0 sm:$0xff] }
 0x1ac   : >> { %v1292_v52 = vmax.f32 %v1290_v48, 0.0  ;;  %v1052_v11 = vpop.f32.mrf.mxu3 }
 0x1ad   : >> { %1293 = vst.msk [vmem:[#allocation3 + $0x34] sm:$0xff] %vm1058_vm2, %v1291_v50  ;;  %v1552_v50 = vld [vmem:[#allocation3 + $0x69] sm:$0xff] }
 0x1ae   : >> { %1294 = vst.msk [vmem:[#allocation3 + $0x3c] sm:$0x1f] %vm1181_vm3, %v1292_v52  ;;  %v1551_v52 = vld [vmem:[#allocation3 + $0x61] sm:$0xff] }
 0x1af   : >> { %1148 = vst.msk [vmem:[#allocation2 + $0x2c8] sm:$0xff] %vm1058_vm2, %v1052_v11  ;;  %v3364_v53 = vpack.i.bf16 %v1552_v50, %v1551_v52 }
 0x1b4   : >> { %v1583_v54 = vld [vmem:[#allocation3 + $0x2e] sm:$0xff] }
 0x1b5   : >> { %v1563_v55 = vld [vmem:[#allocation3 + $0x2d] sm:$0xff]  ;;  %v1584_v20 = vld [vmem:[#allocation3 + $0x36] sm:$0xff]  ;;  %v1585_v62 = vld [vmem:[#allocation3 + $0x3e] sm:$0xff] }
 0x1b6   : >> { %v1545_v56 = vld [vmem:[#allocation3 + $0x31] sm:$0xff]  ;;  %v1546_v58 = vld [vmem:[#allocation3 + $0x39] sm:$0xff]  ;;  %v3319_v59 = vpack.i.bf16 %v1584_v20, %v1583_v54  ;;  %v3334_v5 = vpack.i.bf16 %v1586_v3, %v1585_v62 }
 0x1b7   : >> { %v1564_v57 = vld [vmem:[#allocation3 + $0x35] sm:$0xff]  ;;  %v3324_v61 = vpack.i.bf16 %v1546_v58, %v1545_v56  ;;  %v1565_v63 = vld [vmem:[#allocation3 + $0x3d] sm:$0xff]  ;;  %v1508_v33 = vld [vmem:[#allocation2 + $0x2bd] ss:$2 sm:$0xff] }
 0x1b8   : >> { %v3314_v60 = vpack.i.bf16 %v1564_v57, %v1563_v55  ;;  %3320 = vrot.lane.b32.xlu2 %v3319_v59, %s5293_s29  ;;  %v3329_v6 = vpack.i.bf16 %v1566_v4, %v1565_v63  ;;  %v1502_v32 = vld [vmem:[#allocation2 + $0x2bc] ss:$2 sm:$0xff]  ;;  %v1592_v56 = vld [vmem:[#allocation3 + $0x76] sm:$0xff] }
 0x1b9   : >> { %3325 = vrot.lane.b32.xlu0 %v3324_v61, %s5294_s15  ;;  %v1505_v36 = vmax.f32 %v1499_v23, %v1502_v32  ;;  %v1571_v54 = vld [vmem:[#allocation3 + $0x6d] sm:$0xff]  ;;  %v1572_v20 = vld [vmem:[#allocation3 + $0x75] sm:$0xff]  ;;  %v1593_v58 = vld [vmem:[#allocation3 + $0x7e] sm:$0xff] }
 0x1ba   : >> { %3315 = vrot.lane.b32.xlu1 %v3314_v60, %s5295_s13  ;;  %v1591_v55 = vld [vmem:[#allocation3 + $0x6e] sm:$0xff]  ;;  %v1573_v59 = vld [vmem:[#allocation3 + $0x7d] sm:$0xff] }
 0x1bb   : >> { %v1511_v40 = vmax.f32 %v1505_v36, %v1508_v33  ;;  %v1553_v57 = vld [vmem:[#allocation3 + $0x71] sm:$0xff]  ;;  %v1554_v61 = vld [vmem:[#allocation3 + $0x79] sm:$0xff]  ;;  %v1555_v4 = vld [vmem:[#allocation3 + $0x81] sm:$0xff] }
 0x1bc   : >> { %v1526_v52 = vld [vmem:[#allocation3 + $0x38] sm:$0xff] }
 0x1bd   : >> { %v1513_v47 = vadd.f32 %v3997_v46, %v1511_v40 }
 0x1bf   : >> { %v1515_v49 = vmax.f32 %v1513_v47, 0.0 }
 0x1c0   : >> { %3335 = vrot.lane.b32.xlu2 %v3334_v5, %s5293_s29  ;;  %v1521_v5 = vld [vmem:[#allocation3 + $0x10] sm:$0xff] }
 0x1c1   : >> { %3340 = vrot.lane.b32.xlu0 %v3339_v7, %s5294_s15  ;;  %1517 = vst.msk [vmem:[#allocation3 + $0x9c] sm:$0xff] %vm1058_vm2, %v1515_v49 }
 0x1c2   : >> { %3330 = vrot.lane.b32.xlu1 %v3329_v6, %s5295_s13 }
 0x1c8   : >> { %v3291_v24 = vpop.permute.xlu1 %3290  ;;  %3350 = vrot.lane.b32.xlu2 %v3349_v18, %s5293_s29 }
 0x1c9   : >> { %v3286_v25 = vpop.permute.xlu0 %3285  ;;  %v3292_v26 = vunpack.i.l.bf16 %v3291_v24  ;;  %3355 = vrot.lane.b32.xlu0 %v3354_v22, %s5294_s15  ;;  %v3293_v43 = vunpack.i.h.bf16 %v3291_v24  ;;  %v488_v22 = vld [vmem:[%s3599_s14 + $0x2d0] sm:$0x3f] }
 0x1ca   : >> { %3345 = vrot.lane.b32.xlu1 %v3344_v19, %s5295_s13  ;;  %v3287_v27 = vunpack.i.l.bf16 %v3286_v25  ;;  %v3288_v37 = vunpack.i.h.bf16 %v3286_v25  ;;  %v1556_v19 = vld [vmem:[#allocation3 + $0x89] sm:$0xff]  ;;  %3215 = vmatmul.msk.f32.gmra.mxu3 %vm490_vm1, %v488_v22 }
 0x1cc   : >> { %v1860_v30 = vsel %vm1859_vm4, %v1839_v29, %v3287_v27  ;;  %v1861_v48 = vsel %vm1859_vm4, %v1840_v45, %v3288_v37  ;;  %v1523_v27 = vld [vmem:[#allocation3 + $0x20] sm:$0xff] }
 0x1cd   : >> { %v1881_v35 = vsel %vm1880_vm5, %v1860_v30, %v3292_v26  ;;  %v1882_v51 = vsel %vm1880_vm5, %v1861_v48, %v3293_v43 }
 0x1ce   : >> { %1933 = vmatmul.f32.vlgmr.msrb.gmra.mxu1 %v1881_v35 }
 0x1d0   : >> { %1799 = vrot.lane.b32.xlu2 %v1589_v41, %s5293_s29  ;;  %v3296_v62 = vpop.permute.xlu1 %3295 }
 0x1d1   : >> { %1801 = vrot.lane.b32.xlu0 %v1590_v44, %s5293_s29  ;;  %v3297_v63 = vunpack.i.l.bf16 %v3296_v62  ;;  %v3298_v10 = vunpack.i.h.bf16 %v3296_v62  ;;  %v1525_v44 = vld [vmem:[#allocation3 + $0x30] sm:$0xff] }
 0x1d2   : >> { %3360 = vrot.lane.b32.xlu1 %v3359_v39, %s5295_s13 }
 0x1d3   : >> { %v1841_v7 = vsel %vm1058_vm2, %v1521_v5, %v3297_v63  ;;  %v1842_v16 = vsel %vm1058_vm2, %v1522_v15, %v3298_v10  ;;  %v1528_v5 = vld [vmem:[#allocation3 + $0x48] sm:$0xff]  ;;  %v1529_v15 = vld [vmem:[#allocation3 + $0x50] sm:$0xff] }
 0x1d6   : >> { %1936 = vmatmul.f32.gmra.mxu1 %v1882_v51 }
 0x1d8   : >> { %1723 = vrot.lane.b32.xlu2 %v1571_v54, %s5295_s13 }
 0x1d9   : >> { %1803 = vrot.lane.b32.xlu0 %v1591_v55, %s5293_s29 }
 0x1da   : >> { %3365 = vrot.lane.b32.xlu1 %v3364_v53, %s5294_s15 }
 0x1e0   : >> { %1805 = vrot.lane.b32.xlu2 %v1592_v56, %s5293_s29 }
 0x1e1   : >> { %1647 = vrot.lane.b32.xlu0 %v1553_v57, %s5294_s15 }
 0x1e2   : >> { %1725 = vrot.lane.b32.xlu1 %v1572_v20, %s5295_s13 }
 0x1e8   : >> { %v3301_v60 = vpop.permute.xlu2 %3300  ;;  %1807 = vrot.lane.b32.xlu2 %v1593_v58, %s5293_s29 }
 0x1e9   : >> { %1649 = vrot.lane.b32.xlu0 %v1554_v61, %s5294_s15  ;;  %v3302_v0 = vunpack.i.l.bf16 %v3301_v60  ;;  %v3303_v11 = vunpack.i.h.bf16 %v3301_v60  ;;  %v1527_v61 = vld [vmem:[#allocation3 + $0x40] sm:$0xff] }
 0x1ea   : >> { %1727 = vrot.lane.b32.xlu1 %v1573_v59, %s5295_s13 }
 0x1eb   : >> { %v1862_v8 = vsel %vm1859_vm4, %v1841_v7, %v3302_v0  ;;  %v1863_v17 = vsel %vm1859_vm4, %v1842_v16, %v3303_v11 }
 0x1f0   : >> { %v3306_v3 = vpop.permute.xlu2 %3305  ;;  %1809 = vrot.lane.b32.xlu2 %v1594_v1, %s5293_s29 }
 0x1f1   : >> { %v3307_v6 = vunpack.i.l.bf16 %v3306_v3  ;;  %1651 = vrot.lane.b32.xlu0 %v1555_v4, %s5294_s15  ;;  %v3308_v12 = vunpack.i.h.bf16 %v3306_v3 }
 0x1f2   : >> { %1729 = vrot.lane.b32.xlu1 %v1574_v2, %s5295_s13 }
 0x1f3   : >> { %v1883_v9 = vsel %vm1880_vm5, %v1862_v8, %v3307_v6  ;;  %v1884_v18 = vsel %vm1880_vm5, %v1863_v17, %v3308_v12 }
 0x1f4   : >> { %1939 = vmatmul.f32.gmra.mxu1 %v1883_v9 }
 0x1f8   : >> { %1811 = vrot.lane.b32.xlu2 %v1595_v13, %s5293_s29 }
 0x1fa   : >> { %1731 = vrot.lane.b32.xlu1 %v1575_v14, %s5295_s13 }
 0x1fc   : >> { %1942 = vmatmul.f32.gmra.mxu1 %v1884_v18 }
 0x200   : >> { %1653 = vrot.lane.b32.xlu2 %v1556_v19, %s5294_s15 }
 0x208   : >> { %v3311_v21 = vpop.permute.xlu0 %3310 }
 0x209   : >> { %v3312_v23 = vunpack.i.l.bf16 %v3311_v21  ;;  %v3313_v31 = vunpack.i.h.bf16 %v3311_v21 }
 0x20b   : >> { %v1843_v29 = vsel %vm1058_vm2, %v1523_v27, %v3312_v23  ;;  %v1844_v35 = vsel %vm1058_vm2, %v1524_v34, %v3313_v31  ;;  %v1531_v31 = vld [vmem:[#allocation3 + $0x60] sm:$0xff] }
 0x212   : >> { %v3321_v24 = vpop.permute.xlu2 %3320 }
 0x213   : >> { %v3322_v28 = vunpack.i.l.bf16 %v3321_v24  ;;  %v3323_v38 = vunpack.i.h.bf16 %v3321_v24 }
 0x21a   : >> { %v3336_v43 = vpop.permute.xlu2 %3335 }
 0x21b   : >> { %v3337_v48 = vunpack.i.l.bf16 %v3336_v43  ;;  %v3338_v56 = vunpack.i.h.bf16 %v3336_v43 }
 0x222   : >> { %v3351_v60 = vpop.permute.xlu2 %3350 }
 0x223   : >> { %v3352_v1 = vunpack.i.l.bf16 %v3351_v60  ;;  %v3353_v10 = vunpack.i.h.bf16 %v3351_v60 }
 0x22a   : >> { %v1800_v17 = vpop.permute.xlu2 %1799 }
 0x22b   : >> { %v3326_v36 = vpop.permute.xlu0 %3325 }
 0x22c   : >> { %v3316_v25 = vpop.permute.xlu1 %3315  ;;  %v3327_v40 = vunpack.i.l.bf16 %v3326_v36  ;;  %v3328_v49 = vunpack.i.h.bf16 %v3326_v36 }
 0x22d   : >> { %v3317_v26 = vunpack.i.l.bf16 %v3316_v25  ;;  %v3318_v33 = vunpack.i.h.bf16 %v3316_v25  ;;  %v1530_v25 = vld [vmem:[#allocation3 + $0x58] sm:$0xff] }
 0x22e   : >> { %v1845_v45 = vsel %vm1058_vm2, %v1525_v44, %v3327_v40  ;;  %v1846_v53 = vsel %vm1058_vm2, %v1526_v52, %v3328_v49  ;;  %v2176_v40 = vld [vmem:[%s5269_s5 + $0xf8] sm:$0xff] }
 0x22f   : >> { %v1864_v30 = vsel %vm1859_vm4, %v1843_v29, %v3317_v26  ;;  %v1865_v37 = vsel %vm1859_vm4, %v1844_v35, %v3318_v33  ;;  %2203 = vmatpush.msrb.mxu3 %v2176_v40 }
 0x230   : >> { %v1885_v32 = vsel %vm1880_vm5, %v1864_v30, %v3322_v28  ;;  %v1886_v41 = vsel %vm1880_vm5, %v1865_v37, %v3323_v38 }
 0x231   : >> { %1945 = vmatmul.f32.gmra.mxu1 %v1885_v32 }
 0x232   : >> { %v1724_v29 = vpop.permute.xlu2 %1723 }
 0x233   : >> { %v3341_v54 = vpop.permute.xlu0 %3340 }
 0x234   : >> { %v3331_v39 = vpop.permute.xlu1 %3330  ;;  %v3342_v57 = vunpack.i.l.bf16 %v3341_v54  ;;  %v3343_v2 = vunpack.i.h.bf16 %v3341_v54 }
 0x235   : >> { %v3332_v42 = vunpack.i.l.bf16 %v3331_v39  ;;  %v3333_v51 = vunpack.i.h.bf16 %v3331_v39  ;;  %v2160_v39 = vld [vmem:[%s5269_s5 + $0x78] sm:$0xff] }
 0x236   : >> { %v1847_v63 = vsel %vm1058_vm2, %v1527_v61, %v3342_v57  ;;  %v1848_v7 = vsel %vm1058_vm2, %v1528_v5, %v3343_v2  ;;  %2177 = vmatpush.msrb.mxu2 %v2160_v39  ;;  %v2155_v39 = vld [vmem:[%s5269_s5 + $0x50] sm:$0xff] }
 0x237   : >> { %v1866_v47 = vsel %vm1859_vm4, %v1845_v45, %v3332_v42  ;;  %v1867_v55 = vsel %vm1859_vm4, %v1846_v53, %v3333_v51  ;;  %v1532_v42 = vld [vmem:[#allocation3 + $0x68] sm:$0xff]  ;;  %v1533_v51 = vld [vmem:[#allocation3 + $0x70] sm:$0xff] }
 0x238   : >> { %v1887_v50 = vsel %vm1880_vm5, %v1866_v47, %v3337_v48  ;;  %v1888_v58 = vsel %vm1880_vm5, %v1867_v55, %v3338_v56 }
 0x239   : >> { %1948 = vmatmul.f32.gmra.mxu1 %v1886_v41  ;;  %v2159_v41 = vld [vmem:[%s5269_s5 + $0x70] sm:$0xff] }
 0x23a   : >> { %v1806_v38 = vpop.permute.xlu2 %1805  ;;  %2178 = vmatpush.msrb.mxu2 %v2159_v41 }
 0x23b   : >> { %v3356_v8 = vpop.permute.xlu0 %3355 }
 0x23c   : >> { %v3346_v20 = vpop.permute.xlu1 %3345  ;;  %v3357_v12 = vunpack.i.l.bf16 %v3356_v8  ;;  %v3358_v19 = vunpack.i.h.bf16 %v3356_v8 }
 0x23d   : >> { %v3347_v59 = vunpack.i.l.bf16 %v3346_v20  ;;  %v3348_v4 = vunpack.i.h.bf16 %v3346_v20 }
 0x23e   : >> { %v1849_v16 = vsel %vm1058_vm2, %v1529_v15, %v3357_v12  ;;  %v1850_v26 = vsel %vm1058_vm2, %v1530_v25, %v3358_v19  ;;  %v2175_v15 = vld [vmem:[%s5269_s5 + $0xf0] sm:$0xff] }
 0x23f   : >> { %v1868_v0 = vsel %vm1859_vm4, %v1847_v63, %v3347_v59  ;;  %v1869_v9 = vsel %vm1859_vm4, %v1848_v7, %v3348_v4  ;;  %v1534_v63 = vld [vmem:[#allocation3 + $0x78] sm:$0xff]  ;;  %2204 = vmatpush.msrb.mxu3 %v2175_v15 }
 0x240   : >> { %v1889_v3 = vsel %vm1880_vm5, %v1868_v0, %v3352_v1  ;;  %v1890_v13 = vsel %vm1880_vm5, %v1869_v9, %v3353_v10  ;;  %v1535_v10 = vld [vmem:[#allocation3 + $0x80] sm:$0xff] }
 0x241   : >> { %1951 = vmatmul.f32.gmra.mxu1 %v1887_v50  ;;  %v1498_v25 = vld [vmem:[#allocation2 + $0x2b1] ss:$2 sm:$0x1f] }
 0x242   : >> { %v1808_v50 = vpop.permute.xlu2 %1807 }
 0x243   : >> { %v1802_v23 = vpop.permute.xlu0 %1801 }
 0x244   : >> { %v3361_v11 = vpop.permute.xlu1 %3360 }
 0x245   : >> { %v3362_v14 = vunpack.i.l.bf16 %v3361_v11  ;;  %v3363_v22 = vunpack.i.h.bf16 %v3361_v11 }
 0x247   : >> { %v1870_v18 = vsel %vm1859_vm4, %v1849_v16, %v3362_v14  ;;  %v1871_v27 = vsel %vm1859_vm4, %v1850_v26, %v3363_v22  ;;  %v2158_v16 = vld [vmem:[%s5269_s5 + $0x68] sm:$0xff] }
 0x248   : >> { %v1891_v21 = vsel %vm1880_vm5, %v1870_v18, %v1800_v17  ;;  %v1892_v30 = vsel %vm1880_vm5, %v1871_v27, %v1802_v23  ;;  %v2174_v17 = vld [vmem:[%s5269_s5 + $0xe8] sm:$0xff]  ;;  %2179 = vmatpush.msrb.mxu2 %v2158_v16  ;;  %v2157_v18 = vld [vmem:[%s5269_s5 + $0x60] sm:$0xff]  ;;  %v2156_v23 = vld [vmem:[%s5269_s5 + $0x58] sm:$0xff] }
 0x249   : >> { %1954 = vmatmul.f32.gmra.mxu1 %v1888_v58  ;;  %2205 = vmatpush.msrb.mxu3 %v2174_v17  ;;  %v2168_v16 = vld [vmem:[%s5269_s5 + $0xb8] sm:$0xff]  ;;  %v2151_v17 = vld [vmem:[%s5269_s5 + $0x30] sm:$0xff] }
 0x24a   : >> { %2180 = vmatpush.msrb.mxu2 %v2157_v18  ;;  %v2167_v18 = vld [vmem:[%s5269_s5 + $0xb0] sm:$0xff] }
 0x24b   : >> { %v1934_v62 = vpop.f32.mrf.mxu1  ;;  %v1804_v33 = vpop.permute.xlu0 %1803 }
 0x24c   : >> { %1994 = vst.msk [vmem:[#allocation4] sm:$0xff] %vm1859_vm4, %v1934_v62  ;;  %v3366_v24 = vpop.permute.xlu1 %3365  ;;  %v4076_v62 = vld [vmem:[%s5268_s4] ss:$0 sm:$0xff]  ;;  %2181 = vmatpush.msrb.mxu2 %v2156_v23 }
 0x24d   : >> { %v3367_v28 = vunpack.i.l.bf16 %v3366_v24  ;;  %v3368_v36 = vunpack.i.h.bf16 %v3366_v24  ;;  %v1055_v22 = vpop.f32.mrf.mxu3  ;;  %v1494_v24 = vld [vmem:[#allocation2 + $0x2b0] ss:$2 sm:$0x1f] }
 0x24e   : >> { %1150 = vst.msk [vmem:[#allocation2 + $0x2d0] sm:$0x3f] %vm1149_vm7, %v1055_v22  ;;  %v1500_v26 = vmax.f32 %v1494_v24, %v1498_v25  ;;  %2182 = vmatpush.msrb.mxu2 %v2155_v39  ;;  %v1576_v22 = vld [vmem:[#allocation3 + $0x95] sm:$0xff] }
 0x24f   : >> { %v1851_v32 = vsel %vm1058_vm2, %v1531_v31, %v3367_v28  ;;  %v1852_v44 = vsel %vm1058_vm2, %v1532_v42, %v3368_v36  ;;  %v2147_v39 = vld [vmem:[%s5269_s5 + $0x10] sm:$0xff] }
 0x250   : >> { %v1872_v35 = vsel %vm1859_vm4, %v1851_v32, %v1724_v29 }
 0x251   : >> { %1957 = vmatmul.f32.gmra.mxu1 %v1889_v3  ;;  %v1893_v37 = vsel %vm1880_vm5, %v1872_v35, %v1804_v33  ;;  %v1810_v3 = vpop.permute.xlu2 %1809 }
 0x253   : >> { %v1937_v6 = vpop.f32.mrf.mxu1  ;;  %v1648_v47 = vpop.permute.xlu0 %1647 }
 0x254   : >> { %1995 = vst.msk [vmem:[#allocation4 + $0x8] sm:$0xff] %vm1859_vm4, %v1937_v6  ;;  %v1726_v34 = vpop.permute.xlu1 %1725  ;;  %v1853_v53 = vsel %vm1058_vm2, %v1533_v51, %v1648_v47 }
 0x255   : >> { %v1873_v45 = vsel %vm1859_vm4, %v1852_v44, %v1726_v34  ;;  %v1504_v28 = vld [vmem:[#allocation2 + $0x2cc] ss:$2 sm:$0x1f] }
 0x256   : >> { %v1894_v49 = vsel %vm1880_vm5, %v1873_v45, %v1806_v38  ;;  %v1506_v29 = vmax.f32 %v1500_v26, %v1504_v28  ;;  %v2172_v38 = vld [vmem:[%s5269_s5 + $0xd8] sm:$0xff] }
 0x259   : >> { %1960 = vmatmul.f32.gmra.mxu1 %v1890_v13  ;;  %v1812_v13 = vpop.permute.xlu2 %1811 }
 0x25b   : >> { %v2016_v54 = vld [vmem:[#allocation4] ss:$2 sm:$0x3f]  ;;  %v2018_v55 = vld [vmem:[#allocation4 + $0x1] ss:$2 sm:$0x3f]  ;;  %v1650_v20 = vpop.permute.xlu0 %1649 }
 0x25c   : >> { %v1728_v48 = vpop.permute.xlu1 %1727  ;;  %v2019_v58 = vmax.f32 %v2016_v54, %v2018_v55  ;;  %v1854_v1 = vsel %vm1058_vm2, %v1534_v63, %v1650_v20  ;;  %v2170_v20 = vld [vmem:[%s5269_s5 + $0xc8] sm:$0xff] }
 0x25d   : >> { %v1874_v56 = vsel %vm1859_vm4, %v1853_v53, %v1728_v48  ;;  %v2171_v48 = vld [vmem:[%s5269_s5 + $0xd0] sm:$0xff]  ;;  %v2154_v53 = vld [vmem:[%s5269_s5 + $0x48] sm:$0xff] }
 0x25e   : >> { %v1895_v60 = vsel %vm1880_vm5, %v1874_v56, %v1808_v50  ;;  %2183 = vmatpush.msrb.mxu2 %v2154_v53 }
 0x261   : >> { %1963 = vmatmul.f32.gmra.mxu1 %v1891_v21  ;;  %v2173_v21 = vld [vmem:[%s5269_s5 + $0xe0] sm:$0xff] }
 0x262   : >> { %2206 = vmatpush.msrb.mxu3 %v2173_v21  ;;  %v2150_v21 = vld [vmem:[%s5269_s5 + $0x28] sm:$0xff] }
 0x263   : >> { %v1652_v8 = vpop.permute.xlu0 %1651 }
 0x264   : >> { %v1730_v59 = vpop.permute.xlu1 %1729  ;;  %v1855_v11 = vsel %vm1058_vm2, %v1535_v10, %v1652_v8  ;;  %2207 = vmatpush.msrb.mxu3 %v2172_v38  ;;  %v2164_v38 = vld [vmem:[%s5269_s5 + $0x98] sm:$0xff] }
 0x265   : >> { %v1875_v4 = vsel %vm1859_vm4, %v1854_v1, %v1730_v59 }
 0x266   : >> { %v1896_v7 = vsel %vm1880_vm5, %v1875_v4, %v1810_v3  ;;  %2208 = vmatpush.msrb.mxu3 %v2171_v48 }
 0x268   : >> { %2209 = vmatpush.msrb.mxu3 %v2170_v20  ;;  %v2161_v20 = vld [vmem:[%s5269_s5 + $0x80] sm:$0xff] }
 0x269   : >> { %1966 = vmatmul.f32.gmra.mxu1 %v1892_v30  ;;  %v1510_v30 = vld [vmem:[#allocation2 + $0x2cd] ss:$2 sm:$0x1f] }
 0x26a   : >> { %v1512_v31 = vmax.f32 %v1506_v29, %v1510_v30  ;;  %v2166_v29 = vld [vmem:[%s5269_s5 + $0xa8] sm:$0xff] }
 0x26c   : >> { %v1732_v9 = vpop.permute.xlu1 %1731  ;;  %v1514_v32 = vadd.f32 %v3997_v46, %v1512_v31  ;;  %v1596_v31 = vld [vmem:[#allocation3 + $0x96] sm:$0xff] }
 0x26d   : >> { %v1876_v12 = vsel %vm1859_vm4, %v1855_v11, %v1732_v9 }
 0x26e   : >> { %v1897_v14 = vsel %vm1880_vm5, %v1876_v12, %v1812_v13  ;;  %v1516_v34 = vmax.f32 %v1514_v32, 0.0  ;;  %v1557_v32 = vld [vmem:[#allocation3 + $0x91] sm:$0xff] }
 0x270   : >> { %1518 = vst.msk [vmem:[#allocation3 + $0xa4] sm:$0x1f] %vm1181_vm3, %v1516_v34  ;;  %v2149_v34 = vld [vmem:[%s5269_s5 + $0x20] sm:$0xff] }
 0x271   : >> { %1969 = vmatmul.f32.gmra.mxu1 %v1893_v37  ;;  %v1940_v43 = vpop.f32.mrf.mxu1 }
 0x272   : >> { %1996 = vst.msk [vmem:[#allocation4 + $0x10] sm:$0xff] %vm1859_vm4, %v1940_v43 }
 0x277   : >> { %v1597_v48 = vld [vmem:[#allocation3 + $0x9e] sm:$0xff] }
 0x278   : >> { %v1577_v53 = vld [vmem:[#allocation3 + $0x9d] sm:$0xff] }
 0x279   : >> { %1972 = vmatmul.f32.gmra.mxu1 %v1894_v49  ;;  %v1943_v52 = vpop.f32.mrf.mxu1  ;;  %v2021_v57 = vld [vmem:[#allocation4 + $0xd] ss:$2 sm:$0x3f] }
 0x27a   : >> { %1997 = vst.msk [vmem:[#allocation4 + $0x18] sm:$0xff] %vm1859_vm4, %v1943_v52  ;;  %v2022_v61 = vmax.f32 %v2019_v58, %v2021_v57  ;;  %v2153_v57 = vld [vmem:[%s5269_s5 + $0x40] sm:$0xff] }
 0x27b   : >> { %2184 = vmatpush.msrb.mxu2 %v2153_v57 }
 0x281   : >> { %1975 = vmatmul.f32.gmra.mxu1 %v1895_v60  ;;  %v2024_v0 = vld [vmem:[#allocation4 + $0xe] ss:$2 sm:$0x3f] }
 0x282   : >> { %v2025_v2 = vmax.f32 %v2022_v61, %v2024_v0  ;;  %v2169_v0 = vld [vmem:[%s5269_s5 + $0xc0] sm:$0xff] }
 0x283   : >> { %2210 = vmatpush.msrb.mxu3 %v2169_v0 }
 0x284   : >> { %v2029_v5 = vadd.f32 %v4076_v62, %v2025_v2 }
 0x285   : >> { %2211 = vmatpush.msrb.mxu3 %v2168_v16 }
 0x286   : >> { %v2030_v6 = vmax.f32 %v2029_v5, 0.0  ;;  %v2152_v5 = vld [vmem:[%s5269_s5 + $0x38] sm:$0xff] }
 0x287   : >> { %2185 = vmatpush.msrb.mxu2 %v2152_v5  ;;  %2212 = vmatpush.msrb.mxu3 %v2167_v18 }
 0x288   : >> { %2032 = vst.msk [vmem:[#allocation5] sm:$0x3f] %vm2031_vm6, %v2030_v6 }
 0x289   : >> { %1978 = vmatmul.f32.gmra.mxu1 %v1896_v7  ;;  %2186 = vmatpush.msrb.mxu2 %v2151_v17 }
 0x28a   : >> { %2213 = vmatpush.msrb.mxu3 %v2166_v29 }
 0x28b   : >> { %2187 = vmatpush.msrb.mxu2 %v2150_v21 }
 0x28d   : >> { %2188 = vmatpush.msrb.mxu2 %v2149_v34 }
 0x291   : >> { %1981 = vmatmul.f32.gmra.mxu1 %v1897_v14 }
 0x2ae   : >> { %v1946_v19 = vpop.f32.mrf.mxu1 }
 0x2af   : >> { %1998 = vst.msk [vmem:[#allocation4 + $0x20] sm:$0xff] %vm1859_vm4, %v1946_v19 }
 0x2b6   : >> { %v1949_v27 = vpop.f32.mrf.mxu1  ;;  %v2034_v35 = vld [vmem:[#allocation4 + $0x1a] ss:$2 sm:$0x3f]  ;;  %v2036_v36 = vld [vmem:[#allocation4 + $0x1b] ss:$2 sm:$0x3f] }
 0x2b7   : >> { %1999 = vst.msk [vmem:[#allocation4 + $0x28] sm:$0xff] %vm1859_vm4, %v1949_v27  ;;  %v2037_v37 = vmax.f32 %v2034_v35, %v2036_v36  ;;  %v2165_v35 = vld [vmem:[%s5269_s5 + $0xa0] sm:$0xff] }
 0x2b8   : >> { %2214 = vmatpush.msrb.mxu3 %v2165_v35 }
 0x2ba   : >> { %2215 = vmatpush.msrb.mxu3 %v2164_v38 }
 0x2be   : >> { %v1952_v33 = vpop.f32.mrf.mxu1 }
 0x2bf   : >> { %2000 = vst.msk [vmem:[#allocation4 + $0x30] sm:$0xff] %vm1859_vm4, %v1952_v33 }
 0x2c6   : >> { %v2039_v40 = vld [vmem:[#allocation4 + $0x27] ss:$2 sm:$0x3f]  ;;  %v1955_v41 = vpop.f32.mrf.mxu1  ;;  %v2042_v42 = vld [vmem:[#allocation4 + $0x28] ss:$2 sm:$0x3f] }
 0x2c7   : >> { %v2040_v46 = vmax.f32 %v2037_v37, %v2039_v40  ;;  %2001 = vst.msk [vmem:[#allocation4 + $0x38] sm:$0xff] %vm1859_vm4, %v1955_v41  ;;  %v2148_v37 = vld [vmem:[%s5269_s5 + $0x18] sm:$0xff]  ;;  %v2163_v40 = vld [vmem:[%s5269_s5 + $0x90] sm:$0xff] }
 0x2c8   : >> { %2189 = vmatpush.msrb.mxu2 %v2148_v37  ;;  %2216 = vmatpush.msrb.mxu3 %v2163_v40 }
 0x2c9   : >> { %v2043_v43 = vmax.f32 %v2040_v46, %v2042_v42  ;;  %v2146_v42 = vld [vmem:[%s5269_s5 + $0x8] sm:$0xff] }
 0x2ca   : >> { %2190 = vmatpush.msrb.mxu2 %v2147_v39 }
 0x2cb   : >> { %v2044_v44 = vadd.f32 %v4076_v62, %v2043_v43  ;;  %v2162_v43 = vld [vmem:[%s5269_s5 + $0x88] sm:$0xff] }
 0x2cc   : >> { %2191 = vmatpush.msrb.mxu2 %v2146_v42  ;;  %2217 = vmatpush.msrb.mxu3 %v2162_v43 }
 0x2cd   : >> { %v2045_v45 = vmax.f32 %v2044_v44, 0.0 }
 0x2ce   : >> { %v1958_v47 = vpop.f32.mrf.mxu1  ;;  %v2048_v50 = vld [vmem:[#allocation4 + $0x34] ss:$2 sm:$0x3f]  ;;  %v2050_v51 = vld [vmem:[#allocation4 + $0x35] ss:$2 sm:$0x3f]  ;;  %2218 = vmatpush.msrb.mxu3 %v2161_v20 }
 0x2cf   : >> { %2002 = vst.msk [vmem:[#allocation4 + $0x40] sm:$0xff] %vm1859_vm4, %v1958_v47  ;;  %v2051_v52 = vmax.f32 %v2048_v50, %v2050_v51 }
 0x2d0   : >> { %2046 = vst.msk [vmem:[#allocation5 + $0x6] sm:$0x3f] %vm2031_vm6, %v2045_v45 }
 0x2d6   : >> { %v1961_v49 = vpop.f32.mrf.mxu1 }
 0x2d7   : >> { %2003 = vst.msk [vmem:[#allocation4 + $0x48] sm:$0xff] %vm1859_vm4, %v1961_v49  ;;  %v2106_v2 = vld [vmem:[#allocation5 + $0x1] sm:$0xff]  ;;  %v1578_v49 = vld [vmem:[#allocation3 + $0xa5] sm:$0x7] }
 0x2de   : >> { %v2053_v54 = vld [vmem:[#allocation4 + $0x41] ss:$2 sm:$0x3f]  ;;  %v1964_v55 = vpop.f32.mrf.mxu1  ;;  %v2056_v58 = vld [vmem:[#allocation4 + $0x42] ss:$2 sm:$0x3f] }
 0x2df   : >> { %v2054_v56 = vmax.f32 %v2051_v52, %v2053_v54  ;;  %2004 = vst.msk [vmem:[#allocation4 + $0x50] sm:$0xff] %vm1859_vm4, %v1964_v55  ;;  %v1598_v52 = vld [vmem:[#allocation3 + $0xa6] sm:$0x7] }
 0x2e1   : >> { %v2057_v59 = vmax.f32 %v2054_v56, %v2056_v58  ;;  %v1558_v56 = vld [vmem:[#allocation3 + $0x99] sm:$0x7] }
 0x2e3   : >> { %v2058_v60 = vadd.f32 %v4076_v62, %v2057_v59 }
 0x2e5   : >> { %v2059_v61 = vmax.f32 %v2058_v60, 0.0  ;;  %v2103_v60 = vld [vmem:[#allocation5] sm:$0xff] }
 0x2e6   : >> { %v1967_v63 = vpop.f32.mrf.mxu1 }
 0x2e7   : >> { %2005 = vst.msk [vmem:[#allocation4 + $0x58] sm:$0xff] %vm1859_vm4, %v1967_v63 }
 0x2e8   : >> { %2060 = vst.msk [vmem:[#allocation5 + $0xc] sm:$0x3f] %vm2031_vm6, %v2059_v61 }
 0x2ee   : >> { %v1970_v1 = vpop.f32.mrf.mxu1  ;;  %v2062_v6 = vld [vmem:[#allocation4 + $0x4e] ss:$2 sm:$0x3f]  ;;  %v2064_v7 = vld [vmem:[#allocation4 + $0x4f] ss:$2 sm:$0x3f] }
 0x2ef   : >> { %2006 = vst.msk [vmem:[#allocation4 + $0x60] sm:$0xff] %vm1859_vm4, %v1970_v1  ;;  %v2112_v3 = vld [vmem:[#allocation5 + $0x7] sm:$0xff]  ;;  %v2065_v8 = vmax.f32 %v2062_v6, %v2064_v7  ;;  %v1654_v1 = vpop.permute.xlu2 %1653 }
 0x2f0   : >> { %v3369_v4 = vpack.i.bf16 %v2112_v3, %v2106_v2  ;;  %v2107_v24 = vld [vmem:[#allocation5 + $0x9] sm:$0xff] }
 0x2f1   : >> { %v2109_v61 = vld [vmem:[#allocation5 + $0x6] sm:$0xff] }
 0x2f2   : >> { %3370 = vrot.lane.b32.xlu0 %v3369_v4, %s5295_s13  ;;  %v2104_v6 = vld [vmem:[#allocation5 + $0x8] sm:$0xff] }
 0x2f6   : >> { %v2067_v9 = vld [vmem:[#allocation4 + $0x5b] ss:$2 sm:$0x3f]  ;;  %v1973_v10 = vpop.f32.mrf.mxu1  ;;  %v2070_v12 = vld [vmem:[#allocation4 + $0x5c] ss:$2 sm:$0x3f] }
 0x2f7   : >> { %v2068_v11 = vmax.f32 %v2065_v8, %v2067_v9  ;;  %2007 = vst.msk [vmem:[#allocation4 + $0x68] sm:$0xff] %vm1859_vm4, %v1973_v10 }
 0x2f9   : >> { %v2071_v13 = vmax.f32 %v2068_v11, %v2070_v12  ;;  %v1536_v11 = vld [vmem:[#allocation3 + $0x88] sm:$0xff] }
 0x2fb   : >> { %v2072_v14 = vadd.f32 %v4076_v62, %v2071_v13  ;;  %v1856_v13 = vsel %vm1058_vm2, %v1536_v11, %v1654_v1 }
 0x2fd   : >> { %v2073_v15 = vmax.f32 %v2072_v14, 0.0 }
 0x2fe   : >> { %v1976_v19 = vpop.f32.mrf.mxu1 }
 0x2ff   : >> { %2074 = vst.msk [vmem:[#allocation5 + $0x12] sm:$0x3f] %vm2031_vm6, %v2073_v15 }
 0x300   : >> { %2008 = vst.msk [vmem:[#allocation4 + $0x70] sm:$0xff] %vm1859_vm4, %v1976_v19 }
 0x306   : >> { %v1979_v23 = vpop.f32.mrf.mxu1  ;;  %v2113_v25 = vld [vmem:[#allocation5 + $0xf] sm:$0xff] }
 0x307   : >> { %v2108_v26 = vld [vmem:[#allocation5 + $0x11] sm:$0x3f]  ;;  %v3374_v27 = vpack.i.bf16 %v2113_v25, %v2107_v24  ;;  %2009 = vst.msk [vmem:[#allocation4 + $0x78] sm:$0xff] %vm1859_vm4, %v1979_v23 }
 0x308   : >> { %v3379_v28 = vpack.i.bf16 %v2108_v26, %v1576_v22  ;;  %v2076_v33 = vld [vmem:[#allocation4 + $0x68] ss:$2 sm:$0x3f]  ;;  %v2078_v36 = vld [vmem:[#allocation4 + $0x69] ss:$2 sm:$0x3f] }
 0x309   : >> { %3375 = vrot.lane.b32.xlu1 %v3374_v27, %s5295_s13  ;;  %v2079_v46 = vmax.f32 %v2076_v33, %v2078_v36  ;;  %v2110_v7 = vld [vmem:[#allocation5 + $0xe] sm:$0xff]  ;;  %v1537_v26 = vld [vmem:[#allocation3 + $0x90] sm:$0xff] }
 0x30a   : >> { %3380 = vrot.lane.b32.xlu0 %v3379_v28, %s5295_s13  ;;  %v2105_v21 = vld [vmem:[#allocation5 + $0x10] sm:$0x3f] }
 0x30e   : >> { %v1982_v30 = vpop.f32.mrf.mxu1  ;;  %v2081_v41 = vld [vmem:[#allocation4 + $0x75] ss:$2 sm:$0x3f] }
 0x30f   : >> { %2010 = vst.msk [vmem:[#allocation4 + $0x80] sm:$0xff] %vm1859_vm4, %v1982_v30  ;;  %v2082_v44 = vmax.f32 %v2079_v46, %v2081_v41 }
 0x311   : >> { %1813 = vrot.lane.b32.xlu1 %v1596_v31, %s5293_s29 }
 0x312   : >> { %1655 = vrot.lane.b32.xlu0 %v1557_v32, %s5294_s15  ;;  %v1538_v32 = vld [vmem:[#allocation3 + $0x98] sm:$0x7] }
 0x316   : >> { %v2084_v45 = vld [vmem:[#allocation4 + $0x76] ss:$2 sm:$0x3f] }
 0x317   : >> { %v2085_v47 = vmax.f32 %v2082_v44, %v2084_v45 }
 0x319   : >> { %v2086_v50 = vadd.f32 %v4076_v62, %v2085_v47  ;;  %1815 = vrot.lane.b32.xlu1 %v1597_v48, %s5293_s29  ;;  %v2145_v62 = vld [vmem:[%s5269_s5] sm:$0xff] }
 0x31a   : >> { %1737 = vrot.lane.b32.xlu0 %v1578_v49, %s5295_s13  ;;  %2192 = vmatpush.msrb.mxu2 %v2145_v62 }
 0x31b   : >> { %v2087_v51 = vmax.f32 %v2086_v50, 0.0 }
 0x31d   : >> { %2088 = vst.msk [vmem:[#allocation5 + $0x18] sm:$0x3f] %vm2031_vm6, %v2087_v51 }
 0x321   : >> { %1817 = vrot.lane.b32.xlu1 %v1598_v52, %s5293_s29  ;;  %s2279_s29 = sshra.s32 %s3464_s25, 3  ;;  %s395_s25 = sadd.s32 1, %s3464_s25  }
 0x322   : >> { %s3224_s24 = sshll.u32 %s2279_s29, 5  ;;  %p392_p11 = scmp.ge.s32.totalorder %s395_s25, 8  }
 0x323   : >> { %s2285_s2 = sadd.s32 %s3224_s24, %s2282_s21  ;;  %v2349_v11 = vld [vmem:[%s5271_s7 + $0x1c0] sm:$0xff] (%p392_p11)  ;;  %s3043_s24 = scalar_lea.hbm (%p392_p11), %s5275_s11, %s3575_s30 }
 0x324   : >> { %v2114_v54 = vld [vmem:[#allocation5 + $0x17] sm:$0x3f]  ;;  %s2286_s3 = scalar_lea.vmem [#allocation7], %s2285_s2  ;;  %s5296_s22 = scalar_lea.vmem (%p392_p11), [#allocation8], %s3579_s12 }
 0x325   : >> { %v3384_v55 = vpack.i.bf16 %v1577_v53, %v2114_v54  ;;  %v2111_v22 = vld [vmem:[#allocation5 + $0x16] sm:$0x3f]  ;;  %s3045_s2 = sshll.u32 (%p392_p11), %s5296_s22, 4  ;;  %s5297_s14 = smov (%p392_p11), %s5296_s22  ;;  %s3046_s2 = int_to_ptr.vmem [resolvable:$true] %s3045_s2 }
 0x326   : > { %s5298_s16 = sand.u32 (%p392_p11), 1, %s3452_s18  }
 0x327   : >> { %3385 = vrot.lane.b32.xlu2 %v3384_v55, %s5295_s13  ;;  %s3033_s0 = scalar_lea.sflag (%p392_p11), [#allocation9], %s5298_s16  ;;  %s3414_s13 = scalar_lea.hbm (%p392_p11), %s5275_s11, 16 }
 0x32f   : >> { %1657 = vrot.lane.b32.xlu2 %v1558_v56, %s5294_s15 }
 0x364   : >> { %v3371_v57 = vpop.permute.xlu0 %3370 }
 0x365   : >> { %v3373_v58 = vunpack.i.h.bf16 %v3371_v57  ;;  %v3372_v59 = vunpack.i.l.bf16 %v3371_v57 }
 0x367   : >> { %v2139_v63 = vsel %vm1859_vm4, %v2103_v60, %v3372_v59  ;;  %v2142_v0 = vsel %vm1859_vm4, %v2109_v61, %v3373_v58  ;;  %v3391_v59 = vld [vmem:[%s5270_s6] ss:$0 sm:$0xff] }
 0x368   : >> { %2193 = vmatmul.f32.vlgmr.msrb.gmra.mxu2 %v2139_v63  ;;  %2219 = vmatmul.f32.vlgmr.msrb.gmra.mxu3 %v2142_v0 }
 0x37b   : >> { %v3376_v2 = vpop.permute.xlu1 %3375 }
 0x37c   : >> { %v3381_v3 = vpop.permute.xlu0 %3380  ;;  %v3378_v4 = vunpack.i.h.bf16 %v3376_v2  ;;  %v3377_v5 = vunpack.i.l.bf16 %v3376_v2  ;;  %v2275_v2 = vlaneseq }
 0x37d   : >> { %v3382_v10 = vunpack.i.l.bf16 %v3381_v3  ;;  %v3383_v14 = vunpack.i.h.bf16 %v3381_v3 }
 0x37e   : >> { %v2140_v8 = vsel %vm1859_vm4, %v2104_v6, %v3377_v5  ;;  %v2143_v9 = vsel %vm1859_vm4, %v2110_v7, %v3378_v4  ;;  %vm2277_vm10 = vcmp.lt.s32.totalorder %v2275_v2, 512  ;;  %v2481_v7 = vld [vmem:[%s5271_s7 + $0x5e0] sm:$0xff] (%p392_p11) }
 0x37f   : >> { %2196 = vmatmul.f32.gmra.mxu2 %v2140_v8  ;;  %2222 = vmatmul.f32.gmra.mxu3 %v2143_v9  ;;  %v1877_v17 = vsel %vm1859_vm4, %v1856_v13, %v3382_v10  ;;  %v2141_v23 = vsel %vm1859_vm4, %v2105_v21, %v3383_v14  ;;  %v2353_v8 = vld [vmem:[%s5271_s7 + $0x1e0] sm:$0xff] (%p392_p11) }
 0x380   : > { %v2477_v9 = vld [vmem:[%s5271_s7 + $0x5c0] sm:$0xff] (%p392_p11)  ;;  %2599 = vmatpush.msra.mxu2 (%p392_p11), %v2481_v7  ;;  %2559 = vmatpush.msra.mxu0 (%p392_p11), %v2353_v8  ;;  %v2354_v7 = vld [vmem:[%s5271_s7 + $0x1e8] sm:$0xff] (%p392_p11) }
 0x381   : >> { %v3386_v12 = vpop.permute.xlu2 %3385  ;;  %v2545_v10 = vld [vmem:[%s5271_s7 + $0x7e0] sm:$0xff] (%p392_p11)  ;;  %v2546_v8 = vld [vmem:[%s5271_s7 + $0x7e8] sm:$0xff] (%p392_p11) }
 0x382   : >> { %v3387_v15 = vunpack.i.l.bf16 %v3386_v12  ;;  %v3388_v25 = vunpack.i.h.bf16 %v3386_v12  ;;  %v2417_v12 = vld [vmem:[%s5271_s7 + $0x3e0] sm:$0xff] (%p392_p11)  ;;  %2619 = vmatpush.msra.mxu3 (%p392_p11), %v2545_v10  ;;  %2600 = vmatpush.msra.mxu2 (%p392_p11), %v2477_v9  ;;  %v2478_v9 = vld [vmem:[%s5271_s7 + $0x5c8] sm:$0xff] (%p392_p11) }
 0x383   : >> { %v1814_v16 = vpop.permute.xlu1 %1813  ;;  %2579 = vmatpush.msra.mxu1 (%p392_p11), %v2417_v12  ;;  %v2473_v13 = vld [vmem:[%s5271_s7 + $0x5a0] sm:$0xff] (%p392_p11)  ;;  %2560 = vmatpush.msra.mxu0 (%p392_p11), %v2349_v11  ;;  %v2350_v11 = vld [vmem:[%s5271_s7 + $0x1c8] sm:$0xff] (%p392_p11) }
 0x384   : >> { %v1898_v18 = vsel %vm1880_vm5, %v1877_v17, %v1814_v16  ;;  %v1656_v19 = vpop.permute.xlu0 %1655  ;;  %v2144_v24 = vsel %vm1859_vm4, %v2111_v22, %v3387_v15  ;;  %v2541_v14 = vld [vmem:[%s5271_s7 + $0x7c0] sm:$0xff] (%p392_p11)  ;;  %2601 = vmatpush.msra.mxu2 (%p392_p11), %v2473_v13  ;;  %v2418_v12 = vld [vmem:[%s5271_s7 + $0x3e8] sm:$0xff] (%p392_p11) }
 0x385   : >> { %1984 = vmatmul.f32.gmra.mxu1 %v1898_v18  ;;  %v1857_v27 = vsel %vm1058_vm2, %v1537_v26, %v1656_v19  ;;  %v2345_v15 = vld [vmem:[%s5271_s7 + $0x1a0] sm:$0xff] (%p392_p11)  ;;  %2620 = vmatpush.msra.mxu3 (%p392_p11), %v2541_v14  ;;  %v2474_v13 = vld [vmem:[%s5271_s7 + $0x5a8] sm:$0xff] (%p392_p11) }
 0x386   : >> { %v1878_v29 = vsel %vm1859_vm4, %v1857_v27, %v3388_v25  ;;  %v2413_v16 = vld [vmem:[%s5271_s7 + $0x3c0] sm:$0xff] (%p392_p11)  ;;  %2561 = vmatpush.msra.mxu0 (%p392_p11), %v2345_v15  ;;  %v2542_v14 = vld [vmem:[%s5271_s7 + $0x7c8] sm:$0xff] (%p392_p11) }
 0x387   : >> { %2199 = vmatmul.f32.gmra.mxu2 %v2141_v23  ;;  %2225 = vmatmul.f32.gmra.mxu3 %v2144_v24  ;;  %v2537_v17 = vld [vmem:[%s5271_s7 + $0x7a0] sm:$0xff] (%p392_p11)  ;;  %v2346_v15 = vld [vmem:[%s5271_s7 + $0x1a8] sm:$0xff] (%p392_p11) }
 0x388   : > { %2580 = vmatpush.msra.mxu1 (%p392_p11), %v2413_v16  ;;  %v2469_v18 = vld [vmem:[%s5271_s7 + $0x580] sm:$0xff] (%p392_p11)  ;;  %2621 = vmatpush.msra.mxu3 (%p392_p11), %v2537_v17  ;;  %v2414_v16 = vld [vmem:[%s5271_s7 + $0x3c8] sm:$0xff] (%p392_p11) }
 0x389   : >> { %v1658_v31 = vpop.permute.xlu2 %1657  ;;  %v2341_v19 = vld [vmem:[%s5271_s7 + $0x180] sm:$0xff] (%p392_p11)  ;;  %2602 = vmatpush.msra.mxu2 (%p392_p11), %v2469_v18  ;;  %v2470_v17 = vld [vmem:[%s5271_s7 + $0x588] sm:$0xff] (%p392_p11) }
 0x38a   : >> { %v1858_v33 = vsel %vm1058_vm2, %v1538_v32, %v1658_v31  ;;  %v2409_v21 = vld [vmem:[%s5271_s7 + $0x3a0] sm:$0xff] (%p392_p11)  ;;  %2562 = vmatpush.msra.mxu0 (%p392_p11), %v2341_v19  ;;  %v2538_v18 = vld [vmem:[%s5271_s7 + $0x7a8] sm:$0xff] (%p392_p11) }
 0x38b   : >> { %v1816_v28 = vpop.permute.xlu1 %1815  ;;  %v2533_v22 = vld [vmem:[%s5271_s7 + $0x780] sm:$0xff] (%p392_p11)  ;;  %2581 = vmatpush.msra.mxu1 (%p392_p11), %v2409_v21  ;;  %v2342_v19 = vld [vmem:[%s5271_s7 + $0x188] sm:$0xff] (%p392_p11) }
 0x38c   : >> { %v1899_v30 = vsel %vm1880_vm5, %v1878_v29, %v1816_v28  ;;  %v1738_v34 = vpop.permute.xlu0 %1737  ;;  %v2405_v23 = vld [vmem:[%s5271_s7 + $0x380] sm:$0xff] (%p392_p11)  ;;  %2622 = vmatpush.msra.mxu3 (%p392_p11), %v2533_v22  ;;  %v2410_v21 = vld [vmem:[%s5271_s7 + $0x3a8] sm:$0xff] (%p392_p11) }
 0x38d   : >> { %1987 = vmatmul.f32.gmra.mxu1 %v1899_v30  ;;  %v1879_v35 = vsel %vm1859_vm4, %v1858_v33, %v1738_v34  ;;  %v2465_v24 = vld [vmem:[%s5271_s7 + $0x560] sm:$0xff] (%p392_p11)  ;;  %v2466_v22 = vld [vmem:[%s5271_s7 + $0x568] sm:$0xff] (%p392_p11) }
 0x38e   : > { %v2337_v25 = vld [vmem:[%s5271_s7 + $0x160] sm:$0xff] (%p392_p11)  ;;  %2582 = vmatpush.msra.mxu1 (%p392_p11), %v2405_v23  ;;  %2603 = vmatpush.msra.mxu2 (%p392_p11), %v2465_v24  ;;  %v2534_v23 = vld [vmem:[%s5271_s7 + $0x788] sm:$0xff] (%p392_p11) }
 0x38f   : > { %v2529_v26 = vld [vmem:[%s5271_s7 + $0x760] sm:$0xff] (%p392_p11)  ;;  %2563 = vmatpush.msra.mxu0 (%p392_p11), %v2337_v25  ;;  %v2338_v24 = vld [vmem:[%s5271_s7 + $0x168] sm:$0xff] (%p392_p11) }
 0x390   : > { %v2401_v27 = vld [vmem:[%s5271_s7 + $0x360] sm:$0xff] (%p392_p11)  ;;  %2623 = vmatpush.msra.mxu3 (%p392_p11), %v2529_v26  ;;  %v2406_v25 = vld [vmem:[%s5271_s7 + $0x388] sm:$0xff] (%p392_p11) }
 0x391   : > { %v2461_v28 = vld [vmem:[%s5271_s7 + $0x540] sm:$0xff] (%p392_p11)  ;;  %2583 = vmatpush.msra.mxu1 (%p392_p11), %v2401_v27  ;;  %v2462_v26 = vld [vmem:[%s5271_s7 + $0x548] sm:$0xff] (%p392_p11) }
 0x392   : > { %v2333_v29 = vld [vmem:[%s5271_s7 + $0x140] sm:$0xff] (%p392_p11)  ;;  %2604 = vmatpush.msra.mxu2 (%p392_p11), %v2461_v28  ;;  %v2530_v27 = vld [vmem:[%s5271_s7 + $0x768] sm:$0xff] (%p392_p11) }
 0x393   : >> { %v1818_v36 = vpop.permute.xlu1 %1817  ;;  %v2525_v30 = vld [vmem:[%s5271_s7 + $0x740] sm:$0xff] (%p392_p11)  ;;  %2564 = vmatpush.msra.mxu0 (%p392_p11), %v2333_v29  ;;  %v2334_v28 = vld [vmem:[%s5271_s7 + $0x148] sm:$0xff] (%p392_p11) }
 0x394   : >> { %v1900_v37 = vsel %vm1880_vm5, %v1879_v35, %v1818_v36  ;;  %v2397_v31 = vld [vmem:[%s5271_s7 + $0x340] sm:$0xff] (%p392_p11)  ;;  %2624 = vmatpush.msra.mxu3 (%p392_p11), %v2525_v30  ;;  %v2402_v29 = vld [vmem:[%s5271_s7 + $0x368] sm:$0xff] (%p392_p11) }
 0x395   : >> { %1990 = vmatmul.f32.gmra.mxu1 %v1900_v37  ;;  %v2457_v32 = vld [vmem:[%s5271_s7 + $0x520] sm:$0xff] (%p392_p11)  ;;  %v2458_v30 = vld [vmem:[%s5271_s7 + $0x528] sm:$0xff] (%p392_p11) }
 0x396   : > { %v2329_v33 = vld [vmem:[%s5271_s7 + $0x120] sm:$0xff] (%p392_p11)  ;;  %2584 = vmatpush.msra.mxu1 (%p392_p11), %v2397_v31  ;;  %2605 = vmatpush.msra.mxu2 (%p392_p11), %v2457_v32  ;;  %v2526_v31 = vld [vmem:[%s5271_s7 + $0x748] sm:$0xff] (%p392_p11) }
 0x397   : > { %v2521_v34 = vld [vmem:[%s5271_s7 + $0x720] sm:$0xff] (%p392_p11)  ;;  %2565 = vmatpush.msra.mxu0 (%p392_p11), %v2329_v33  ;;  %v2330_v32 = vld [vmem:[%s5271_s7 + $0x128] sm:$0xff] (%p392_p11) }
 0x398   : > { %v2393_v35 = vld [vmem:[%s5271_s7 + $0x320] sm:$0xff] (%p392_p11)  ;;  %2625 = vmatpush.msra.mxu3 (%p392_p11), %v2521_v34  ;;  %v2398_v33 = vld [vmem:[%s5271_s7 + $0x348] sm:$0xff] (%p392_p11) }
 0x399   : > { %v2453_v36 = vld [vmem:[%s5271_s7 + $0x500] sm:$0xff] (%p392_p11)  ;;  %2585 = vmatpush.msra.mxu1 (%p392_p11), %v2393_v35  ;;  %v2454_v34 = vld [vmem:[%s5271_s7 + $0x508] sm:$0xff] (%p392_p11) }
 0x39a   : > { %v2325_v37 = vld [vmem:[%s5271_s7 + $0x100] sm:$0xff] (%p392_p11)  ;;  %2606 = vmatpush.msra.mxu2 (%p392_p11), %v2453_v36  ;;  %v2522_v35 = vld [vmem:[%s5271_s7 + $0x728] sm:$0xff] (%p392_p11) }
 0x39b   : > { %2566 = vmatpush.msra.mxu0 (%p392_p11), %v2325_v37  ;;  %v2361_v2 = vld [vmem:[%s5271_s7 + $0x220] sm:$0xff] (%p392_p11)  ;;  %v2326_v36 = vld [vmem:[%s5271_s7 + $0x108] sm:$0xff] (%p392_p11) }
 0x39c   : > { %v2357_v10 = vld [vmem:[%s5271_s7 + $0x200] sm:$0xff] (%p392_p11)  ;;  %v2394_v37 = vld [vmem:[%s5271_s7 + $0x328] sm:$0xff] (%p392_p11) }
 0x3eb   : >> { %v2194_v38 = vpop.f32.mrf.mxu2  ;;  %v2220_v39 = vpop.f32.mrf.mxu3 }
 0x3ec   : >> { %v2221_v40 = vadd.f32 %v2220_v39, %v2194_v38  ;;  %v2517_v38 = vld [vmem:[%s5271_s7 + $0x700] sm:$0xff] (%p392_p11) }
 0x3ed   : > { %v2389_v39 = vld [vmem:[%s5271_s7 + $0x300] sm:$0xff] (%p392_p11)  ;;  %2626 = vmatpush.msra.mxu3 (%p392_p11), %v2517_v38  ;;  %v2450_v38 = vld [vmem:[%s5271_s7 + $0x4e8] sm:$0xff] (%p392_p11) }
 0x3ee   : >> { %2229 = vst [vmem:[#allocation6] sm:$0xff] %v2221_v40  ;;  %v2449_v40 = vld [vmem:[%s5271_s7 + $0x4e0] sm:$0xff] (%p392_p11)  ;;  %2586 = vmatpush.msra.mxu1 (%p392_p11), %v2389_v39  ;;  %v2518_v39 = vld [vmem:[%s5271_s7 + $0x708] sm:$0xff] (%p392_p11) }
 0x3ef   : > { %2607 = vmatpush.msra.mxu2 (%p392_p11), %v2449_v40  ;;  %v2322_v40 = vld [vmem:[%s5271_s7 + $0xe8] sm:$0xff] (%p392_p11) }
 0x3f5   : >> { %v2233_v49 = vld [vmem:[#allocation6] ss:$2 sm:$0x3]  ;;  %v2235_v50 = vld [vmem:[#allocation6 + $0x1] ss:$2 sm:$0x3] }
 0x3f6   : >> { %v2236_v52 = vmax.f32 %v2233_v49, %v2235_v50  ;;  %v2313_v49 = vld [vmem:[%s5271_s7 + $0xa0] sm:$0xff] (%p392_p11) }
 0x3f7   : > { %v2505_v50 = vld [vmem:[%s5271_s7 + $0x6a0] sm:$0xff] (%p392_p11) }
 0x402   : >> { %v1985_v41 = vpop.f32.mrf.mxu1  ;;  %v2197_v46 = vpop.f32.mrf.mxu2 }
 0x403   : >> { %2011 = vst.msk [vmem:[#allocation4 + $0x88] sm:$0xff] %vm1859_vm4, %v1985_v41  ;;  %v2223_v42 = vpop.f32.mrf.mxu3  ;;  %v2321_v41 = vld [vmem:[%s5271_s7 + $0xe0] sm:$0xff] (%p392_p11) }
 0x404   : >> { %v2224_v43 = vadd.f32 %v2223_v42, %v2197_v46  ;;  %v2513_v46 = vld [vmem:[%s5271_s7 + $0x6e0] sm:$0xff] (%p392_p11)  ;;  %2567 = vmatpush.msra.mxu0 (%p392_p11), %v2321_v41  ;;  %v2390_v41 = vld [vmem:[%s5271_s7 + $0x308] sm:$0xff] (%p392_p11) }
 0x405   : > { %v2385_v42 = vld [vmem:[%s5271_s7 + $0x2e0] sm:$0xff] (%p392_p11)  ;;  %2627 = vmatpush.msra.mxu3 (%p392_p11), %v2513_v46  ;;  %v2446_v46 = vld [vmem:[%s5271_s7 + $0x4c8] sm:$0xff] (%p392_p11) }
 0x406   : >> { %2230 = vst [vmem:[#allocation6 + $0x8] sm:$0xff] %v2224_v43  ;;  %v2445_v43 = vld [vmem:[%s5271_s7 + $0x4c0] sm:$0xff] (%p392_p11)  ;;  %2587 = vmatpush.msra.mxu1 (%p392_p11), %v2385_v42  ;;  %v2514_v42 = vld [vmem:[%s5271_s7 + $0x6e8] sm:$0xff] (%p392_p11) }
 0x407   : > { %2608 = vmatpush.msra.mxu2 (%p392_p11), %v2445_v43  ;;  %v2318_v43 = vld [vmem:[%s5271_s7 + $0xc8] sm:$0xff] (%p392_p11) }
 0x40a   : >> { %v1988_v44 = vpop.f32.mrf.mxu1  ;;  %v2200_v45 = vpop.f32.mrf.mxu2 }
 0x40b   : >> { %2012 = vst.msk [vmem:[#allocation4 + $0x90] sm:$0xff] %vm1859_vm4, %v1988_v44  ;;  %v2226_v47 = vpop.f32.mrf.mxu3  ;;  %v2317_v44 = vld [vmem:[%s5271_s7 + $0xc0] sm:$0xff] (%p392_p11) }
 0x40c   : >> { %v2227_v48 = vadd.f32 %v2226_v47, %v2200_v45  ;;  %v2509_v45 = vld [vmem:[%s5271_s7 + $0x6c0] sm:$0xff] (%p392_p11)  ;;  %2568 = vmatpush.msra.mxu0 (%p392_p11), %v2317_v44  ;;  %v2386_v44 = vld [vmem:[%s5271_s7 + $0x2e8] sm:$0xff] (%p392_p11) }
 0x40d   : >> { %v2238_v51 = vld [vmem:[#allocation6 + $0x6] ss:$2 sm:$0x3]  ;;  %v2249_v53 = vld [vmem:[#allocation6 + $0xc] ss:$2 sm:$0x3]  ;;  %2628 = vmatpush.msra.mxu3 (%p392_p11), %v2509_v45 }
 0x40e   : >> { %2231 = vst [vmem:[#allocation6 + $0x10] sm:$0x3f] %v2227_v48  ;;  %v2251_v54 = vld [vmem:[#allocation6 + $0xd] ss:$2 sm:$0x3]  ;;  %v2239_v56 = vmax.f32 %v2236_v52, %v2238_v51  ;;  %v2381_v47 = vld [vmem:[%s5271_s7 + $0x2c0] sm:$0xff] (%p392_p11)  ;;  %2569 = vmatpush.msra.mxu0 (%p392_p11), %v2313_v49 }
 0x40f   : >> { %v2252_v62 = vmax.f32 %v2249_v53, %v2251_v54  ;;  %v2241_v20 = vld [vmem:[#allocation6 + $0x7] ss:$2 sm:$0x3]  ;;  %v2441_v48 = vld [vmem:[%s5271_s7 + $0x4a0] sm:$0xff] (%p392_p11)  ;;  %2588 = vmatpush.msra.mxu1 (%p392_p11), %v2381_v47  ;;  %2629 = vmatpush.msra.mxu3 (%p392_p11), %v2505_v50  ;;  %v2442_v45 = vld [vmem:[%s5271_s7 + $0x4a8] sm:$0xff] (%p392_p11) }
 0x410   : >> { %v2242_v58 = vmax.f32 %v2239_v56, %v2241_v20  ;;  %v2377_v51 = vld [vmem:[%s5271_s7 + $0x2a0] sm:$0xff] (%p392_p11)  ;;  %2609 = vmatpush.msra.mxu2 (%p392_p11), %v2441_v48  ;;  %v2510_v47 = vld [vmem:[%s5271_s7 + $0x6c8] sm:$0xff] (%p392_p11) }
 0x411   : > { %v2437_v52 = vld [vmem:[%s5271_s7 + $0x480] sm:$0xff] (%p392_p11)  ;;  %2589 = vmatpush.msra.mxu1 (%p392_p11), %v2377_v51  ;;  %v2314_v48 = vld [vmem:[%s5271_s7 + $0xa8] sm:$0xff] (%p392_p11) }
 0x412   : >> { %v1991_v55 = vpop.f32.mrf.mxu1  ;;  %v2246_v0 = vadd.f32 %v3391_v59, %v2242_v58  ;;  %v2309_v53 = vld [vmem:[%s5271_s7 + $0x80] sm:$0xff] (%p392_p11)  ;;  %2610 = vmatpush.msra.mxu2 (%p392_p11), %v2437_v52  ;;  %v2382_v49 = vld [vmem:[%s5271_s7 + $0x2c8] sm:$0xff] (%p392_p11) }
 0x413   : >> { %2014 = vst.msk [vmem:[#allocation4 + $0x98] sm:$0x7] %vm2013_vm8, %v1991_v55  ;;  %v2501_v54 = vld [vmem:[%s5271_s7 + $0x680] sm:$0xff] (%p392_p11)  ;;  %2570 = vmatpush.msra.mxu0 (%p392_p11), %v2309_v53  ;;  %v2438_v50 = vld [vmem:[%s5271_s7 + $0x488] sm:$0xff] (%p392_p11) }
 0x414   : >> { %v2247_v4 = vmax.f32 %v2246_v0, 0.0  ;;  %v2373_v55 = vld [vmem:[%s5271_s7 + $0x280] sm:$0xff] (%p392_p11)  ;;  %2630 = vmatpush.msra.mxu3 (%p392_p11), %v2501_v54  ;;  %v2506_v51 = vld [vmem:[%s5271_s7 + $0x6a8] sm:$0xff] (%p392_p11) }
 0x415   : >> { %v2254_v57 = vld [vmem:[#allocation6 + $0x12] ss:$2 sm:$0x3]  ;;  %v2257_v61 = vld [vmem:[#allocation6 + $0x13] ss:$2 sm:$0x3]  ;;  %2590 = vmatpush.msra.mxu1 (%p392_p11), %v2373_v55 }
 0x416   : >> { %v2255_v60 = vmax.f32 %v2252_v62, %v2254_v57  ;;  %v2433_v56 = vld [vmem:[%s5271_s7 + $0x460] sm:$0xff] (%p392_p11)  ;;  %v2310_v52 = vld [vmem:[%s5271_s7 + $0x88] sm:$0xff] (%p392_p11) }
 0x417   : > { %v2305_v62 = vld [vmem:[%s5271_s7 + $0x60] sm:$0xff] (%p392_p11)  ;;  %2611 = vmatpush.msra.mxu2 (%p392_p11), %v2433_v56  ;;  %v2378_v53 = vld [vmem:[%s5271_s7 + $0x2a8] sm:$0xff] (%p392_p11) }
 0x418   : >> { %v2258_v63 = vmax.f32 %v2255_v60, %v2257_v61  ;;  %v2497_v20 = vld [vmem:[%s5271_s7 + $0x660] sm:$0xff] (%p392_p11)  ;;  %2571 = vmatpush.msra.mxu0 (%p392_p11), %v2305_v62  ;;  %v2434_v54 = vld [vmem:[%s5271_s7 + $0x468] sm:$0xff] (%p392_p11) }
 0x419   : > { %v2369_v57 = vld [vmem:[%s5271_s7 + $0x260] sm:$0xff] (%p392_p11)  ;;  %2631 = vmatpush.msra.mxu3 (%p392_p11), %v2497_v20  ;;  %v2502_v55 = vld [vmem:[%s5271_s7 + $0x688] sm:$0xff] (%p392_p11) }
 0x41a   : >> { %v2259_v1 = vadd.f32 %v3391_v59, %v2258_v63  ;;  %v2429_v58 = vld [vmem:[%s5271_s7 + $0x440] sm:$0xff] (%p392_p11)  ;;  %2591 = vmatpush.msra.mxu1 (%p392_p11), %v2369_v57  ;;  %v2306_v62 = vld [vmem:[%s5271_s7 + $0x68] sm:$0xff] (%p392_p11) }
 0x41b   : > { %v2301_v59 = vld [vmem:[%s5271_s7 + $0x40] sm:$0xff] (%p392_p11)  ;;  %2612 = vmatpush.msra.mxu2 (%p392_p11), %v2429_v58  ;;  %v2374_v20 = vld [vmem:[%s5271_s7 + $0x288] sm:$0xff] (%p392_p11) }
 0x41c   : >> { %v2260_v3 = vmax.f32 %v2259_v1, 0.0  ;;  %v2493_v60 = vld [vmem:[%s5271_s7 + $0x640] sm:$0xff] (%p392_p11)  ;;  %2572 = vmatpush.msra.mxu0 (%p392_p11), %v2301_v59  ;;  %v2430_v57 = vld [vmem:[%s5271_s7 + $0x448] sm:$0xff] (%p392_p11) }
 0x41d   : > { %394 = sbr.rel (!%p392_p11) target bundleno = 29 (0x1d), region = 241  ;;  %v2365_v61 = vld [vmem:[%s5271_s7 + $0x240] sm:$0xff] (%p392_p11)  ;;  %2632 = vmatpush.msra.mxu3 (%p392_p11), %v2493_v60  ;;  %v2498_v58 = vld [vmem:[%s5271_s7 + $0x668] sm:$0xff] (%p392_p11) }
 0x41e   : >> { %v2266_v5 = vrot.slane %v2260_v3, 6  ;;  %v2425_v63 = vld [vmem:[%s5271_s7 + $0x420] sm:$0xff] (%p392_p11)  ;;  %2592 = vmatpush.msra.mxu1 (%p392_p11), %v2365_v61  ;;  %v2302_v61 = vld [vmem:[%s5271_s7 + $0x48] sm:$0xff] (%p392_p11) }
 0x41f   : > { %v2297_v0 = vld [vmem:[%s5271_s7 + $0x20] sm:$0xff] (%p392_p11)  ;;  %2613 = vmatpush.msra.mxu2 (%p392_p11), %v2425_v63  ;;  %v2370_v63 = vld [vmem:[%s5271_s7 + $0x268] sm:$0xff] (%p392_p11) }
 0x420   : >> { %v2273_v6 = vsel %vm2272_vm9, %v2247_v4, %v2266_v5  ;;  %v2489_v1 = vld [vmem:[%s5271_s7 + $0x620] sm:$0xff] (%p392_p11)  ;;  %2573 = vmatpush.msra.mxu0 (%p392_p11), %v2297_v0  ;;  %v2482_v5 = vld [vmem:[%s5271_s7 + $0x5e8] sm:$0xff] (%p392_p11)  ;;  %2593 = vmatpush.msra.mxu1 (%p392_p11), %v2361_v2 }
 0x421   : >> { %2287 = vst.msk [vmem:[%s2286_s3] ss:$8 sm:$0xf] %vm2277_vm10, %v2273_v6  ;;  %v2421_v3 = vld [vmem:[%s5271_s7 + $0x400] sm:$0xff] (%p392_p11)  ;;  %2633 = vmatpush.msra.mxu3 (%p392_p11), %v2489_v1  ;;  %v2426_v0 = vld [vmem:[%s5271_s7 + $0x428] sm:$0xff] (%p392_p11)  ;;  %s3047_s3 = sshll.u32 (%p392_p11), %s3043_s24, 4  ;;  %s3048_s3 = int_to_ptr.hbm [resolvable:$true] %s3047_s3 }
 0x422   : > { %v2293_v4 = vld [vmem:[%s5271_s7] sm:$0xff]  ;;  %2614 = vmatpush.msra.mxu2 %v2421_v3  ;;  %2594 = vmatpush.msra.mxu1 %v2357_v10  ;;  %v2494_v1 = vld [vmem:[%s5271_s7 + $0x648] sm:$0xff]  ;;  %s3408_s1 = sshra.s32 %s3048_s3, 4  ;;  %s3409_s1 = int_to_ptr.hbm [resolvable:$true] %s3408_s1 }
 0x423   : > { %v2485_v6 = vld [vmem:[%s5271_s7 + $0x600] sm:$0xff]  ;;  %2574 = vmatpush.msra.mxu0 %v2293_v4  ;;  %v2298_v3 = vld [vmem:[%s5271_s7 + $0x28] sm:$0xff]  ;;  %s3410_s29 = scalar_lea.hbm %s3409_s1, 8  ;;  %p3415_p1 = scmp.lt.s32.totalorder %s3409_s1, %s5275_s11 }
 0x424   : > { %2679 = vmatpush.msrb.mxu2 %v2482_v5  ;;  %2634 = vmatpush.msra.mxu3 %v2485_v6  ;;  %v2366_v4 = vld [vmem:[%s5271_s7 + $0x248] sm:$0xff]  ;;  %p3411_p12 = scmp.ne.s32.totalorder %s3409_s1, %s3410_s29  ;;  %p3416_p2 = scmp.lt.s32.totalorder %s3414_s13, %s3410_s29 }
 0x425   : > { %2639 = vmatpush.msrb.mxu0 %v2354_v7  ;;  %2659 = vmatpush.msrb.mxu1 %v2418_v12  ;;  %v2422_v5 = vld [vmem:[%s5271_s7 + $0x408] sm:$0xff]  ;;  %v2483_v7 = vld [vmem:[%s5271_s7 + $0x5f0] sm:$0xff] }
 0x426   : > { %2699 = vmatpush.msrb.mxu3 %v2546_v8  ;;  %2680 = vmatpush.msrb.mxu2 %v2478_v9  ;;  %v2490_v6 = vld [vmem:[%s5271_s7 + $0x628] sm:$0xff]  ;;  %v2479_v12 = vld [vmem:[%s5271_s7 + $0x5d0] sm:$0xff]  ;;  %p3412_p13 = pnand %p3411_p12, %p3564_p5  ;;  %p3417_p3 = por %p3416_p2, %p3415_p1 }
 0x427   : > { %2640 = vmatpush.msrb.mxu0 %v2350_v11  ;;  %2660 = vmatpush.msrb.mxu1 %v2414_v16  ;;  %v2294_v8 = vld [vmem:[%s5271_s7 + $0x8] sm:$0xff]  ;;  %v2355_v11 = vld [vmem:[%s5271_s7 + $0x1f0] sm:$0xff] }
 0x428   : > { %2681 = vmatpush.msrb.mxu2 %v2474_v13  ;;  %2700 = vmatpush.msrb.mxu3 %v2542_v14  ;;  %v4567_v56 = vld [vmem:[#allocation7 + $0x10] sm:$0xff]  ;;  %v4581_v59 = vld [vmem:[#allocation7] sm:$0xff]  ;;  %v4584_v60 = vld [vmem:[#allocation7 + $0x18] sm:$0xff]  ;;  %p3413_p0 = pneg %p3412_p13 }
 0x429   : > { %2641 = vmatpush.msrb.mxu0 %v2346_v15  ;;  %2661 = vmatpush.msrb.mxu1 %v2410_v21  ;;  %v4599_v2 = vld [vmem:[#allocation7 + $0x8] sm:$0xff]  ;;  %v2362_v9 = vld [vmem:[%s5271_s7 + $0x228] sm:$0xff] }
 0x42a   : > { %2682 = vmatpush.msrb.mxu2 %v2470_v17  ;;  %2701 = vmatpush.msrb.mxu3 %v2538_v18  ;;  %v2486_v10 = vld [vmem:[%s5271_s7 + $0x608] sm:$0xff]  ;;  %v2547_v13 = vld [vmem:[%s5271_s7 + $0x7f0] sm:$0xff]  ;;  %p3418_p4 = pnand %p3417_p3, %p3413_p0 }
 0x42b   : > { %2642 = vmatpush.msrb.mxu0 %v2342_v19  ;;  %2662 = vmatpush.msrb.mxu1 %v2406_v25  ;;  %v2358_v14 = vld [vmem:[%s5271_s7 + $0x208] sm:$0xff]  ;;  %v2351_v15 = vld [vmem:[%s5271_s7 + $0x1d0] sm:$0xff] }
 0x42c   : > { %2683 = vmatpush.msrb.mxu2 %v2466_v22  ;;  %2702 = vmatpush.msrb.mxu3 %v2534_v23  ;;  %v2419_v16 = vld [vmem:[%s5271_s7 + $0x3f0] sm:$0xff] }
 0x42d   : > { %2643 = vmatpush.msrb.mxu0 %v2338_v24  ;;  %2663 = vmatpush.msrb.mxu1 %v2402_v29  ;;  %v2475_v17 = vld [vmem:[%s5271_s7 + $0x5b0] sm:$0xff] }
 0x42e   : > { %2684 = vmatpush.msrb.mxu2 %v2462_v26  ;;  %2703 = vmatpush.msrb.mxu3 %v2530_v27  ;;  %v2543_v18 = vld [vmem:[%s5271_s7 + $0x7d0] sm:$0xff] }
 0x42f   : > { %2644 = vmatpush.msrb.mxu0 %v2334_v28  ;;  %2664 = vmatpush.msrb.mxu1 %v2398_v33  ;;  %v2347_v19 = vld [vmem:[%s5271_s7 + $0x1b0] sm:$0xff] }
 0x430   : > { %2685 = vmatpush.msrb.mxu2 %v2458_v30  ;;  %2704 = vmatpush.msrb.mxu3 %v2526_v31  ;;  %v2415_v21 = vld [vmem:[%s5271_s7 + $0x3d0] sm:$0xff] }
 0x431   : > { %2645 = vmatpush.msrb.mxu0 %v2330_v32  ;;  %2665 = vmatpush.msrb.mxu1 %v2394_v37  ;;  %v2471_v22 = vld [vmem:[%s5271_s7 + $0x590] sm:$0xff] }
 0x432   : > { %2686 = vmatpush.msrb.mxu2 %v2454_v34  ;;  %2705 = vmatpush.msrb.mxu3 %v2522_v35  ;;  %v2539_v23 = vld [vmem:[%s5271_s7 + $0x7b0] sm:$0xff] }
 0x433   : > { %2646 = vmatpush.msrb.mxu0 %v2326_v36  ;;  %2666 = vmatpush.msrb.mxu1 %v2390_v41  ;;  %v2343_v24 = vld [vmem:[%s5271_s7 + $0x190] sm:$0xff] }
 0x434   : > { %2687 = vmatpush.msrb.mxu2 %v2450_v38  ;;  %2706 = vmatpush.msrb.mxu3 %v2518_v39  ;;  %v2411_v25 = vld [vmem:[%s5271_s7 + $0x3b0] sm:$0xff] }
 0x435   : > { %2647 = vmatpush.msrb.mxu0 %v2322_v40  ;;  %2667 = vmatpush.msrb.mxu1 %v2386_v44  ;;  %v2467_v26 = vld [vmem:[%s5271_s7 + $0x570] sm:$0xff] }
 0x436   : > { %2688 = vmatpush.msrb.mxu2 %v2446_v46  ;;  %2707 = vmatpush.msrb.mxu3 %v2514_v42  ;;  %v2535_v27 = vld [vmem:[%s5271_s7 + $0x790] sm:$0xff] }
 0x437   : > { %2648 = vmatpush.msrb.mxu0 %v2318_v43  ;;  %2668 = vmatpush.msrb.mxu1 %v2382_v49  ;;  %v2339_v28 = vld [vmem:[%s5271_s7 + $0x170] sm:$0xff] }
 0x438   : > { %2689 = vmatpush.msrb.mxu2 %v2442_v45  ;;  %2708 = vmatpush.msrb.mxu3 %v2510_v47  ;;  %v2407_v29 = vld [vmem:[%s5271_s7 + $0x390] sm:$0xff] }
 0x439   : > { %2649 = vmatpush.msrb.mxu0 %v2314_v48  ;;  %2669 = vmatpush.msrb.mxu1 %v2378_v53  ;;  %v2463_v30 = vld [vmem:[%s5271_s7 + $0x550] sm:$0xff] }
 0x43a   : > { %2690 = vmatpush.msrb.mxu2 %v2438_v50  ;;  %2709 = vmatpush.msrb.mxu3 %v2506_v51  ;;  %v2531_v31 = vld [vmem:[%s5271_s7 + $0x770] sm:$0xff] }
 0x43b   : > { %2650 = vmatpush.msrb.mxu0 %v2310_v52  ;;  %2615 = vmatmul.f32.vlgmr.msra.gmra.mxu2 %v4567_v56  ;;  %v2335_v32 = vld [vmem:[%s5271_s7 + $0x150] sm:$0xff] }
 0x43c   : > { %2691 = vmatpush.msrb.mxu2 %v2434_v54  ;;  %2710 = vmatpush.msrb.mxu3 %v2502_v55  ;;  %v2403_v33 = vld [vmem:[%s5271_s7 + $0x370] sm:$0xff] }
 0x43d   : > { %2651 = vmatpush.msrb.mxu0 %v2306_v62  ;;  %2670 = vmatpush.msrb.mxu1 %v2374_v20  ;;  %v2459_v34 = vld [vmem:[%s5271_s7 + $0x530] sm:$0xff] }
 0x43e   : > { %2692 = vmatpush.msrb.mxu2 %v2430_v57  ;;  %2711 = vmatpush.msrb.mxu3 %v2498_v58  ;;  %v2527_v35 = vld [vmem:[%s5271_s7 + $0x750] sm:$0xff] }
 0x43f   : > { %2575 = vmatmul.f32.vlgmr.msra.gmra.mxu0 %v4581_v59  ;;  %2635 = vmatmul.f32.vlgmr.msra.gmra.mxu3 %v4584_v60  ;;  %v2331_v36 = vld [vmem:[%s5271_s7 + $0x130] sm:$0xff] }
 0x440   : > { %2652 = vmatpush.msrb.mxu0 %v2302_v61  ;;  %2671 = vmatpush.msrb.mxu1 %v2370_v63  ;;  %v2399_v37 = vld [vmem:[%s5271_s7 + $0x350] sm:$0xff] }
 0x441   : > { %2693 = vmatpush.msrb.mxu2 %v2426_v0  ;;  %2712 = vmatpush.msrb.mxu3 %v2494_v1  ;;  %v2455_v38 = vld [vmem:[%s5271_s7 + $0x510] sm:$0xff] }
 0x442   : > { %2595 = vmatmul.f32.vlgmr.msra.gmra.mxu1 %v4599_v2  ;;  %2653 = vmatpush.msrb.mxu0 %v2298_v3  ;;  %v2523_v39 = vld [vmem:[%s5271_s7 + $0x730] sm:$0xff] }
 0x443   : > { %2672 = vmatpush.msrb.mxu1 %v2366_v4  ;;  %2694 = vmatpush.msrb.mxu2 %v2422_v5  ;;  %v2327_v40 = vld [vmem:[%s5271_s7 + $0x110] sm:$0xff] }
 0x444   : > { %2713 = vmatpush.msrb.mxu3 %v2490_v6  ;;  %2654 = vmatpush.msrb.mxu0 %v2294_v8  ;;  %v2395_v41 = vld [vmem:[%s5271_s7 + $0x330] sm:$0xff] }
 0x445   : > { %2759 = vmatpush.msra.mxu2 %v2483_v7  ;;  %2673 = vmatpush.msrb.mxu1 %v2362_v9  ;;  %v2451_v46 = vld [vmem:[%s5271_s7 + $0x4f0] sm:$0xff] }
 0x446   : > { %2714 = vmatpush.msrb.mxu3 %v2486_v10  ;;  %2695 = vmatmul.f32.vlgmr.msrb.gmra.mxu2 %v4567_v56  ;;  %v2519_v42 = vld [vmem:[%s5271_s7 + $0x710] sm:$0xff] }
 0x447   : > { %2719 = vmatpush.msra.mxu0 %v2355_v11  ;;  %2760 = vmatpush.msra.mxu2 %v2479_v12  ;;  %v2323_v43 = vld [vmem:[%s5271_s7 + $0xf0] sm:$0xff]  ;;  %v2484_v12 = vld [vmem:[%s5271_s7 + $0x5f8] sm:$0xff] }
 0x448   : > { %2779 = vmatpush.msra.mxu3 %v2547_v13  ;;  %2674 = vmatpush.msrb.mxu1 %v2358_v14  ;;  %v2391_v44 = vld [vmem:[%s5271_s7 + $0x310] sm:$0xff] }
 0x449   : > { %2655 = vmatmul.f32.vlgmr.msrb.gmra.mxu0 %v4581_v59  ;;  %2715 = vmatmul.f32.vlgmr.msrb.gmra.mxu3 %v4584_v60  ;;  %v2447_v45 = vld [vmem:[%s5271_s7 + $0x4d0] sm:$0xff] }
 0x44a   : > { %2720 = vmatpush.msra.mxu0 %v2351_v15  ;;  %2739 = vmatpush.msra.mxu1 %v2419_v16  ;;  %v2515_v47 = vld [vmem:[%s5271_s7 + $0x6f0] sm:$0xff]  ;;  %v2356_v15 = vld [vmem:[%s5271_s7 + $0x1f8] sm:$0xff] }
 0x44b   : > { %2761 = vmatpush.msra.mxu2 %v2475_v17  ;;  %2780 = vmatpush.msra.mxu3 %v2543_v18  ;;  %v2319_v48 = vld [vmem:[%s5271_s7 + $0xd0] sm:$0xff]  ;;  %v2480_v16 = vld [vmem:[%s5271_s7 + $0x5d8] sm:$0xff] }
 0x44c   : > { %2675 = vmatmul.f32.vlgmr.msrb.gmra.mxu1 %v4599_v2  ;;  %2721 = vmatpush.msra.mxu0 %v2347_v19  ;;  %v2387_v49 = vld [vmem:[%s5271_s7 + $0x2f0] sm:$0xff]  ;;  %v2548_v17 = vld [vmem:[%s5271_s7 + $0x7f8] sm:$0xff] }
 0x44d   : > { %2740 = vmatpush.msra.mxu1 %v2415_v21  ;;  %2762 = vmatpush.msra.mxu2 %v2471_v22  ;;  %v2443_v50 = vld [vmem:[%s5271_s7 + $0x4b0] sm:$0xff]  ;;  %v2352_v19 = vld [vmem:[%s5271_s7 + $0x1d8] sm:$0xff] }
 0x44e   : > { %2781 = vmatpush.msra.mxu3 %v2539_v23  ;;  %2722 = vmatpush.msra.mxu0 %v2343_v24  ;;  %v2511_v51 = vld [vmem:[%s5271_s7 + $0x6d0] sm:$0xff]  ;;  %v2476_v21 = vld [vmem:[%s5271_s7 + $0x5b8] sm:$0xff] }
 0x44f   : > { %2741 = vmatpush.msra.mxu1 %v2411_v25  ;;  %2763 = vmatpush.msra.mxu2 %v2467_v26  ;;  %v2315_v52 = vld [vmem:[%s5271_s7 + $0xb0] sm:$0xff]  ;;  %v2420_v22 = vld [vmem:[%s5271_s7 + $0x3f8] sm:$0xff] }
 0x450   : > { %2782 = vmatpush.msra.mxu3 %v2535_v27  ;;  %2723 = vmatpush.msra.mxu0 %v2339_v28  ;;  %v2383_v53 = vld [vmem:[%s5271_s7 + $0x2d0] sm:$0xff]  ;;  %v2544_v23 = vld [vmem:[%s5271_s7 + $0x7d8] sm:$0xff] }
 0x451   : > { %2742 = vmatpush.msra.mxu1 %v2407_v29  ;;  %2764 = vmatpush.msra.mxu2 %v2463_v30  ;;  %v2439_v54 = vld [vmem:[%s5271_s7 + $0x490] sm:$0xff]  ;;  %v2348_v24 = vld [vmem:[%s5271_s7 + $0x1b8] sm:$0xff] }
 0x452   : > { %2783 = vmatpush.msra.mxu3 %v2531_v31  ;;  %2724 = vmatpush.msra.mxu0 %v2335_v32  ;;  %v2507_v55 = vld [vmem:[%s5271_s7 + $0x6b0] sm:$0xff]  ;;  %v2472_v25 = vld [vmem:[%s5271_s7 + $0x598] sm:$0xff] }
 0x453   : > { %2743 = vmatpush.msra.mxu1 %v2403_v33  ;;  %2765 = vmatpush.msra.mxu2 %v2459_v34  ;;  %v2311_v62 = vld [vmem:[%s5271_s7 + $0x90] sm:$0xff]  ;;  %v2416_v26 = vld [vmem:[%s5271_s7 + $0x3d8] sm:$0xff] }
 0x454   : > { %2784 = vmatpush.msra.mxu3 %v2527_v35  ;;  %2725 = vmatpush.msra.mxu0 %v2331_v36  ;;  %v2379_v20 = vld [vmem:[%s5271_s7 + $0x2b0] sm:$0xff]  ;;  %v2540_v27 = vld [vmem:[%s5271_s7 + $0x7b8] sm:$0xff] }
 0x455   : > { %2744 = vmatpush.msra.mxu1 %v2399_v37  ;;  %2766 = vmatpush.msra.mxu2 %v2455_v38  ;;  %v2435_v57 = vld [vmem:[%s5271_s7 + $0x470] sm:$0xff]  ;;  %v2344_v28 = vld [vmem:[%s5271_s7 + $0x198] sm:$0xff] }
 0x456   : > { %2785 = vmatpush.msra.mxu3 %v2523_v39  ;;  %2726 = vmatpush.msra.mxu0 %v2327_v40  ;;  %v2503_v58 = vld [vmem:[%s5271_s7 + $0x690] sm:$0xff]  ;;  %v2468_v29 = vld [vmem:[%s5271_s7 + $0x578] sm:$0xff] }
 0x457   : > { %2745 = vmatpush.msra.mxu1 %v2395_v41  ;;  %2767 = vmatpush.msra.mxu2 %v2451_v46  ;;  %v2307_v61 = vld [vmem:[%s5271_s7 + $0x70] sm:$0xff]  ;;  %v2412_v30 = vld [vmem:[%s5271_s7 + $0x3b8] sm:$0xff] }
 0x458   : > { %2786 = vmatpush.msra.mxu3 %v2519_v42  ;;  %2727 = vmatpush.msra.mxu0 %v2323_v43  ;;  %v2375_v63 = vld [vmem:[%s5271_s7 + $0x290] sm:$0xff]  ;;  %v2536_v31 = vld [vmem:[%s5271_s7 + $0x798] sm:$0xff] }
 0x459   : > { %2746 = vmatpush.msra.mxu1 %v2391_v44  ;;  %2768 = vmatpush.msra.mxu2 %v2447_v45  ;;  %v2431_v0 = vld [vmem:[%s5271_s7 + $0x450] sm:$0xff]  ;;  %v2340_v32 = vld [vmem:[%s5271_s7 + $0x178] sm:$0xff] }
 0x45a   : > { %2787 = vmatpush.msra.mxu3 %v2515_v47  ;;  %2728 = vmatpush.msra.mxu0 %v2319_v48  ;;  %v2499_v1 = vld [vmem:[%s5271_s7 + $0x670] sm:$0xff]  ;;  %v2464_v33 = vld [vmem:[%s5271_s7 + $0x558] sm:$0xff] }
 0x45b   : > { %2747 = vmatpush.msra.mxu1 %v2387_v49  ;;  %2769 = vmatpush.msra.mxu2 %v2443_v50  ;;  %v2303_v3 = vld [vmem:[%s5271_s7 + $0x50] sm:$0xff]  ;;  %v2408_v34 = vld [vmem:[%s5271_s7 + $0x398] sm:$0xff] }
 0x45c   : > { %2788 = vmatpush.msra.mxu3 %v2511_v51  ;;  %2729 = vmatpush.msra.mxu0 %v2315_v52  ;;  %v2371_v4 = vld [vmem:[%s5271_s7 + $0x270] sm:$0xff]  ;;  %v2532_v35 = vld [vmem:[%s5271_s7 + $0x778] sm:$0xff] }
 0x45d   : > { %2748 = vmatpush.msra.mxu1 %v2383_v53  ;;  %2770 = vmatpush.msra.mxu2 %v2439_v54  ;;  %v2427_v5 = vld [vmem:[%s5271_s7 + $0x430] sm:$0xff]  ;;  %v2336_v36 = vld [vmem:[%s5271_s7 + $0x158] sm:$0xff] }
 0x45e   : > { %2789 = vmatpush.msra.mxu3 %v2507_v55  ;;  %2730 = vmatpush.msra.mxu0 %v2311_v62  ;;  %v2495_v6 = vld [vmem:[%s5271_s7 + $0x650] sm:$0xff]  ;;  %v2460_v37 = vld [vmem:[%s5271_s7 + $0x538] sm:$0xff] }
 0x45f   : > { %2749 = vmatpush.msra.mxu1 %v2379_v20  ;;  %2771 = vmatpush.msra.mxu2 %v2435_v57  ;;  %v2299_v7 = vld [vmem:[%s5271_s7 + $0x30] sm:$0xff]  ;;  %v2404_v38 = vld [vmem:[%s5271_s7 + $0x378] sm:$0xff] }
 0x460   : > { %2790 = vmatpush.msra.mxu3 %v2503_v58  ;;  %2731 = vmatpush.msra.mxu0 %v2307_v61  ;;  %v2367_v8 = vld [vmem:[%s5271_s7 + $0x250] sm:$0xff]  ;;  %v2528_v39 = vld [vmem:[%s5271_s7 + $0x758] sm:$0xff] }
 0x461   : > { %2750 = vmatpush.msra.mxu1 %v2375_v63  ;;  %2772 = vmatpush.msra.mxu2 %v2431_v0  ;;  %v2423_v9 = vld [vmem:[%s5271_s7 + $0x410] sm:$0xff]  ;;  %v2332_v40 = vld [vmem:[%s5271_s7 + $0x138] sm:$0xff] }
 0x462   : > { %2791 = vmatpush.msra.mxu3 %v2499_v1  ;;  %2732 = vmatpush.msra.mxu0 %v2303_v3  ;;  %v2491_v10 = vld [vmem:[%s5271_s7 + $0x630] sm:$0xff]  ;;  %v2456_v41 = vld [vmem:[%s5271_s7 + $0x518] sm:$0xff] }
 0x463   : > { %2751 = vmatpush.msra.mxu1 %v2371_v4  ;;  %2773 = vmatpush.msra.mxu2 %v2427_v5  ;;  %v2295_v11 = vld [vmem:[%s5271_s7 + $0x10] sm:$0xff]  ;;  %v2400_v46 = vld [vmem:[%s5271_s7 + $0x358] sm:$0xff] }
 0x464   : > { %2792 = vmatpush.msra.mxu3 %v2495_v6  ;;  %2733 = vmatpush.msra.mxu0 %v2299_v7  ;;  %v2363_v13 = vld [vmem:[%s5271_s7 + $0x230] sm:$0xff]  ;;  %v2524_v42 = vld [vmem:[%s5271_s7 + $0x738] sm:$0xff] }
 0x465   : > { %2752 = vmatpush.msra.mxu1 %v2367_v8  ;;  %2774 = vmatpush.msra.mxu2 %v2423_v9  ;;  %v2487_v14 = vld [vmem:[%s5271_s7 + $0x610] sm:$0xff]  ;;  %v2328_v43 = vld [vmem:[%s5271_s7 + $0x118] sm:$0xff] }
 0x466   : > { %2793 = vmatpush.msra.mxu3 %v2491_v10  ;;  %2775 = vmatmul.f32.vlgmr.msra.gmra.mxu2 %v4567_v56  ;;  %v2359_v18 = vld [vmem:[%s5271_s7 + $0x210] sm:$0xff]  ;;  %v2452_v44 = vld [vmem:[%s5271_s7 + $0x4f8] sm:$0xff] }
 0x467   : > { %2734 = vmatpush.msra.mxu0 %v2295_v11  ;;  %2839 = vmatpush.msrb.mxu2 %v2484_v12  ;;  %v2396_v45 = vld [vmem:[%s5271_s7 + $0x338] sm:$0xff] }
 0x468   : > { %2753 = vmatpush.msra.mxu1 %v2363_v13  ;;  %2794 = vmatpush.msra.mxu3 %v2487_v14  ;;  %v2520_v47 = vld [vmem:[%s5271_s7 + $0x718] sm:$0xff] }
 0x469   : > { %2735 = vmatmul.f32.vlgmr.msra.gmra.mxu0 %v4581_v59  ;;  %2795 = vmatmul.f32.vlgmr.msra.gmra.mxu3 %v4584_v60  ;;  %v2324_v48 = vld [vmem:[%s5271_s7 + $0xf8] sm:$0xff] }
 0x46a   : > { %2799 = vmatpush.msrb.mxu0 %v2356_v15  ;;  %2840 = vmatpush.msrb.mxu2 %v2480_v16  ;;  %v2448_v49 = vld [vmem:[%s5271_s7 + $0x4d8] sm:$0xff] }
 0x46b   : > { %2859 = vmatpush.msrb.mxu3 %v2548_v17  ;;  %2754 = vmatpush.msra.mxu1 %v2359_v18  ;;  %v2392_v50 = vld [vmem:[%s5271_s7 + $0x318] sm:$0xff] }
 0x46c   : > { %2800 = vmatpush.msrb.mxu0 %v2352_v19  ;;  %2755 = vmatmul.f32.vlgmr.msra.gmra.mxu1 %v4599_v2  ;;  %v2516_v51 = vld [vmem:[%s5271_s7 + $0x6f8] sm:$0xff] }
 0x46d   : > { %2841 = vmatpush.msrb.mxu2 %v2476_v21  ;;  %2819 = vmatpush.msrb.mxu1 %v2420_v22  ;;  %v2320_v52 = vld [vmem:[%s5271_s7 + $0xd8] sm:$0xff]  ;;  %v2897_v21 = vld [vmem:[%s5273_s9 + $0x70] sm:$0xff]  ;;  %v2896_v22 = vld [vmem:[%s5273_s9 + $0x68] sm:$0xff] }
 0x46e   : > { %2860 = vmatpush.msrb.mxu3 %v2544_v23  ;;  %2801 = vmatpush.msrb.mxu0 %v2348_v24  ;;  %v2444_v53 = vld [vmem:[%s5271_s7 + $0x4b8] sm:$0xff]  ;;  %v2912_v23 = vld [vmem:[%s5273_s9 + $0xe8] sm:$0xff]  ;;  %v2911_v24 = vld [vmem:[%s5273_s9 + $0xe0] sm:$0xff] }
 0x46f   : > { %2842 = vmatpush.msrb.mxu2 %v2472_v25  ;;  %2820 = vmatpush.msrb.mxu1 %v2416_v26  ;;  %v2388_v54 = vld [vmem:[%s5271_s7 + $0x2f8] sm:$0xff]  ;;  %v2893_v25 = vld [vmem:[%s5273_s9 + $0x50] sm:$0xff] }
 0x470   : > { %2861 = vmatpush.msrb.mxu3 %v2540_v27  ;;  %2802 = vmatpush.msrb.mxu0 %v2344_v28  ;;  %v2512_v55 = vld [vmem:[%s5271_s7 + $0x6d8] sm:$0xff]  ;;  %v2892_v27 = vld [vmem:[%s5273_s9 + $0x48] sm:$0xff]  ;;  %v2909_v28 = vld [vmem:[%s5273_s9 + $0xd0] sm:$0xff] }
 0x471   : > { %2843 = vmatpush.msrb.mxu2 %v2468_v29  ;;  %2821 = vmatpush.msrb.mxu1 %v2412_v30  ;;  %v2316_v62 = vld [vmem:[%s5271_s7 + $0xb8] sm:$0xff]  ;;  %v2891_v29 = vld [vmem:[%s5273_s9 + $0x40] sm:$0xff]  ;;  %v2908_v30 = vld [vmem:[%s5273_s9 + $0xc8] sm:$0xff] }
 0x472   : > { %2862 = vmatpush.msrb.mxu3 %v2536_v31  ;;  %2803 = vmatpush.msrb.mxu0 %v2340_v32  ;;  %v2440_v20 = vld [vmem:[%s5271_s7 + $0x498] sm:$0xff]  ;;  %v2907_v32 = vld [vmem:[%s5273_s9 + $0xc0] sm:$0xff] }
 0x473   : > { %2844 = vmatpush.msrb.mxu2 %v2464_v33  ;;  %2822 = vmatpush.msrb.mxu1 %v2408_v34  ;;  %v2384_v57 = vld [vmem:[%s5271_s7 + $0x2d8] sm:$0xff]  ;;  %v2889_v33 = vld [vmem:[%s5273_s9 + $0x30] sm:$0xff] }
 0x474   : > { %2863 = vmatpush.msrb.mxu3 %v2532_v35  ;;  %2804 = vmatpush.msrb.mxu0 %v2336_v36  ;;  %v2508_v58 = vld [vmem:[%s5271_s7 + $0x6b8] sm:$0xff]  ;;  %v2888_v35 = vld [vmem:[%s5273_s9 + $0x28] sm:$0xff]  ;;  %v2905_v36 = vld [vmem:[%s5273_s9 + $0xb0] sm:$0xff] }
 0x475   : > { %2845 = vmatpush.msrb.mxu2 %v2460_v37  ;;  %2823 = vmatpush.msrb.mxu1 %v2404_v38  ;;  %v2312_v61 = vld [vmem:[%s5271_s7 + $0x98] sm:$0xff]  ;;  %v2887_v37 = vld [vmem:[%s5273_s9 + $0x20] sm:$0xff]  ;;  %v2904_v38 = vld [vmem:[%s5273_s9 + $0xa8] sm:$0xff] }
 0x476   : > { %2864 = vmatpush.msrb.mxu3 %v2528_v39  ;;  %2805 = vmatpush.msrb.mxu0 %v2332_v40  ;;  %v2436_v63 = vld [vmem:[%s5271_s7 + $0x478] sm:$0xff]  ;;  %v2903_v40 = vld [vmem:[%s5273_s9 + $0xa0] sm:$0xff] }
 0x477   : > { %2846 = vmatpush.msrb.mxu2 %v2456_v41  ;;  %2824 = vmatpush.msrb.mxu1 %v2400_v46  ;;  %v2380_v0 = vld [vmem:[%s5271_s7 + $0x2b8] sm:$0xff]  ;;  %v2885_v41 = vld [vmem:[%s5273_s9 + $0x10] sm:$0xff] }
 0x478   : > { %2865 = vmatpush.msrb.mxu3 %v2524_v42  ;;  %2806 = vmatpush.msrb.mxu0 %v2328_v43  ;;  %v2504_v1 = vld [vmem:[%s5271_s7 + $0x698] sm:$0xff]  ;;  %v2884_v42 = vld [vmem:[%s5273_s9 + $0x8] sm:$0xff]  ;;  %v2901_v43 = vld [vmem:[%s5273_s9 + $0x90] sm:$0xff] }
 0x479   : > { %2847 = vmatpush.msrb.mxu2 %v2452_v44  ;;  %2825 = vmatpush.msrb.mxu1 %v2396_v45  ;;  %v2308_v3 = vld [vmem:[%s5271_s7 + $0x78] sm:$0xff]  ;;  %v2883_v44 = vld [vmem:[%s5273_s9] sm:$0xff]  ;;  %v2900_v45 = vld [vmem:[%s5273_s9 + $0x88] sm:$0xff] }
 0x47a   : > { %2866 = vmatpush.msrb.mxu3 %v2520_v47  ;;  %2807 = vmatpush.msrb.mxu0 %v2324_v48  ;;  %v2432_v4 = vld [vmem:[%s5271_s7 + $0x458] sm:$0xff]  ;;  %v2899_v48 = vld [vmem:[%s5273_s9 + $0x80] sm:$0xff] }
 0x47b   : > { %2848 = vmatpush.msrb.mxu2 %v2448_v49  ;;  %2826 = vmatpush.msrb.mxu1 %v2392_v50  ;;  %v2376_v5 = vld [vmem:[%s5271_s7 + $0x298] sm:$0xff]  ;;  %v2929_v49 = vld [vmem:[%s5273_s9 + $0x170] sm:$0xff]  ;;  %v2928_v50 = vld [vmem:[%s5273_s9 + $0x168] sm:$0xff] }
 0x47c   : > { %2867 = vmatpush.msrb.mxu3 %v2516_v51  ;;  %2808 = vmatpush.msrb.mxu0 %v2320_v52  ;;  %v2500_v6 = vld [vmem:[%s5271_s7 + $0x678] sm:$0xff]  ;;  %v2927_v51 = vld [vmem:[%s5273_s9 + $0x160] sm:$0xff] }
 0x47d   : > { %2849 = vmatpush.msrb.mxu2 %v2444_v53  ;;  %2827 = vmatpush.msrb.mxu1 %v2388_v54  ;;  %v2304_v7 = vld [vmem:[%s5271_s7 + $0x58] sm:$0xff]  ;;  %v5134_v52 = vld [vmem:[%s5272_s8] sm:$0xf] }
 0x47e   : > { %2868 = vmatpush.msrb.mxu3 %v2512_v55  ;;  %2809 = vmatpush.msrb.mxu0 %v2316_v62  ;;  %v2428_v8 = vld [vmem:[%s5271_s7 + $0x438] sm:$0xff]  ;;  %v2551_v54 = vperm.slane %v5134_v52, 0  ;;  %v2925_v55 = vld [vmem:[%s5273_s9 + $0x150] sm:$0xff]  ;;  %v2924_v62 = vld [vmem:[%s5273_s9 + $0x148] sm:$0xff] }
 0x47f   : > { %2850 = vmatpush.msrb.mxu2 %v2440_v20  ;;  %2828 = vmatpush.msrb.mxu1 %v2384_v57  ;;  %v2372_v9 = vld [vmem:[%s5271_s7 + $0x278] sm:$0xff] }
 0x480   : > { %2869 = vmatpush.msrb.mxu3 %v2508_v58  ;;  %2810 = vmatpush.msrb.mxu0 %v2312_v61  ;;  %v2496_v10 = vld [vmem:[%s5271_s7 + $0x658] sm:$0xff]  ;;  %v2923_v58 = vld [vmem:[%s5273_s9 + $0x140] sm:$0xff] }
 0x481   : > { %2851 = vmatpush.msrb.mxu2 %v2436_v63  ;;  %2829 = vmatpush.msrb.mxu1 %v2380_v0  ;;  %v2300_v11 = vld [vmem:[%s5271_s7 + $0x38] sm:$0xff] }
 0x482   : > { %2870 = vmatpush.msrb.mxu3 %v2504_v1  ;;  %2811 = vmatpush.msrb.mxu0 %v2308_v3  ;;  %v2424_v12 = vld [vmem:[%s5271_s7 + $0x418] sm:$0xff]  ;;  %v2921_v3 = vld [vmem:[%s5273_s9 + $0x130] sm:$0xff] }
 0x483   : > { %2852 = vmatpush.msrb.mxu2 %v2432_v4  ;;  %2830 = vmatpush.msrb.mxu1 %v2376_v5  ;;  %v2368_v13 = vld [vmem:[%s5271_s7 + $0x258] sm:$0xff] }
 0x484   : > { %2871 = vmatpush.msrb.mxu3 %v2500_v6  ;;  %2812 = vmatpush.msrb.mxu0 %v2304_v7  ;;  %v2492_v14 = vld [vmem:[%s5271_s7 + $0x638] sm:$0xff]  ;;  %v2552_v6 = vperm.slane %v5134_v52, 1 }
 0x485   : > { %2853 = vmatpush.msrb.mxu2 %v2428_v8  ;;  %2831 = vmatpush.msrb.mxu1 %v2372_v9  ;;  %v2296_v15 = vld [vmem:[%s5271_s7 + $0x18] sm:$0xff] }
 0x486   : > { %2872 = vmatpush.msrb.mxu3 %v2496_v10  ;;  %2813 = vmatpush.msrb.mxu0 %v2300_v11  ;;  %v2364_v16 = vld [vmem:[%s5271_s7 + $0x238] sm:$0xff]  ;;  %v2920_v11 = vld [vmem:[%s5273_s9 + $0x128] sm:$0xff] }
 0x487   : > { %2854 = vmatpush.msrb.mxu2 %v2424_v12  ;;  %v2488_v17 = vld [vmem:[%s5271_s7 + $0x618] sm:$0xff]  ;;  %2832 = vmatpush.msrb.mxu1 %v2368_v13 }
 0x488   : > { %2873 = vmatpush.msrb.mxu3 %v2492_v14  ;;  %2855 = vmatmul.f32.vlgmr.msrb.gmra.mxu2 %v4567_v56  ;;  %v2360_v18 = vld [vmem:[%s5271_s7 + $0x218] sm:$0xff] }
 0x489   : > { %2814 = vmatpush.msrb.mxu0 %v2296_v15  ;;  %v2898_v19 = vld [vmem:[%s5273_s9 + $0x78] sm:$0xff]  ;;  %2833 = vmatpush.msrb.mxu1 %v2364_v16  ;;  %v2919_v15 = vld [vmem:[%s5273_s9 + $0x120] sm:$0xff] }
 0x48a   : > { %2874 = vmatpush.msrb.mxu3 %v2488_v17  ;;  %2815 = vmatmul.f32.vlgmr.msrb.gmra.mxu0 %v4581_v59  ;;  %v2914_v56 = vld [vmem:[%s5273_s9 + $0xf8] sm:$0xff]  ;;  %v2913_v59 = vld [vmem:[%s5273_s9 + $0xf0] sm:$0xff] }
 0x48b   : > { %2875 = vmatmul.f32.vlgmr.msrb.gmra.mxu3 %v4584_v60  ;;  %2834 = vmatpush.msrb.mxu1 %v2360_v18  ;;  %v2895_v60 = vld [vmem:[%s5273_s9 + $0x60] sm:$0xff]  ;;  %v2910_v26 = vld [vmem:[%s5273_s9 + $0xd8] sm:$0xff] }
 0x48c   : > { %2951 = vmatpush.msra.mxu0 %v2898_v19  ;;  %2835 = vmatmul.f32.vlgmr.msrb.gmra.mxu1 %v4599_v2  ;;  %v2894_v2 = vld [vmem:[%s5273_s9 + $0x58] sm:$0xff] }
 0x48d   : > { %2971 = vmatpush.msra.mxu1 %v2914_v56  ;;  %v2890_v31 = vld [vmem:[%s5273_s9 + $0x38] sm:$0xff] }
 0x48e   : > { %2952 = vmatpush.msra.mxu0 %v2897_v21  ;;  %v2906_v34 = vld [vmem:[%s5273_s9 + $0xb8] sm:$0xff]  ;;  %v2917_v21 = vld [vmem:[%s5273_s9 + $0x110] sm:$0xff] }
 0x48f   : > { %2972 = vmatpush.msra.mxu1 %v2913_v59  ;;  %v2886_v39 = vld [vmem:[%s5273_s9 + $0x18] sm:$0xff]  ;;  %v2915_v59 = vld [vmem:[%s5273_s9 + $0x100] sm:$0xff] }
 0x490   : > { %2953 = vmatpush.msra.mxu0 %v2896_v22  ;;  %v2902_v46 = vld [vmem:[%s5273_s9 + $0x98] sm:$0xff]  ;;  %v2916_v22 = vld [vmem:[%s5273_s9 + $0x108] sm:$0xff] }
 0x491   : > { %2973 = vmatpush.msra.mxu1 %v2912_v23  ;;  %v2930_v47 = vld [vmem:[%s5273_s9 + $0x178] sm:$0xff]  ;;  %v2945_v23 = vld [vmem:[%s5273_s9 + $0x1f0] sm:$0xff] }
 0x492   : > { %2954 = vmatpush.msra.mxu0 %v2895_v60  ;;  %2991 = vmatpush.msra.mxu2 %v2930_v47  ;;  %v2926_v53 = vld [vmem:[%s5273_s9 + $0x158] sm:$0xff]  ;;  %v2554_v47 = vperm.slane %v5134_v52, 3 }
 0x493   : > { %2974 = vmatpush.msra.mxu1 %v2911_v24  ;;  %v2922_v63 = vld [vmem:[%s5273_s9 + $0x138] sm:$0xff]  ;;  %v2943_v24 = vld [vmem:[%s5273_s9 + $0x1e0] sm:$0xff] }
 0x494   : > { %2955 = vmatpush.msra.mxu0 %v2894_v2  ;;  %2992 = vmatpush.msra.mxu2 %v2929_v49  ;;  %v2918_v17 = vld [vmem:[%s5273_s9 + $0x118] sm:$0xff]  ;;  %v2944_v2 = vld [vmem:[%s5273_s9 + $0x1e8] sm:$0xff] }
 0x495   : > { %2975 = vmatpush.msra.mxu1 %v2910_v26  ;;  %v2946_v60 = vld [vmem:[%s5273_s9 + $0x1f8] sm:$0xff]  ;;  %v2941_v26 = vld [vmem:[%s5273_s9 + $0x1d0] sm:$0xff] }
 0x496   : > { %2956 = vmatpush.msra.mxu0 %v2893_v25  ;;  %2993 = vmatpush.msra.mxu2 %v2928_v50  ;;  %v2942_v25 = vld [vmem:[%s5273_s9 + $0x1d8] sm:$0xff] }
 0x497   : > { %2976 = vmatpush.msra.mxu1 %v2909_v28  ;;  %3011 = vmatpush.msra.mxu3 %v2946_v60  ;;  %v2939_v28 = vld [vmem:[%s5273_s9 + $0x1c0] sm:$0xff] }
 0x498   : > { %2957 = vmatpush.msra.mxu0 %v2892_v27  ;;  %2994 = vmatpush.msra.mxu2 %v2927_v51  ;;  %v2940_v27 = vld [vmem:[%s5273_s9 + $0x1c8] sm:$0xff] }
 0x499   : > { %2977 = vmatpush.msra.mxu1 %v2908_v30  ;;  %3012 = vmatpush.msra.mxu3 %v2945_v23  ;;  %v2553_v30 = vperm.slane %v5134_v52, 2 }
 0x49a   : > { %2958 = vmatpush.msra.mxu0 %v2891_v29  ;;  %2995 = vmatpush.msra.mxu2 %v2926_v53  ;;  %v2938_v29 = vld [vmem:[%s5273_s9 + $0x1b8] sm:$0xff] }
 0x49b   : > { %2978 = vmatpush.msra.mxu1 %v2907_v32  ;;  %3013 = vmatpush.msra.mxu3 %v2944_v2 }
 0x49c   : > { %2959 = vmatpush.msra.mxu0 %v2890_v31  ;;  %2996 = vmatpush.msra.mxu2 %v2925_v55  ;;  %v2937_v31 = vld [vmem:[%s5273_s9 + $0x1b0] sm:$0xff] }
 0x49d   : > { %2979 = vmatpush.msra.mxu1 %v2906_v34  ;;  %3014 = vmatpush.msra.mxu3 %v2943_v24  ;;  %v2936_v34 = vld [vmem:[%s5273_s9 + $0x1a8] sm:$0xff] }
 0x49e   : > { %2960 = vmatpush.msra.mxu0 %v2889_v33  ;;  %2997 = vmatpush.msra.mxu2 %v2924_v62 }
 0x49f   : > { %2980 = vmatpush.msra.mxu1 %v2905_v36  ;;  %3015 = vmatpush.msra.mxu3 %v2942_v25 }
 0x4a0   : > { %2961 = vmatpush.msra.mxu0 %v2888_v35  ;;  %2998 = vmatpush.msra.mxu2 %v2923_v58  ;;  %v2935_v35 = vld [vmem:[%s5273_s9 + $0x1a0] sm:$0xff] }
 0x4a1   : > { %2981 = vmatpush.msra.mxu1 %v2904_v38  ;;  %3016 = vmatpush.msra.mxu3 %v2941_v26 }
 0x4a2   : > { %2962 = vmatpush.msra.mxu0 %v2887_v37  ;;  %2999 = vmatpush.msra.mxu2 %v2922_v63 }
 0x4a3   : > { %2982 = vmatpush.msra.mxu1 %v2903_v40  ;;  %3017 = vmatpush.msra.mxu3 %v2940_v27 }
 0x4a4   : > { %2963 = vmatpush.msra.mxu0 %v2886_v39  ;;  %3000 = vmatpush.msra.mxu2 %v2921_v3  ;;  %v2934_v39 = vld [vmem:[%s5273_s9 + $0x198] sm:$0xff] }
 0x4a5   : > { %2983 = vmatpush.msra.mxu1 %v2902_v46  ;;  %3018 = vmatpush.msra.mxu3 %v2939_v28  ;;  %v2933_v46 = vld [vmem:[%s5273_s9 + $0x190] sm:$0xff] }
 0x4a6   : > { %2964 = vmatpush.msra.mxu0 %v2885_v41  ;;  %3001 = vmatpush.msra.mxu2 %v2920_v11 }
 0x4a7   : > { %2984 = vmatpush.msra.mxu1 %v2901_v43  ;;  %3019 = vmatpush.msra.mxu3 %v2938_v29  ;;  %v2932_v43 = vld [vmem:[%s5273_s9 + $0x188] sm:$0xff] }
 0x4a8   : > { %2965 = vmatpush.msra.mxu0 %v2884_v42  ;;  %3002 = vmatpush.msra.mxu2 %v2919_v15 }
 0x4a9   : > { %2985 = vmatpush.msra.mxu1 %v2900_v45  ;;  %3020 = vmatpush.msra.mxu3 %v2937_v31  ;;  %v2931_v45 = vld [vmem:[%s5273_s9 + $0x180] sm:$0xff] }
 0x4aa   : > { %2966 = vmatpush.msra.mxu0 %v2883_v44  ;;  %3003 = vmatpush.msra.mxu2 %v2918_v17 }
 0x4ab   : > { %2986 = vmatpush.msra.mxu1 %v2899_v48  ;;  %3021 = vmatpush.msra.mxu3 %v2936_v34 }
 0x4ac   : > { %3004 = vmatpush.msra.mxu2 %v2917_v21 }
 0x4ad   : > { %3022 = vmatpush.msra.mxu3 %v2935_v35 }
 0x4ae   : > { %3005 = vmatpush.msra.mxu2 %v2916_v22 }
 0x4af   : > { %3023 = vmatpush.msra.mxu3 %v2934_v39 }
 0x4b0   : > { %3006 = vmatpush.msra.mxu2 %v2915_v59 }
 0x4b1   : > { %3024 = vmatpush.msra.mxu3 %v2933_v46 }
 0x4b3   : > { %3025 = vmatpush.msra.mxu3 %v2932_v43 }
 0x4b5   : > { %3026 = vmatpush.msra.mxu3 %v2931_v45 }
 0x4bc   : > { %v2576_v20 = vpop.f32.mrf.mxu0 }
 0x4bd   : > { %v2577_v57 = vadd.f32 %v2576_v20, %v2551_v54 }
 0x4be   : > { %v2616_v1 = vpop.f32.mrf.mxu2 }
 0x4bf   : > { %v2596_v61 = vpop.f32.mrf.mxu1 }
 0x4c0   : > { %v2597_v0 = vadd.f32 %v2596_v61, %v2577_v57  ;;  %v3393_v57 = vld [vmem:[%s5274_s10] ss:$0 sm:$0xff] }
 0x4c2   : > { %v2617_v4 = vadd.f32 %v2616_v1, %v2597_v0  ;;  %v2636_v5 = vpop.f32.mrf.mxu3 }
 0x4c4   : > { %v2637_v7 = vadd.f32 %v2636_v5, %v2617_v4 }
 0x4c6   : > { %v2879_v8 = vmax.f32 %v2637_v7, 0.0  ;;  %v2656_v9 = vpop.f32.mrf.mxu0 }
 0x4c7   : > { %v2657_v10 = vadd.f32 %v2656_v9, %v2552_v6 }
 0x4c8   : > { %2967 = vmatmul.f32.vlgmr.msra.gmra.mxu0 %v2879_v8 }
 0x4c9   : > { %v2676_v12 = vpop.f32.mrf.mxu1  ;;  %v2696_v14 = vpop.f32.mrf.mxu2 }
 0x4ca   : > { %v2677_v13 = vadd.f32 %v2676_v12, %v2657_v10 }
 0x4cc   : > { %v2697_v16 = vadd.f32 %v2696_v14, %v2677_v13  ;;  %v2716_v18 = vpop.f32.mrf.mxu3 }
 0x4ce   : > { %v2717_v19 = vadd.f32 %v2716_v18, %v2697_v16 }
 0x4d0   : > { %v2880_v56 = vmax.f32 %v2717_v19, 0.0 }
 0x4d2   : > { %2987 = vmatmul.f32.vlgmr.msra.gmra.mxu1 %v2880_v56 }
 0x4e6   : > { %v2736_v32 = vpop.f32.mrf.mxu0 }
 0x4e7   : > { %v2737_v33 = vadd.f32 %v2736_v32, %v2553_v30 }
 0x4e9   : > { %v2756_v36 = vpop.f32.mrf.mxu1  ;;  %v2776_v37 = vpop.f32.mrf.mxu2 }
 0x4ea   : > { %v2757_v38 = vadd.f32 %v2756_v36, %v2737_v33 }
 0x4ec   : > { %v2777_v40 = vadd.f32 %v2776_v37, %v2757_v38  ;;  %v2796_v41 = vpop.f32.mrf.mxu3 }
 0x4ee   : > { %v2797_v42 = vadd.f32 %v2796_v41, %v2777_v40 }
 0x4f0   : > { %v2881_v44 = vmax.f32 %v2797_v42, 0.0 }
 0x4f2   : > { %3007 = vmatmul.f32.vlgmr.msra.gmra.mxu2 %v2881_v44 }
 0x507   : > { %v2816_v48 = vpop.f32.mrf.mxu0 }
 0x508   : > { %v2817_v49 = vadd.f32 %v2816_v48, %v2554_v47 }
 0x509   : > { %v2836_v50 = vpop.f32.mrf.mxu1 }
 0x50a   : > { %v2837_v51 = vadd.f32 %v2836_v50, %v2817_v49 }
 0x50b   : > { %v2856_v53 = vpop.f32.mrf.mxu2 }
 0x50c   : > { %v2857_v54 = vadd.f32 %v2856_v53, %v2837_v51 }
 0x50e   : > { %v2876_v55 = vpop.f32.mrf.mxu3 }
 0x50f   : > { %v2877_v62 = vadd.f32 %v2876_v55, %v2857_v54 }
 0x511   : > { %v2882_v20 = vmax.f32 %v2877_v62, 0.0 }
 0x513   : > { %3027 = vmatmul.f32.vlgmr.msra.gmra.mxu3 %v2882_v20 }
 0x545   : > { %v2968_v58 = vpop.f32.mrf.mxu0 }
 0x546   : > { %v2969_v61 = vadd.f32 %v3393_v57, %v2968_v58 }
 0x54f   : > { %v2988_v52 = vpop.f32.mrf.mxu1 }
 0x550   : > { %v2989_v0 = vadd.f32 %v2988_v52, %v2969_v61 }
 0x575   : > { %v3008_v63 = vpop.f32.mrf.mxu2 }
 0x576   : > { %v3009_v1 = vadd.f32 %v3008_v63, %v2989_v0 }
 0x596   : > { %v3028_v3 = vpop.f32.mrf.mxu3 }
 0x597   : > { %v3029_v4 = vadd.f32 %v3028_v3, %v3009_v1 }
 0x599   : > { %3031 = vst [vmem:[%s5297_s14] sm:$0xff] %v3029_v4 }
 0x59a   : > { %3421 = shalt.err (!%p3418_p4)
}
 0x59b   : > { %3229 = dma.vmem_to_hbm [thread:$0]  (%p3564_p5), %s3046_s2, 128, %s3048_s3, %s3033_s0  }
 0x59c PF: > { %p3235_p7 = scmp.ge.s32.totalorder %s3460_s20, 2  ;;  %s3059_s12 = sand.u32 1, %s3448_s17  }
 0x59d   : > { %s3060_s24 = scalar_lea.sflag [#allocation9], %s3059_s12 }
 0x59e   : > { %p3232_p8 = pnand %p3235_p7, %p3568_p6 }
 0x5a0   : > { %p3233_p9 = pneg %p3232_p8 }
 0x5a2   : > { %3443 = dma.done.wait (%p3233_p9), %s3060_s24, 128  }
 0x5a3   : > { %3445 = vsyncadd (%p3233_p9), %s3060_s24, 4294967168  ;;  %p21_p10 = scmp.ge.s32.totalorder %s3552_s23, 4   ;;  %s5299_s17 = smov %s3452_s18 }
 0x5a4   : > { %s5300_s18 = smov %s3456_s19  ;;  %s5301_s19 = smov %s3562_s26 }
 0x5a5   : > { %s5302_s20 = smov %s3552_s23  ;;  %23 = sbr.rel (!%p21_p10) target bundleno = 8 (0x8), region = 252 }
 0x5aa   :  { %3066 = vsyncpa [#allocation9], 1 }
 0x5ab   :  { %3068 = vsyncpa [#allocation9 + $0x1], 1 }

</bundles_post_ra>
